<compile_context>
chip_gen: v7x
topology: tpu7x:2x2x1
jax: 0.10.0
libtpu: 0.0.40
codegen_flags: <defaults>
</compile_context>

<pallas_src>
import jax
import jax.numpy as jnp
import numpy as np
from jax.experimental import pallas as pl
from jax.experimental.pallas import tpu as pltpu

LATENT = 256
HIDDEN = 1024
NUM_CLASSES = 1
OUT_PAD = 128          # lane-dense padded width of the final layer
TB_MAX = 256           # batch rows per grid step


def _mlp_kernel(h_ref, w1_ref, b1_ref, w2_ref, b2_ref, w3_ref, b3_ref, o_ref):
    # bf16 operands into the MXU, f32 accumulation, f32 element-wise math.
    z1 = jnp.dot(h_ref[...], w1_ref[...],
                 preferred_element_type=jnp.float32) + b1_ref[...]
    a1 = jnp.maximum(z1, 0.0).astype(jnp.bfloat16)            # ReLU

    z2 = jnp.dot(a1, w2_ref[...],
                 preferred_element_type=jnp.float32) + b2_ref[...]
    a2 = jnp.maximum(z2, 0.0).astype(jnp.bfloat16)            # ReLU

    z3 = jnp.dot(a2, w3_ref[...],
                 preferred_element_type=jnp.float32) + b3_ref[...]
    # Sigmoid: exp on the EUP, reciprocal instead of a VPU divide sequence.
    o_ref[...] = pl.reciprocal(1.0 + jnp.exp(-z3), approx=False)


def discriminator_forward(h, params):
    """h: [B, LATENT] float32 -> [B, NUM_CLASSES] float32."""
    w1, b1, w2, b2, w3, b3 = params
    B = h.shape[0]

    b_aligned = ((B + 7) // 8) * 8                 # sublane alignment
    TB = min(TB_MAX, b_aligned)
    grid = (pl.cdiv(b_aligned, TB),)
    b_full = grid[0] * TB

    hb = h.astype(jnp.bfloat16)                    # halve input DMA bytes
    if b_full != B:
        hb = jnp.pad(hb, ((0, b_full - B), (0, 0)))

    def resident(arr):
        # Constant block index across the grid => loaded once, stays in VMEM.
        return pl.BlockSpec(arr.shape, lambda i: (0,) * arr.ndim)

    out = pl.pallas_call(
        _mlp_kernel,
        out_shape=jax.ShapeDtypeStruct((b_full, OUT_PAD), jnp.float32),
        grid=grid,
        in_specs=[
            pl.BlockSpec((TB, LATENT), lambda i: (i, 0)),   # batch-tiled input
            resident(w1), resident(b1),
            resident(w2), resident(b2),
            resident(w3), resident(b3),
        ],
        out_specs=pl.BlockSpec((TB, OUT_PAD), lambda i: (i, 0)),
        compiler_params=pltpu.CompilerParams(
            dimension_semantics=("parallel",),     # megacore split on v7x
            vmem_limit_bytes=32 << 20,             # ~8 MiB actually needed
        ),
    )(hb, w1, b1, w2, b2, w3, b3)

    return out[:B, :NUM_CLASSES]


def init_params(key):
    """PyTorch nn.Linear default init U(-1/sqrt(fan_in), +).  Weights stored
    [in, out] in bf16, biases [1, out] in f32; final layer padded to OUT_PAD."""
    ks = jax.random.split(key, 6)

    def linear(kw, kb, fan_in, fan_out, pad_to=None):
        bound = 1.0 / np.sqrt(fan_in)
        w = jax.random.uniform(kw, (fan_in, fan_out), jnp.float32, -bound, bound)
        b = jax.random.uniform(kb, (1, fan_out), jnp.float32, -bound, bound)
        if pad_to is not None and pad_to > fan_out:
            w = jnp.pad(w, ((0, 0), (0, pad_to - fan_out)))
            b = jnp.pad(b, ((0, 0), (0, pad_to - fan_out)))
        return w.astype(jnp.bfloat16), b

    w1, b1 = linear(ks[0], ks[1], LATENT, HIDDEN)
    w2, b2 = linear(ks[2], ks[3], HIDDEN, HIDDEN)
    w3, b3 = linear(ks[4], ks[5], HIDDEN, NUM_CLASSES, pad_to=OUT_PAD)
    return (w1, b1, w2, b2, w3, b3)


def reference_forward(h, params):
    """Mirrors the kernel's numerics exactly (bf16 MXU operands, f32 accum)."""
    w1, b1, w2, b2, w3, b3 = params
    z1 = jnp.dot(h.astype(jnp.bfloat16), w1, preferred_element_type=jnp.float32) + b1
    a1 = jnp.maximum(z1, 0.0).astype(jnp.bfloat16)
    z2 = jnp.dot(a1, w2, preferred_element_type=jnp.float32) + b2
    a2 = jnp.maximum(z2, 0.0).astype(jnp.bfloat16)
    z3 = jnp.dot(a2, w3, preferred_element_type=jnp.float32) + b3
    return (1.0 / (1.0 + jnp.exp(-z3)))[:, :NUM_CLASSES]


def reference_forward_f32(h, params):
    """Full-f32 reference (PyTorch semantics) for a loose semantic check."""
    w1, b1, w2, b2, w3, b3 = params
    a1 = jnp.maximum(h @ w1.astype(jnp.float32) + b1, 0.0)
    a2 = jnp.maximum(a1 @ w2.astype(jnp.float32) + b2, 0.0)
    return jax.nn.sigmoid(a2 @ w3.astype(jnp.float32) + b3)[:, :NUM_CLASSES]


if __name__ == "__main__":
    key = jax.random.PRNGKey(0)
    k_h, k_p = jax.random.split(key)

    B = 8  # small, sublane-aligned batch
    h = jax.random.normal(k_h, (B, LATENT), dtype=jnp.float32)
    params = init_params(k_p)

    y = jax.block_until_ready(discriminator_forward(h, params))
    assert y.shape == (B, NUM_CLASSES)

    np.testing.assert_allclose(np.asarray(y),
                               np.asarray(reference_forward(h, params)),
                               rtol=1e-4, atol=1e-4)
    np.testing.assert_allclose(np.asarray(y),
                               np.asarray(reference_forward_f32(h, params)),
                               rtol=0.05, atol=0.03)

    # Exercise the multi-tile / padded batch path (grid > 1, B not 8-aligned).
    B2 = 300
    h2 = jax.random.normal(k_h, (B2, LATENT), dtype=jnp.float32)
    y2 = jax.block_until_ready(discriminator_forward(h2, params))
    assert y2.shape == (B2, NUM_CLASSES)
    np.testing.assert_allclose(np.asarray(y2),
                               np.asarray(reference_forward(h2, params)),
                               rtol=1e-4, atol=1e-4)

    print("KERNEL_OK")
</pallas_src>

<mosaic_0001>
module attributes {stable_mosaic.version = 11 : i64} {
  func.func @_mlp_kernel(%arg0: i32, %arg1: memref<8x256xbf16, #tpu.memory_space<vmem>>, %arg2: memref<256x1024xbf16, #tpu.memory_space<vmem>>, %arg3: memref<1x1024xf32, #tpu.memory_space<vmem>>, %arg4: memref<1024x1024xbf16, #tpu.memory_space<vmem>>, %arg5: memref<1x1024xf32, #tpu.memory_space<vmem>>, %arg6: memref<1024x128xbf16, #tpu.memory_space<vmem>>, %arg7: memref<1x128xf32, #tpu.memory_space<vmem>>, %arg8: memref<8x128xf32, #tpu.memory_space<vmem>>) attributes {dimension_semantics = [#tpu.dimension_semantics<parallel>], iteration_bounds = array<i64: 1>, scalar_prefetch = 0 : i64, scratch_operands = 0 : i64, tpu.core_type = #tpu.core_type<tc>, window_params = [{transform_indices = @transform_0, window_bounds = array<i64: 8, 256>}, {pipeline_mode = #tpu.pipeline_mode<synchronous>, transform_indices = @transform_1, window_bounds = array<i64: 256, 1024>}, {pipeline_mode = #tpu.pipeline_mode<synchronous>, transform_indices = @transform_2, window_bounds = array<i64: 1, 1024>}, {pipeline_mode = #tpu.pipeline_mode<synchronous>, transform_indices = @transform_3, window_bounds = array<i64: 1024, 1024>}, {pipeline_mode = #tpu.pipeline_mode<synchronous>, transform_indices = @transform_4, window_bounds = array<i64: 1, 1024>}, {pipeline_mode = #tpu.pipeline_mode<synchronous>, transform_indices = @transform_5, window_bounds = array<i64: 1024, 128>}, {pipeline_mode = #tpu.pipeline_mode<synchronous>, transform_indices = @transform_6, window_bounds = array<i64: 1, 128>}, {transform_indices = @transform_7, window_bounds = array<i64: 8, 128>}]} {
    %c0 = arith.constant 0 : index
    %c0_0 = arith.constant 0 : index
    %0 = vector.load %arg1[%c0, %c0_0] : memref<8x256xbf16, #tpu.memory_space<vmem>>, vector<8x256xbf16>
    %c0_1 = arith.constant 0 : index
    %c0_2 = arith.constant 0 : index
    %1 = vector.load %arg2[%c0_1, %c0_2] : memref<256x1024xbf16, #tpu.memory_space<vmem>>, vector<256x1024xbf16>
    %cst = arith.constant dense<0.000000e+00> : vector<8x1024xf32>
    %2 = tpu.matmul %0, %1, %cst {dimension_numbers = #tpu.dot_dimension_numbers<[1], [0], [0], [1], [0, 0, 1, 1], [], []>} : vector<8x256xbf16>, vector<256x1024xbf16>, vector<8x1024xf32> -> vector<8x1024xf32>
    %c0_3 = arith.constant 0 : index
    %c0_4 = arith.constant 0 : index
    %3 = vector.load %arg3[%c0_3, %c0_4] : memref<1x1024xf32, #tpu.memory_space<vmem>>, vector<1x1024xf32>
    %4 = vector.broadcast %3 : vector<1x1024xf32> to vector<8x1024xf32>
    %5 = arith.addf %2, %4 : vector<8x1024xf32>
    %cst_5 = arith.constant 0.000000e+00 : f32
    %6 = vector.broadcast %cst_5 : f32 to vector<8x1024xf32>
    %7 = arith.maximumf %5, %6 : vector<8x1024xf32>
    %8 = arith.truncf %7 : vector<8x1024xf32> to vector<8x1024xbf16>
    %c0_6 = arith.constant 0 : index
    %c0_7 = arith.constant 0 : index
    %9 = vector.load %arg4[%c0_6, %c0_7] : memref<1024x1024xbf16, #tpu.memory_space<vmem>>, vector<1024x1024xbf16>
    %cst_8 = arith.constant dense<0.000000e+00> : vector<8x1024xf32>
    %10 = tpu.matmul %8, %9, %cst_8 {dimension_numbers = #tpu.dot_dimension_numbers<[1], [0], [0], [1], [0, 0, 1, 1], [], []>} : vector<8x1024xbf16>, vector<1024x1024xbf16>, vector<8x1024xf32> -> vector<8x1024xf32>
    %c0_9 = arith.constant 0 : index
    %c0_10 = arith.constant 0 : index
    %11 = vector.load %arg5[%c0_9, %c0_10] : memref<1x1024xf32, #tpu.memory_space<vmem>>, vector<1x1024xf32>
    %12 = vector.broadcast %11 : vector<1x1024xf32> to vector<8x1024xf32>
    %13 = arith.addf %10, %12 : vector<8x1024xf32>
    %cst_11 = arith.constant 0.000000e+00 : f32
    %14 = vector.broadcast %cst_11 : f32 to vector<8x1024xf32>
    %15 = arith.maximumf %13, %14 : vector<8x1024xf32>
    %16 = arith.truncf %15 : vector<8x1024xf32> to vector<8x1024xbf16>
    %c0_12 = arith.constant 0 : index
    %c0_13 = arith.constant 0 : index
    %17 = vector.load %arg6[%c0_12, %c0_13] : memref<1024x128xbf16, #tpu.memory_space<vmem>>, vector<1024x128xbf16>
    %cst_14 = arith.constant dense<0.000000e+00> : vector<8x128xf32>
    %18 = tpu.matmul %16, %17, %cst_14 {dimension_numbers = #tpu.dot_dimension_numbers<[1], [0], [0], [1], [0, 0, 1, 1], [], []>} : vector<8x1024xbf16>, vector<1024x128xbf16>, vector<8x128xf32> -> vector<8x128xf32>
    %c0_15 = arith.constant 0 : index
    %c0_16 = arith.constant 0 : index
    %19 = vector.load %arg7[%c0_15, %c0_16] : memref<1x128xf32, #tpu.memory_space<vmem>>, vector<1x128xf32>
    %20 = vector.broadcast %19 : vector<1x128xf32> to vector<8x128xf32>
    %21 = arith.addf %18, %20 : vector<8x128xf32>
    %cst_17 = arith.constant 0.000000e+00 : f32
    %22 = vector.broadcast %cst_17 : f32 to vector<8x128xf32>
    %23 = arith.subf %22, %21 : vector<8x128xf32>
    %24 = math.exp %23 : vector<8x128xf32>
    %cst_18 = arith.constant 1.000000e+00 : f32
    %25 = vector.broadcast %cst_18 : f32 to vector<8x128xf32>
    %26 = arith.addf %25, %24 : vector<8x128xf32>
    %27 = tpu.reciprocal %26 : vector<8x128xf32> -> vector<8x128xf32>
    %c0_19 = arith.constant 0 : index
    %c0_20 = arith.constant 0 : index
    %28 = vector.load %arg8[%c0_19, %c0_20] : memref<8x128xf32, #tpu.memory_space<vmem>>, vector<8x128xf32>
    tpu.vector_store %arg8[%c0_19, %c0_20], %27 {strides = array<i32>} : memref<8x128xf32, #tpu.memory_space<vmem>>, vector<8x128xf32>,
    return
  }
  func.func @transform_0(%arg0: i32) -> (i32, i32) {
    %c0_i32 = arith.constant 0 : i32
    %c0_i32_0 = arith.constant 0 : i32
    return %arg0, %c0_i32 : i32, i32
  }
  func.func @transform_1(%arg0: i32) -> (i32, i32) {
    %c0_i32 = arith.constant 0 : i32
    %c0_i32_0 = arith.constant 0 : i32
    %c0_i32_1 = arith.constant 0 : i32
    return %c0_i32, %c0_i32_0 : i32, i32
  }
  func.func @transform_2(%arg0: i32) -> (i32, i32) {
    %c0_i32 = arith.constant 0 : i32
    %c0_i32_0 = arith.constant 0 : i32
    %c0_i32_1 = arith.constant 0 : i32
    return %c0_i32, %c0_i32_0 : i32, i32
  }
  func.func @transform_3(%arg0: i32) -> (i32, i32) {
    %c0_i32 = arith.constant 0 : i32
    %c0_i32_0 = arith.constant 0 : i32
    %c0_i32_1 = arith.constant 0 : i32
    return %c0_i32, %c0_i32_0 : i32, i32
  }
  func.func @transform_4(%arg0: i32) -> (i32, i32) {
    %c0_i32 = arith.constant 0 : i32
    %c0_i32_0 = arith.constant 0 : i32
    %c0_i32_1 = arith.constant 0 : i32
    return %c0_i32, %c0_i32_0 : i32, i32
  }
  func.func @transform_5(%arg0: i32) -> (i32, i32) {
    %c0_i32 = arith.constant 0 : i32
    %c0_i32_0 = arith.constant 0 : i32
    %c0_i32_1 = arith.constant 0 : i32
    return %c0_i32, %c0_i32_0 : i32, i32
  }
  func.func @transform_6(%arg0: i32) -> (i32, i32) {
    %c0_i32 = arith.constant 0 : i32
    %c0_i32_0 = arith.constant 0 : i32
    %c0_i32_1 = arith.constant 0 : i32
    return %c0_i32, %c0_i32_0 : i32, i32
  }
  func.func @transform_7(%arg0: i32) -> (i32, i32) {
    %c0_i32 = arith.constant 0 : i32
    %c0_i32_0 = arith.constant 0 : i32
    return %arg0, %c0_i32 : i32, i32
  }
}

</mosaic_0001>

<bundles_post_ra>
// kernel: tpu_custom_call.1
= control target key start
LH: loop header
LB: loop body
LE: loop exit
PB: predicated region body
PF: predicated region fallthrough
CT: control target
= control target key end

     0   :  { %12 = vsyncpa [#allocation3], 0  ;;  %s7043_s0 = inlined_call_operand.hbm [shape: bf16[8,256], index: 0, kind: input, shape index: {}]   ;;  %s7044_s1 = inlined_call_operand.hbm [shape: bf16[256,1024], index: 1, kind: input, shape index: {}]   ;;  %s7045_s2 = inlined_call_operand.hbm [shape: f32[1,1024], index: 2, kind: input, shape index: {}]   ;;  %s7046_s3 = inlined_call_operand.hbm [shape: bf16[1024,1024], index: 3, kind: input, shape index: {}]   ;;  %s7047_s4 = inlined_call_operand.hbm [shape: f32[1,1024], index: 4, kind: input, shape index: {}]   ;;  %s7048_s5 = inlined_call_operand.hbm [shape: bf16[1024,128], index: 5, kind: input, shape index: {}]   ;;  %s7049_s6 = inlined_call_operand.hbm [shape: f32[1,128], index: 6, kind: input, shape index: {}]   ;;  %s7050_s7 = inlined_call_operand.hbm [shape: f32[8,128], index: 7, kind: output, shape index: {}]  }
   0x1   :  { %13 = vsyncpa [#allocation6], 0 }
   0x2   :  { %14 = vsyncpa [#allocation9], 0 }
   0x3   :  { %15 = vsyncpa [#allocation12], 0 }
   0x4   :  { %16 = vsyncpa [#allocation4], 0  ;;  %s6722_s24 = smov [#allocation5]   ;;  %s6536_s28 = scalar_lea.hbm %s7044_s1, 16384 }
   0x5   :  { %s32_s25 = sshll.u32 %s6722_s24, 4  ;;  %p6537_p0 = scmp.ne.s32.totalorder %s7044_s1, %s6536_s28  ;;  %s33_s25 = int_to_ptr.vmem [resolvable:$true] %s32_s25 }
   0x6   :  { %p6540_p1 = scmp.lt.u32.totalorder %s6536_s28, %s7044_s1 }
   0x8   :  { %p6542_p2 = pnand %p6540_p1, %p6537_p0 }
   0xa   :  { %6545 = shalt.err (!%p6542_p2)
}
   0xb   :  { %s6546_s10 = scalar_lea.vmem %s33_s25, 16384  ;;  %p6551_p4 = scmp.lt.s32.totalorder %s33_s25, %s33_s25 }
   0xc   :  { %p6547_p3 = scmp.ne.s32.totalorder %s33_s25, %s6546_s10  ;;  %p6552_p5 = scmp.lt.s32.totalorder %s6546_s10, %s6546_s10 }
   0xe   :  { %p6553_p6 = por %p6552_p5, %p6551_p4 }
  0x10   :  { %p6554_p7 = pnand %p6553_p6, %p6547_p3 }
  0x12   :  { %6557 = shalt.err (!%p6554_p7)
}
  0x13   :  { %s6723_s11 = smov 512   ;;  %s6724_s12 = smov 32  }
  0x14   :  { %38 = dma.hbm_to_vmem [thread:$0]  %s7044_s1, 16384, %s33_s25, [#allocation6], %s6723_s11, %s6723_s11, %s6724_s12  }
  0x15   :  { %s6725_s15 = smov [#allocation8]   ;;  %s6726_s17 = smov [#allocation11]  }
  0x16   :  { %s54_s16 = sshll.u32 %s6725_s15, 4  ;;  %s76_s18 = sshll.u32 %s6726_s17, 4  ;;  %s55_s16 = int_to_ptr.vmem [resolvable:$true] %s54_s16  ;;  %s77_s18 = int_to_ptr.vmem [resolvable:$true] %s76_s18 }
  0x17   :  { %s6558_s21 = scalar_lea.hbm %s7046_s3, 65536 }
  0x18   :  { %p6559_p8 = scmp.ne.s32.totalorder %s7046_s3, %s6558_s21  ;;  %p6562_p9 = scmp.lt.u32.totalorder %s6558_s21, %s7046_s3 }
  0x1a   :  { %p6564_p10 = pnand %p6562_p9, %p6559_p8 }
  0x1c   :  { %6567 = shalt.err (!%p6564_p10)
}
  0x1d   :  { %s6568_s1 = scalar_lea.vmem %s55_s16, 65536  ;;  %p6573_p12 = scmp.lt.s32.totalorder %s55_s16, %s55_s16 }
  0x1e   :  { %p6569_p11 = scmp.ne.s32.totalorder %s55_s16, %s6568_s1  ;;  %p6574_p13 = scmp.lt.s32.totalorder %s6568_s1, %s6568_s1 }
  0x20   :  { %p6575_p0 = por %p6574_p13, %p6573_p12 }
  0x22   :  { %p6576_p1 = pnand %p6575_p0, %p6569_p11 }
  0x24   :  { %6579 = shalt.err (!%p6576_p1)
}
  0x25   :  { %60 = dma.hbm_to_vmem [thread:$0]  %s7046_s3, 65536, %s55_s16, [#allocation9], %s6723_s11, %s6723_s11, %s6724_s12  }
  0x26   :  { %s6580_s30 = scalar_lea.hbm %s7048_s5, 8192 }
  0x27   :  { %p6581_p2 = scmp.ne.s32.totalorder %s7048_s5, %s6580_s30  ;;  %p6584_p3 = scmp.lt.u32.totalorder %s6580_s30, %s7048_s5 }
  0x29   :  { %p6586_p4 = pnand %p6584_p3, %p6581_p2 }
  0x2b   :  { %6589 = shalt.err (!%p6586_p4)
}
  0x2c   :  { %s6590_s14 = scalar_lea.vmem %s77_s18, 8192  ;;  %p6595_p6 = scmp.lt.s32.totalorder %s77_s18, %s77_s18 }
  0x2d   :  { %p6591_p5 = scmp.ne.s32.totalorder %s77_s18, %s6590_s14  ;;  %p6596_p7 = scmp.lt.s32.totalorder %s6590_s14, %s6590_s14 }
  0x2f   :  { %p6597_p8 = por %p6596_p7, %p6595_p6 }
  0x31   :  { %p6598_p9 = pnand %p6597_p8, %p6591_p5 }
  0x33   :  { %6601 = shalt.err (!%p6598_p9)
}
  0x34   :  { %s6727_s3 = smov 64   ;;  %s6728_s11 = smov 4  }
  0x35   :  { %82 = dma.hbm_to_vmem [thread:$0]  %s7048_s5, 8192, %s77_s18, [#allocation12], %s6727_s3, %s6727_s3, %s6728_s11  }
  0x36   :  { %s6729_s16 = smov [#allocation2]   ;;  %s6730_s19 = smov [#allocation7]  }
  0x37   :  { %s23_s17 = sshll.u32 %s6729_s16, 4  ;;  %s45_s20 = sshll.u32 %s6730_s19, 4  ;;  %s24_s17 = int_to_ptr.vmem [resolvable:$true] %s23_s17  ;;  %s46_s20 = int_to_ptr.vmem [resolvable:$true] %s45_s20 }
  0x38   :  { %s6602_s23 = scalar_lea.hbm %s7043_s0, 128 }
  0x39   :  { %p6603_p10 = scmp.ne.s32.totalorder %s7043_s0, %s6602_s23  ;;  %p6606_p11 = scmp.lt.u32.totalorder %s6602_s23, %s7043_s0 }
  0x3b   :  { %p6608_p12 = pnand %p6606_p11, %p6603_p10 }
  0x3d   :  { %6611 = shalt.err (!%p6608_p12)
}
  0x3e   :  { %s6612_s5 = scalar_lea.vmem %s24_s17, 128  ;;  %p6617_p0 = scmp.lt.s32.totalorder %s24_s17, %s24_s17 }
  0x3f   :  { %p6613_p13 = scmp.ne.s32.totalorder %s24_s17, %s6612_s5  ;;  %p6618_p1 = scmp.lt.s32.totalorder %s6612_s5, %s6612_s5 }
  0x41   :  { %p6619_p2 = por %p6618_p1, %p6617_p0 }
  0x43   :  { %p6620_p3 = pnand %p6619_p2, %p6613_p13 }
  0x45   :  { %6623 = shalt.err (!%p6620_p3)
}
  0x46   :  { %26 = dma.hbm_to_vmem [thread:$0]  %s7043_s0, 128, %s24_s17, [#allocation3]  }
  0x47   :  { %s6624_s30 = scalar_lea.hbm %s7045_s2, 128 }
  0x48   :  { %p6625_p4 = scmp.ne.s32.totalorder %s7045_s2, %s6624_s30  ;;  %p6628_p5 = scmp.lt.u32.totalorder %s6624_s30, %s7045_s2 }
  0x4a   :  { %p6630_p6 = pnand %p6628_p5, %p6625_p4 }
  0x4c   :  { %6633 = shalt.err (!%p6630_p6)
}
  0x4d   :  { %s6634_s14 = scalar_lea.vmem %s46_s20, 128  ;;  %p6639_p8 = scmp.lt.s32.totalorder %s46_s20, %s46_s20 }
  0x4e   :  { %p6635_p7 = scmp.ne.s32.totalorder %s46_s20, %s6634_s14  ;;  %p6640_p9 = scmp.lt.s32.totalorder %s6634_s14, %s6634_s14 }
  0x50   :  { %p6641_p10 = por %p6640_p9, %p6639_p8 }
  0x52   :  { %p6642_p11 = pnand %p6641_p10, %p6635_p7 }
  0x54   :  { %6645 = shalt.err (!%p6642_p11)
}
  0x55   :  { %48 = dma.hbm_to_vmem [thread:$0]  %s7045_s2, 128, %s46_s20, [#allocation6]  }
  0x56   :  { %s6731_s11 = smov [#allocation10]   ;;  %s6732_s15 = smov [#allocation13]  }
  0x57   :  { %s67_s12 = sshll.u32 %s6731_s11, 4  ;;  %s89_s16 = sshll.u32 %s6732_s15, 4  ;;  %s68_s12 = int_to_ptr.vmem [resolvable:$true] %s67_s12  ;;  %s90_s16 = int_to_ptr.vmem [resolvable:$true] %s89_s16 }
  0x58   :  { %s6646_s21 = scalar_lea.hbm %s7047_s4, 128 }
  0x59   :  { %p6647_p12 = scmp.ne.s32.totalorder %s7047_s4, %s6646_s21  ;;  %p6650_p13 = scmp.lt.u32.totalorder %s6646_s21, %s7047_s4 }
  0x5b   :  { %p6652_p0 = pnand %p6650_p13, %p6647_p12 }
  0x5d   :  { %6655 = shalt.err (!%p6652_p0)
}
  0x5e   :  { %s6656_s2 = scalar_lea.vmem %s68_s12, 128  ;;  %p6661_p2 = scmp.lt.s32.totalorder %s68_s12, %s68_s12 }
  0x5f   :  { %p6657_p1 = scmp.ne.s32.totalorder %s68_s12, %s6656_s2  ;;  %p6662_p3 = scmp.lt.s32.totalorder %s6656_s2, %s6656_s2 }
  0x61   :  { %p6663_p4 = por %p6662_p3, %p6661_p2 }
  0x63   :  { %p6664_p5 = pnand %p6663_p4, %p6657_p1 }
  0x65   :  { %6667 = shalt.err (!%p6664_p5)
}
  0x66   :  { %70 = dma.hbm_to_vmem [thread:$0]  %s7047_s4, 128, %s68_s12, [#allocation9]  }
  0x67   :  { %s6668_s18 = scalar_lea.hbm %s7049_s6, 16 }
  0x68   :  { %p6669_p6 = scmp.ne.s32.totalorder %s7049_s6, %s6668_s18  ;;  %p6672_p7 = scmp.lt.u32.totalorder %s6668_s18, %s7049_s6 }
  0x6a   :  { %p6674_p8 = pnand %p6672_p7, %p6669_p6 }
  0x6c   :  { %6677 = shalt.err (!%p6674_p8)
}
  0x6d   :  { %s6678_s8 = scalar_lea.vmem %s90_s16, 16  ;;  %s6682_s9 = scalar_lea.vmem %s90_s16, 32 }
  0x6e   :  { %p6679_p9 = scmp.ne.s32.totalorder %s90_s16, %s6678_s8  ;;  %p6683_p10 = scmp.lt.s32.totalorder %s90_s16, %s90_s16 }
  0x6f   :  { %p6684_p11 = scmp.lt.s32.totalorder %s6682_s9, %s6678_s8 }
  0x71   :  { %p6685_p12 = por %p6684_p11, %p6683_p10 }
  0x73   :  { %p6686_p13 = pnand %p6685_p12, %p6679_p9 }
  0x75   :  { %6689 = shalt.err (!%p6686_p13)
}
  0x76   :  { %92 = dma.hbm_to_vmem [thread:$0]  %s7049_s6, 16, %s90_s16, [#allocation12]  }
  0x77   :  { %6712 = dma.done.wait [#allocation3], 128  }
  0x78   :  { %6713 = vsyncadd [#allocation3], 4294967168 }
  0x79   :  { %6714 = dma.done.wait [#allocation6], 16512  }
  0x7a   :  { %6715 = vsyncadd [#allocation6], 4294950784 }
  0x7b   :  { %6716 = dma.done.wait [#allocation9], 65664  }
  0x7c   :  { %6717 = vsyncadd [#allocation9], 4294901632 }
  0x7d   :  { %6718 = dma.done.wait [#allocation12], 8208  }
  0x7e   :  { %6719 = vsyncadd [#allocation12], 4294959088  ;;  %v116_v0 = vld [vmem:[#allocation5] sm:$0xff]  ;;  %v117_v17 = vld [vmem:[#allocation5 + $0x8] sm:$0xff]  ;;  %s6733_s6 = smov [#allocation14]  }
  0x7f   :  { %v120_v1 = vld [vmem:[#allocation5 + $0x20] sm:$0xff]  ;;  %v121_v18 = vld [vmem:[#allocation5 + $0x28] sm:$0xff]  ;;  %v6858_v19 = vld [vmem:[#allocation2] sm:$0xff]  ;;  %s5590_s13 = sshll.u32 %s6733_s6, 4  ;;  %s5591_s13 = int_to_ptr.vmem [resolvable:$true] %s5590_s13 }
  0x80   :  { %v124_v2 = vld [vmem:[#allocation5 + $0x40] sm:$0xff]  ;;  %v5605_v3 = vcombine.high %v116_v0, %v120_v1  ;;  %v5604_v4 = vcombine.low %v116_v0, %v120_v1  ;;  %v125_v20 = vld [vmem:[#allocation5 + $0x48] sm:$0xff]  ;;  %v5607_v22 = vcombine.high %v117_v17, %v121_v18  ;;  %v5606_v23 = vcombine.low %v117_v17, %v121_v18  ;;  %s6690_s14 = scalar_lea.vmem %s5591_s13, 128  ;;  %p6695_p1 = scmp.lt.s32.totalorder %s5591_s13, %s5591_s13 }
  0x81   :  { %v128_v5 = vld [vmem:[#allocation5 + $0x60] sm:$0xff]  ;;  %v6862_v24 = vcombine.high %v6858_v19, %v6858_v19  ;;  %v129_v25 = vld [vmem:[#allocation5 + $0x68] sm:$0xff]  ;;  %p6691_p0 = scmp.ne.s32.totalorder %s5591_s13, %s6690_s14  ;;  %p6696_p2 = scmp.lt.s32.totalorder %s6690_s14, %s6690_s14 }
  0x82   :  { %v5613_v6 = vcombine.high %v124_v2, %v128_v5  ;;  %v132_v7 = vld [vmem:[#allocation5 + $0x80] sm:$0xff]  ;;  %933 = vmatprep.subr.bf16.mxu0 %v5605_v3  ;;  %v5612_v9 = vcombine.low %v124_v2, %v128_v5  ;;  %v5615_v27 = vcombine.high %v125_v20, %v129_v25  ;;  %v133_v28 = vld [vmem:[#allocation5 + $0x88] sm:$0xff]  ;;  %974 = vmatprep.subr.bf16.mxu1 %v5607_v22 }
  0x83   :  { %v136_v8 = vld [vmem:[#allocation5 + $0xa0] sm:$0xff]  ;;  %934 = vmatpush1.bf16.msra.mxu0 %v5604_v4  ;;  %v137_v29 = vld [vmem:[#allocation5 + $0xa8] sm:$0xff]  ;;  %965 = vmatprep.mubr.bf16.mxu0 %v6862_v24  ;;  %v5614_v32 = vcombine.low %v125_v20, %v129_v25  ;;  %p6697_p3 = por %p6696_p2, %p6695_p1 }
  0x84   :  { %935 = vmatprep.subr.bf16.mxu0 %v5613_v6  ;;  %v5621_v10 = vcombine.high %v132_v7, %v136_v8  ;;  %v140_v11 = vld [vmem:[#allocation5 + $0xc0] sm:$0xff]  ;;  %v5620_v13 = vcombine.low %v132_v7, %v136_v8  ;;  %975 = vmatpush1.bf16.msra.mxu1 %v5606_v23  ;;  %v5623_v34 = vcombine.high %v133_v28, %v137_v29  ;;  %v141_v36 = vld [vmem:[#allocation5 + $0xc8] sm:$0xff] }
  0x85   :  { %v144_v12 = vld [vmem:[#allocation5 + $0xe0] sm:$0xff]  ;;  %976 = vmatprep.subr.bf16.mxu1 %v5615_v27  ;;  %v145_v37 = vld [vmem:[#allocation5 + $0xe8] sm:$0xff]  ;;  %1006 = vmatprep.mubr.bf16.mxu1 %v6862_v24  ;;  %v5622_v40 = vcombine.low %v133_v28, %v137_v29  ;;  %p6698_p4 = pnand %p6697_p3, %p6691_p0 }
  0x86   :  { %v5629_v14 = vcombine.high %v140_v11, %v144_v12  ;;  %v148_v15 = vld [vmem:[#allocation5 + $0x100] sm:$0xff]  ;;  %v5628_v21 = vcombine.low %v140_v11, %v144_v12  ;;  %v5631_v42 = vcombine.high %v141_v36, %v145_v37  ;;  %v149_v44 = vld [vmem:[#allocation5 + $0x108] sm:$0xff]  ;;  %v5630_v48 = vcombine.low %v141_v36, %v145_v37 }
  0x87   :  { %936 = vmatpush1.bf16.msra.mxu0 %v5612_v9  ;;  %v152_v16 = vld [vmem:[#allocation5 + $0x120] sm:$0xff]  ;;  %v153_v45 = vld [vmem:[#allocation5 + $0x128] sm:$0xff] }
  0x88   :  { %937 = vmatprep.subr.bf16.mxu0 %v5621_v10  ;;  %v5637_v26 = vcombine.high %v148_v15, %v152_v16  ;;  %v156_v30 = vld [vmem:[#allocation5 + $0x140] sm:$0xff]  ;;  %v5636_v33 = vcombine.low %v148_v15, %v152_v16  ;;  %977 = vmatpush1.bf16.msra.mxu1 %v5614_v32  ;;  %v5639_v50 = vcombine.high %v149_v44, %v153_v45  ;;  %v157_v52 = vld [vmem:[#allocation5 + $0x148] sm:$0xff] }
  0x89   :  { %v160_v31 = vld [vmem:[#allocation5 + $0x160] sm:$0xff]  ;;  %978 = vmatprep.subr.bf16.mxu1 %v5623_v34  ;;  %v161_v53 = vld [vmem:[#allocation5 + $0x168] sm:$0xff]  ;;  %v5638_v56 = vcombine.low %v149_v44, %v153_v45 }
  0x8a   :  { %v5645_v35 = vcombine.high %v156_v30, %v160_v31  ;;  %v164_v38 = vld [vmem:[#allocation5 + $0x180] sm:$0xff]  ;;  %v5644_v41 = vcombine.low %v156_v30, %v160_v31  ;;  %v5647_v58 = vcombine.high %v157_v52, %v161_v53  ;;  %v165_v60 = vld [vmem:[#allocation5 + $0x188] sm:$0xff]  ;;  %v5646_v0 = vcombine.low %v157_v52, %v161_v53 }
  0x8b   :  { %938 = vmatpush1.bf16.msra.mxu0 %v5620_v13  ;;  %v168_v39 = vld [vmem:[#allocation5 + $0x1a0] sm:$0xff]  ;;  %v169_v61 = vld [vmem:[#allocation5 + $0x1a8] sm:$0xff] }
  0x8c   :  { %939 = vmatprep.subr.bf16.mxu0 %v5629_v14  ;;  %v5653_v43 = vcombine.high %v164_v38, %v168_v39  ;;  %v172_v46 = vld [vmem:[#allocation5 + $0x1c0] sm:$0xff]  ;;  %979 = vmatpush1.bf16.msra.mxu1 %v5622_v40  ;;  %v5652_v49 = vcombine.low %v164_v38, %v168_v39  ;;  %v5655_v2 = vcombine.high %v165_v60, %v169_v61  ;;  %v173_v4 = vld [vmem:[#allocation5 + $0x1c8] sm:$0xff] }
  0x8d   :  { %v176_v47 = vld [vmem:[#allocation5 + $0x1e0] sm:$0xff]  ;;  %980 = vmatprep.subr.bf16.mxu1 %v5631_v42  ;;  %v177_v5 = vld [vmem:[#allocation5 + $0x1e8] sm:$0xff]  ;;  %v5654_v8 = vcombine.low %v165_v60, %v169_v61 }
  0x8e   :  { %v5661_v51 = vcombine.high %v172_v46, %v176_v47  ;;  %v180_v54 = vld [vmem:[#allocation5 + $0x200] sm:$0xff]  ;;  %v5660_v57 = vcombine.low %v172_v46, %v176_v47  ;;  %v5663_v10 = vcombine.high %v173_v4, %v177_v5  ;;  %v181_v12 = vld [vmem:[#allocation5 + $0x208] sm:$0xff]  ;;  %v5662_v16 = vcombine.low %v173_v4, %v177_v5 }
  0x8f   :  { %940 = vmatpush1.bf16.msra.mxu0 %v5628_v21  ;;  %v184_v55 = vld [vmem:[#allocation5 + $0x220] sm:$0xff]  ;;  %v185_v13 = vld [vmem:[#allocation5 + $0x228] sm:$0xff] }
  0x90   :  { %941 = vmatprep.subr.bf16.mxu0 %v5637_v26  ;;  %981 = vmatpush1.bf16.msra.mxu1 %v5630_v48  ;;  %v5669_v59 = vcombine.high %v180_v54, %v184_v55  ;;  %v188_v62 = vld [vmem:[#allocation5 + $0x240] sm:$0xff]  ;;  %v5668_v1 = vcombine.low %v180_v54, %v184_v55  ;;  %v5671_v18 = vcombine.high %v181_v12, %v185_v13  ;;  %v189_v21 = vld [vmem:[#allocation5 + $0x248] sm:$0xff] }
  0x91   :  { %982 = vmatprep.subr.bf16.mxu1 %v5639_v50  ;;  %v192_v63 = vld [vmem:[#allocation5 + $0x260] sm:$0xff]  ;;  %v193_v22 = vld [vmem:[#allocation5 + $0x268] sm:$0xff]  ;;  %v5670_v26 = vcombine.low %v181_v12, %v185_v13  ;;  %v119_v12 = vld [vmem:[#allocation5 + $0x18] sm:$0xff] }
  0x92   :  { %v5677_v3 = vcombine.high %v188_v62, %v192_v63  ;;  %v196_v6 = vld [vmem:[#allocation5 + $0x280] sm:$0xff]  ;;  %v5676_v9 = vcombine.low %v188_v62, %v192_v63  ;;  %v5679_v28 = vcombine.high %v189_v21, %v193_v22  ;;  %v197_v30 = vld [vmem:[#allocation5 + $0x288] sm:$0xff]  ;;  %v5678_v34 = vcombine.low %v189_v21, %v193_v22  ;;  %v126_v63 = vld [vmem:[#allocation5 + $0x50] sm:$0xff] }
  0x93   :  { %942 = vmatpush1.bf16.msra.mxu0 %v5636_v33  ;;  %v200_v7 = vld [vmem:[#allocation5 + $0x2a0] sm:$0xff]  ;;  %v201_v31 = vld [vmem:[#allocation5 + $0x2a8] sm:$0xff]  ;;  %v131_v21 = vld [vmem:[#allocation5 + $0x78] sm:$0xff] }
  0x94   :  { %943 = vmatprep.subr.bf16.mxu0 %v5645_v35  ;;  %983 = vmatpush1.bf16.msra.mxu1 %v5638_v56  ;;  %v5685_v11 = vcombine.high %v196_v6, %v200_v7  ;;  %v204_v14 = vld [vmem:[#allocation5 + $0x2c0] sm:$0xff]  ;;  %v5684_v17 = vcombine.low %v196_v6, %v200_v7  ;;  %v5687_v36 = vcombine.high %v197_v30, %v201_v31  ;;  %v205_v38 = vld [vmem:[#allocation5 + $0x2c8] sm:$0xff]  ;;  %v118_v56 = vld [vmem:[#allocation5 + $0x10] sm:$0xff] }
  0x95   :  { %984 = vmatprep.subr.bf16.mxu1 %v5647_v58  ;;  %v208_v15 = vld [vmem:[#allocation5 + $0x2e0] sm:$0xff]  ;;  %v209_v39 = vld [vmem:[#allocation5 + $0x2e8] sm:$0xff]  ;;  %v5686_v42 = vcombine.low %v197_v30, %v201_v31  ;;  %v139_v30 = vld [vmem:[#allocation5 + $0xb8] sm:$0xff] }
  0x96   :  { %v5693_v20 = vcombine.high %v204_v14, %v208_v15  ;;  %v212_v23 = vld [vmem:[#allocation5 + $0x300] sm:$0xff]  ;;  %v5692_v27 = vcombine.low %v204_v14, %v208_v15  ;;  %v5695_v44 = vcombine.high %v205_v38, %v209_v39  ;;  %v213_v46 = vld [vmem:[#allocation5 + $0x308] sm:$0xff]  ;;  %v5694_v50 = vcombine.low %v205_v38, %v209_v39  ;;  %v142_v14 = vld [vmem:[#allocation5 + $0xd0] sm:$0xff] }
  0x97   :  { %944 = vmatpush1.bf16.msra.mxu0 %v5644_v41  ;;  %v216_v25 = vld [vmem:[#allocation5 + $0x320] sm:$0xff]  ;;  %v217_v47 = vld [vmem:[#allocation5 + $0x328] sm:$0xff]  ;;  %v146_v15 = vld [vmem:[#allocation5 + $0xf0] sm:$0xff] }
  0x98   :  { %945 = vmatprep.subr.bf16.mxu0 %v5653_v43  ;;  %985 = vmatpush1.bf16.msra.mxu1 %v5646_v0  ;;  %v5701_v29 = vcombine.high %v212_v23, %v216_v25  ;;  %v220_v32 = vld [vmem:[#allocation5 + $0x340] sm:$0xff]  ;;  %v5700_v35 = vcombine.low %v212_v23, %v216_v25  ;;  %v5703_v52 = vcombine.high %v213_v46, %v217_v47  ;;  %v221_v54 = vld [vmem:[#allocation5 + $0x348] sm:$0xff]  ;;  %v130_v0 = vld [vmem:[#allocation5 + $0x70] sm:$0xff] }
  0x99   :  { %986 = vmatprep.subr.bf16.mxu1 %v5655_v2  ;;  %v224_v33 = vld [vmem:[#allocation5 + $0x360] sm:$0xff]  ;;  %v225_v55 = vld [vmem:[#allocation5 + $0x368] sm:$0xff]  ;;  %v5702_v58 = vcombine.low %v213_v46, %v217_v47  ;;  %v6868_v2 = vcombine.low %v6858_v19, %v6858_v19  ;;  %v5616_v13 = vcombine.low %v126_v63, %v130_v0  ;;  %v150_v23 = vld [vmem:[#allocation5 + $0x110] sm:$0xff]  ;;  %v5632_v31 = vcombine.low %v142_v14, %v146_v15 }
  0x9a   :  { %v5709_v37 = vcombine.high %v220_v32, %v224_v33  ;;  %v228_v40 = vld [vmem:[#allocation5 + $0x380] sm:$0xff]  ;;  %v5708_v43 = vcombine.low %v220_v32, %v224_v33  ;;  %v233_v60 = vld [vmem:[#allocation5 + $0x3a8] sm:$0xff]  ;;  %v5711_v62 = vcombine.high %v221_v54, %v225_v55  ;;  %v154_v25 = vld [vmem:[#allocation5 + $0x130] sm:$0xff] }
  0x9b   :  { %946 = vmatpush1.bf16.msra.mxu0 %v5652_v49  ;;  %v232_v41 = vld [vmem:[#allocation5 + $0x3a0] sm:$0xff]  ;;  %v237_v4 = vld [vmem:[#allocation5 + $0x3c8] sm:$0xff]  ;;  %v158_v32 = vld [vmem:[#allocation5 + $0x150] sm:$0xff]  ;;  %v5640_v39 = vcombine.low %v150_v23, %v154_v25 }
  0x9c   :  { %947 = vmatprep.subr.bf16.mxu0 %v5661_v51  ;;  %987 = vmatpush1.bf16.msra.mxu1 %v5654_v8  ;;  %v5717_v45 = vcombine.high %v228_v40, %v232_v41  ;;  %v236_v48 = vld [vmem:[#allocation5 + $0x3c0] sm:$0xff]  ;;  %v5716_v51 = vcombine.low %v228_v40, %v232_v41  ;;  %v241_v5 = vld [vmem:[#allocation5 + $0x3e8] sm:$0xff]  ;;  %v134_v8 = vld [vmem:[#allocation5 + $0x90] sm:$0xff] }
  0x9d   :  { %988 = vmatprep.subr.bf16.mxu1 %v5663_v10  ;;  %v240_v49 = vld [vmem:[#allocation5 + $0x3e0] sm:$0xff]  ;;  %v5617_v10 = vcombine.high %v126_v63, %v130_v0  ;;  %v5727_v19 = vcombine.high %v237_v4, %v241_v5  ;;  %v162_v33 = vld [vmem:[#allocation5 + $0x170] sm:$0xff]  ;;  %v147_v38 = vld [vmem:[#allocation5 + $0xf8] sm:$0xff] }
  0x9e   :  { %v5725_v53 = vcombine.high %v236_v48, %v240_v49  ;;  %v5724_v61 = vcombine.low %v236_v48, %v240_v49  ;;  %v166_v40 = vld [vmem:[#allocation5 + $0x190] sm:$0xff]  ;;  %v155_v46 = vld [vmem:[#allocation5 + $0x138] sm:$0xff]  ;;  %v5648_v47 = vcombine.low %v158_v32, %v162_v33 }
  0x9f   :  { %948 = vmatpush1.bf16.msra.mxu0 %v5660_v57  ;;  %v122_v57 = vld [vmem:[#allocation5 + $0x30] sm:$0xff] }
  0xa0   :  { %949 = vmatprep.subr.bf16.mxu0 %v5669_v59  ;;  %989 = vmatpush1.bf16.msra.mxu1 %v5662_v16  ;;  %v229_v59 = vld [vmem:[#allocation5 + $0x388] sm:$0xff]  ;;  %v5608_v7 = vcombine.low %v118_v56, %v122_v57  ;;  %v170_v41 = vld [vmem:[#allocation5 + $0x1b0] sm:$0xff] }
  0xa1   :  { %990 = vmatprep.subr.bf16.mxu1 %v5671_v18  ;;  %v5719_v6 = vcombine.high %v229_v59, %v233_v60  ;;  %v5726_v18 = vcombine.low %v237_v4, %v241_v5  ;;  %v174_v48 = vld [vmem:[#allocation5 + $0x1d0] sm:$0xff]  ;;  %v175_v5 = vld [vmem:[#allocation5 + $0x1d8] sm:$0xff] }
  0xa2   :  { %v178_v49 = vld [vmem:[#allocation5 + $0x1f0] sm:$0xff] }
  0xa3   :  { %950 = vmatpush1.bf16.msra.mxu0 %v5668_v1  ;;  %v5609_v1 = vcombine.high %v118_v56, %v122_v57  ;;  %v186_v56 = vld [vmem:[#allocation5 + $0x230] sm:$0xff] }
  0xa4   :  { %951 = vmatprep.subr.bf16.mxu0 %v5677_v3  ;;  %991 = vmatpush1.bf16.msra.mxu1 %v5670_v26  ;;  %v5710_v3 = vcombine.low %v221_v54, %v225_v55  ;;  %v5656_v54 = vcombine.low %v166_v40, %v170_v41  ;;  %v182_v55 = vld [vmem:[#allocation5 + $0x210] sm:$0xff] }
  0xa5   :  { %992 = vmatprep.subr.bf16.mxu1 %v5679_v28  ;;  %v190_v63 = vld [vmem:[#allocation5 + $0x250] sm:$0xff] }
  0xa6   :  { %v194_v0 = vld [vmem:[#allocation5 + $0x270] sm:$0xff] }
  0xa7   :  { %952 = vmatpush1.bf16.msra.mxu0 %v5676_v9  ;;  %v138_v9 = vld [vmem:[#allocation5 + $0xb0] sm:$0xff] }
  0xa8   :  { %953 = vmatprep.subr.bf16.mxu0 %v5685_v11  ;;  %993 = vmatpush1.bf16.msra.mxu1 %v5678_v34  ;;  %v5718_v11 = vcombine.low %v229_v59, %v233_v60  ;;  %v5625_v16 = vcombine.high %v134_v8, %v138_v9  ;;  %v5624_v22 = vcombine.low %v134_v8, %v138_v9  ;;  %v167_v60 = vld [vmem:[#allocation5 + $0x198] sm:$0xff]  ;;  %v198_v8 = vld [vmem:[#allocation5 + $0x290] sm:$0xff] }
  0xa9   :  { %994 = vmatprep.subr.bf16.mxu1 %v5687_v36  ;;  %v202_v9 = vld [vmem:[#allocation5 + $0x2b0] sm:$0xff] }
  0xab   :  { %954 = vmatpush1.bf16.msra.mxu0 %v5684_v17  ;;  %v123_v17 = vld [vmem:[#allocation5 + $0x38] sm:$0xff] }
  0xac   :  { %955 = vmatprep.subr.bf16.mxu0 %v5693_v20  ;;  %995 = vmatpush1.bf16.msra.mxu1 %v5686_v42  ;;  %v127_v20 = vld [vmem:[#allocation5 + $0x58] sm:$0xff]  ;;  %v5611_v26 = vcombine.high %v119_v12, %v123_v17  ;;  %v5610_v28 = vcombine.low %v119_v12, %v123_v17 }
  0xad   :  { %996 = vmatprep.subr.bf16.mxu1 %v5695_v44  ;;  %v5619_v34 = vcombine.high %v127_v20, %v131_v21  ;;  %v5618_v36 = vcombine.low %v127_v20, %v131_v21  ;;  %v5688_v21 = vcombine.low %v198_v8, %v202_v9 }
  0xaf   :  { %956 = vmatpush1.bf16.msra.mxu0 %v5692_v27  ;;  %v5633_v27 = vcombine.high %v142_v14, %v146_v15  ;;  %v5680_v14 = vcombine.low %v190_v63, %v194_v0  ;;  %v206_v15 = vld [vmem:[#allocation5 + $0x2d0] sm:$0xff] }
  0xb0   :  { %957 = vmatprep.subr.bf16.mxu0 %v5701_v29  ;;  %997 = vmatpush1.bf16.msra.mxu1 %v5694_v50  ;;  %v135_v29 = vld [vmem:[#allocation5 + $0x98] sm:$0xff] }
  0xb1   :  { %998 = vmatprep.subr.bf16.mxu1 %v5703_v52  ;;  %v5627_v42 = vcombine.high %v135_v29, %v139_v30  ;;  %v5626_v44 = vcombine.low %v135_v29, %v139_v30  ;;  %v159_v52 = vld [vmem:[#allocation5 + $0x158] sm:$0xff] }
  0xb3   :  { %958 = vmatpush1.bf16.msra.mxu0 %v5700_v35  ;;  %v5641_v35 = vcombine.high %v150_v23, %v154_v25  ;;  %v191_v25 = vld [vmem:[#allocation5 + $0x258] sm:$0xff] }
  0xb4   :  { %959 = vmatprep.subr.bf16.mxu0 %v5709_v37  ;;  %999 = vmatpush1.bf16.msra.mxu1 %v5702_v58  ;;  %v143_v37 = vld [vmem:[#allocation5 + $0xd8] sm:$0xff]  ;;  %v5665_v58 = vcombine.high %v174_v48, %v178_v49 }
  0xb5   :  { %1000 = vmatprep.subr.bf16.mxu1 %v5711_v62  ;;  %v5635_v50 = vcombine.high %v143_v37, %v147_v38  ;;  %v5664_v62 = vcombine.low %v174_v48, %v178_v49  ;;  %v215_v49 = vld [vmem:[#allocation5 + $0x318] sm:$0xff] }
  0xb7   :  { %960 = vmatpush1.bf16.msra.mxu0 %v5708_v43  ;;  %v5649_v43 = vcombine.high %v158_v32, %v162_v33  ;;  %v199_v33 = vld [vmem:[#allocation5 + $0x298] sm:$0xff] }
  0xb8   :  { %961 = vmatprep.subr.bf16.mxu0 %v5717_v45  ;;  %1001 = vmatpush1.bf16.msra.mxu1 %v5710_v3  ;;  %v151_v45 = vld [vmem:[#allocation5 + $0x118] sm:$0xff]  ;;  %v5673_v3 = vcombine.high %v182_v55, %v186_v56 }
  0xb9   :  { %1002 = vmatprep.subr.bf16.mxu1 %v5719_v6  ;;  %v5643_v57 = vcombine.high %v151_v45, %v155_v46  ;;  %v5642_v59 = vcombine.low %v151_v45, %v155_v46  ;;  %v179_v6 = vld [vmem:[#allocation5 + $0x1f8] sm:$0xff] }
  0xba   :  { %v5667_v17 = vcombine.high %v175_v5, %v179_v6  ;;  %v5666_v20 = vcombine.low %v175_v5, %v179_v6 }
  0xbb   :  { %962 = vmatpush1.bf16.msra.mxu0 %v5716_v51  ;;  %v5634_v51 = vcombine.low %v143_v37, %v147_v38 }
  0xbc   :  { %963 = vmatprep.subr.bf16.mxu0 %v5725_v53  ;;  %1003 = vmatpush1.bf16.msra.mxu1 %v5718_v11  ;;  %v163_v53 = vld [vmem:[#allocation5 + $0x178] sm:$0xff]  ;;  %v5681_v11 = vcombine.high %v190_v63, %v194_v0 }
  0xbd   :  { %1004 = vmatprep.subr.bf16.mxu1 %v5727_v19  ;;  %v5650_v4 = vcombine.low %v159_v52, %v163_v53  ;;  %v183_v19 = vld [vmem:[#allocation5 + $0x218] sm:$0xff] }
  0xbe   :  { %v231_v63 = vld [vmem:[#allocation5 + $0x398] sm:$0xff] }
  0xbf   :  { %964 = vmatpush1.bf16.msra.mxu0 %v5724_v61  ;;  %v171_v61 = vld [vmem:[#allocation5 + $0x1b8] sm:$0xff] }
  0xc0   :  { %1015 = vmatprep.subr.bf16.mxu0 %v5609_v1  ;;  %1005 = vmatpush1.bf16.msra.mxu1 %v5726_v18  ;;  %v5651_v1 = vcombine.high %v159_v52, %v163_v53  ;;  %v5658_v12 = vcombine.low %v167_v60, %v171_v61  ;;  %v5689_v18 = vcombine.high %v198_v8, %v202_v9  ;;  %v235_v0 = vld [vmem:[#allocation5 + $0x3b8] sm:$0xff] }
  0xc1   :  { %1056 = vmatprep.subr.bf16.mxu1 %v5611_v26  ;;  %v195_v26 = vld [vmem:[#allocation5 + $0x278] sm:$0xff]  ;;  %v5723_v6 = vcombine.high %v231_v63, %v235_v0 }
  0xc2   :  { %966 = vmatmul.mubr.bf16.vlgmr.msra.gmra.mrb[0].mxu0 %v6868_v2  ;;  %v5682_v37 = vcombine.low %v191_v25, %v195_v26  ;;  %v239_v8 = vld [vmem:[#allocation5 + $0x3d8] sm:$0xff] }
  0xc3   :  { %1016 = vmatpush1.bf16.msra.mxu0 %v5608_v7  ;;  %1047 = vmatprep.mubr.bf16.mxu0 %v6862_v24  ;;  %v5672_v7 = vcombine.low %v182_v55, %v186_v56  ;;  %v223_v56 = vld [vmem:[#allocation5 + $0x358] sm:$0xff] }
  0xc4   :  { %1017 = vmatprep.subr.bf16.mxu0 %v5617_v10  ;;  %1007 = vmatmul.mubr.bf16.vlgmr.msra.gmra.mrb[0].mxu1 %v6868_v2  ;;  %v5659_v10 = vcombine.high %v167_v60, %v171_v61  ;;  %v243_v9 = vld [vmem:[#allocation5 + $0x3f8] sm:$0xff] }
  0xc5   :  { %1057 = vmatpush1.bf16.msra.mxu1 %v5610_v28  ;;  %1088 = vmatprep.mubr.bf16.mxu1 %v6862_v24  ;;  %v5657_v24 = vcombine.high %v166_v40, %v170_v41  ;;  %v218_v28 = vld [vmem:[#allocation5 + $0x330] sm:$0xff]  ;;  %v207_v41 = vld [vmem:[#allocation5 + $0x2d8] sm:$0xff] }
  0xc6   :  { %1058 = vmatprep.subr.bf16.mxu1 %v5619_v34  ;;  %v203_v34 = vld [vmem:[#allocation5 + $0x2b8] sm:$0xff] }
  0xc7   :  { %1018 = vmatpush1.bf16.msra.mxu0 %v5616_v13  ;;  %v187_v13 = vld [vmem:[#allocation5 + $0x238] sm:$0xff]  ;;  %v5690_v45 = vcombine.low %v199_v33, %v203_v34 }
  0xc8   :  { %1019 = vmatprep.subr.bf16.mxu0 %v5625_v16  ;;  %v210_v16 = vld [vmem:[#allocation5 + $0x2f0] sm:$0xff]  ;;  %v5674_v29 = vcombine.low %v183_v19, %v187_v13 }
  0xc9   :  { %1059 = vmatpush1.bf16.msra.mxu1 %v5618_v36  ;;  %v5697_v23 = vcombine.high %v206_v15, %v210_v16  ;;  %v5696_v30 = vcombine.low %v206_v15, %v210_v16  ;;  %v226_v36 = vld [vmem:[#allocation5 + $0x370] sm:$0xff] }
  0xca   :  { %1060 = vmatprep.subr.bf16.mxu1 %v5627_v42  ;;  %v211_v42 = vld [vmem:[#allocation5 + $0x2f8] sm:$0xff]  ;;  %v1114_v15 = vld [vmem:[#allocation8 + $0x8] sm:$0xff] }
  0xcb   :  { %1020 = vmatpush1.bf16.msra.mxu0 %v5624_v22  ;;  %v5675_v22 = vcombine.high %v183_v19, %v187_v13  ;;  %v5698_v52 = vcombine.low %v207_v41, %v211_v42  ;;  %v5722_v19 = vcombine.low %v231_v63, %v235_v0  ;;  %v5731_v13 = vcombine.high %v239_v8, %v243_v9  ;;  %v1118_v16 = vld [vmem:[#allocation8 + $0x28] sm:$0xff] }
  0xcc   :  { %1021 = vmatprep.subr.bf16.mxu0 %v5633_v27  ;;  %v214_v27 = vld [vmem:[#allocation5 + $0x310] sm:$0xff] }
  0xcd   :  { %1061 = vmatpush1.bf16.msra.mxu1 %v5626_v44  ;;  %v5705_v32 = vcombine.high %v214_v27, %v218_v28  ;;  %v5704_v38 = vcombine.low %v214_v27, %v218_v28  ;;  %v234_v44 = vld [vmem:[#allocation5 + $0x3b0] sm:$0xff]  ;;  %v1145_v28 = vld [vmem:[#allocation8 + $0x100] sm:$0xff] }
  0xce   :  { %1062 = vmatprep.subr.bf16.mxu1 %v5635_v50  ;;  %v219_v50 = vld [vmem:[#allocation5 + $0x338] sm:$0xff]  ;;  %v6880_v63 = vld [vmem:[#allocation8 + $0x408] sm:$0xff] }
  0xcf   :  { %1022 = vmatpush1.bf16.msra.mxu0 %v5632_v31  ;;  %v5683_v31 = vcombine.high %v191_v25, %v195_v26  ;;  %v5706_v60 = vcombine.low %v215_v49, %v219_v50  ;;  %v1122_v25 = vld [vmem:[#allocation8 + $0x48] sm:$0xff] }
  0xd0   :  { %1023 = vmatprep.subr.bf16.mxu0 %v5641_v35  ;;  %v222_v35 = vld [vmem:[#allocation5 + $0x350] sm:$0xff] }
  0xd1   :  { %1063 = vmatpush1.bf16.msra.mxu1 %v5634_v51  ;;  %v5713_v40 = vcombine.high %v222_v35, %v226_v36  ;;  %v5712_v46 = vcombine.low %v222_v35, %v226_v36  ;;  %v242_v51 = vld [vmem:[#allocation5 + $0x3f0] sm:$0xff]  ;;  %v1153_v36 = vld [vmem:[#allocation8 + $0x140] sm:$0xff] }
  0xd2   :  { %1064 = vmatprep.subr.bf16.mxu1 %v5643_v57  ;;  %v227_v57 = vld [vmem:[#allocation5 + $0x378] sm:$0xff]  ;;  %v1126_v26 = vld [vmem:[#allocation8 + $0x68] sm:$0xff] }
  0xd3   :  { %1024 = vmatpush1.bf16.msra.mxu0 %v5640_v39  ;;  %v5691_v39 = vcombine.high %v199_v33, %v203_v34  ;;  %v5714_v5 = vcombine.low %v223_v56, %v227_v57  ;;  %v1130_v33 = vld [vmem:[#allocation8 + $0x88] sm:$0xff] }
  0xd4   :  { %1025 = vmatprep.subr.bf16.mxu0 %v5649_v43  ;;  %v230_v43 = vld [vmem:[#allocation5 + $0x390] sm:$0xff] }
  0xd5   :  { %1065 = vmatpush1.bf16.msra.mxu1 %v5642_v59  ;;  %v5721_v48 = vcombine.high %v230_v43, %v234_v44  ;;  %v5720_v53 = vcombine.low %v230_v43, %v234_v44  ;;  %v1117_v59 = vld [vmem:[#allocation8 + $0x20] sm:$0xff]  ;;  %v1134_v34 = vld [vmem:[#allocation8 + $0xa8] sm:$0xff] }
  0xd6   :  { %1066 = vmatprep.subr.bf16.mxu1 %v5651_v1  ;;  %v1161_v44 = vld [vmem:[#allocation8 + $0x180] sm:$0xff] }
  0xd7   :  { %1026 = vmatpush1.bf16.msra.mxu0 %v5648_v47  ;;  %v5699_v47 = vcombine.high %v207_v41, %v211_v42  ;;  %v1138_v41 = vld [vmem:[#allocation8 + $0xc8] sm:$0xff] }
  0xd8   :  { %1027 = vmatprep.subr.bf16.mxu0 %v5657_v24  ;;  %v238_v24 = vld [vmem:[#allocation5 + $0x3d0] sm:$0xff] }
  0xd9   :  { %1067 = vmatpush1.bf16.msra.mxu1 %v5650_v4  ;;  %v5729_v55 = vcombine.high %v238_v24, %v242_v51  ;;  %v5728_v61 = vcombine.low %v238_v24, %v242_v51  ;;  %v1125_v4 = vld [vmem:[#allocation8 + $0x60] sm:$0xff]  ;;  %v1142_v42 = vld [vmem:[#allocation8 + $0xe8] sm:$0xff] }
  0xda   :  { %1068 = vmatprep.subr.bf16.mxu1 %v5659_v10  ;;  %v1169_v24 = vld [vmem:[#allocation8 + $0x1c0] sm:$0xff] }
  0xdb   :  { %1028 = vmatpush1.bf16.msra.mxu0 %v5656_v54  ;;  %v5707_v54 = vcombine.high %v215_v49, %v219_v50  ;;  %v1150_v49 = vld [vmem:[#allocation8 + $0x128] sm:$0xff]  ;;  %v1173_v51 = vld [vmem:[#allocation8 + $0x1e0] sm:$0xff] }
  0xdc   :  { %1029 = vmatprep.subr.bf16.mxu0 %v5665_v58  ;;  %v1113_v58 = vld [vmem:[#allocation8] sm:$0xff] }
  0xdd   :  { %1069 = vmatpush1.bf16.msra.mxu1 %v5658_v12  ;;  %v5733_v1 = vcombine.high %v1113_v58, %v1117_v59  ;;  %v1133_v12 = vld [vmem:[#allocation8 + $0xa0] sm:$0xff] }
  0xde   :  { %1070 = vmatprep.subr.bf16.mxu1 %v5667_v17 }
  0xdf   :  { %1030 = vmatpush1.bf16.msra.mxu0 %v5664_v62  ;;  %v5715_v62 = vcombine.high %v223_v56, %v227_v57  ;;  %v1158_v56 = vld [vmem:[#allocation8 + $0x168] sm:$0xff]  ;;  %v5789_v57 = vcombine.high %v1169_v24, %v1173_v51 }
  0xe0   :  { %1031 = vmatprep.subr.bf16.mxu0 %v5673_v3  ;;  %v1121_v3 = vld [vmem:[#allocation8 + $0x40] sm:$0xff] }
  0xe1   :  { %1071 = vmatpush1.bf16.msra.mxu1 %v5666_v20  ;;  %v5741_v10 = vcombine.high %v1121_v3, %v1125_v4  ;;  %v1141_v20 = vld [vmem:[#allocation8 + $0xe0] sm:$0xff] }
  0xe2   :  { %1072 = vmatprep.subr.bf16.mxu1 %v5675_v22  ;;  %v5735_v22 = vcombine.high %v1114_v15, %v1118_v16 }
  0xe3   :  { %1032 = vmatpush1.bf16.msra.mxu0 %v5672_v7  ;;  %v5732_v7 = vcombine.low %v1113_v58, %v1117_v59  ;;  %v1177_v58 = vld [vmem:[#allocation8 + $0x200] sm:$0xff] }
  0xe4   :  { %1033 = vmatprep.subr.bf16.mxu0 %v5681_v11  ;;  %v1129_v11 = vld [vmem:[#allocation8 + $0x80] sm:$0xff] }
  0xe5   :  { %1073 = vmatpush1.bf16.msra.mxu1 %v5674_v29  ;;  %v5749_v17 = vcombine.high %v1129_v11, %v1133_v12  ;;  %v1149_v29 = vld [vmem:[#allocation8 + $0x120] sm:$0xff] }
  0xe6   :  { %1074 = vmatprep.subr.bf16.mxu1 %v5683_v31  ;;  %v5743_v31 = vcombine.high %v1122_v25, %v1126_v26  ;;  %v5765_v35 = vcombine.high %v1145_v28, %v1149_v29  ;;  %v1181_v59 = vld [vmem:[#allocation8 + $0x220] sm:$0xff] }
  0xe7   :  { %1034 = vmatpush1.bf16.msra.mxu0 %v5680_v14  ;;  %v5740_v14 = vcombine.low %v1121_v3, %v1125_v4  ;;  %v6882_v3 = vld [vmem:[#allocation8 + $0x428] sm:$0xff] }
  0xe8   :  { %1035 = vmatprep.subr.bf16.mxu0 %v5689_v18  ;;  %v1137_v18 = vld [vmem:[#allocation8 + $0xc0] sm:$0xff]  ;;  %v1162_v4 = vld [vmem:[#allocation8 + $0x188] sm:$0xff] }
  0xe9   :  { %1075 = vmatpush1.bf16.msra.mxu1 %v5682_v37  ;;  %v5757_v27 = vcombine.high %v1137_v18, %v1141_v20  ;;  %v1157_v37 = vld [vmem:[#allocation8 + $0x160] sm:$0xff] }
  0xea   :  { %1076 = vmatprep.subr.bf16.mxu1 %v5691_v39  ;;  %v5751_v39 = vcombine.high %v1130_v33, %v1134_v34  ;;  %v5773_v43 = vcombine.high %v1153_v36, %v1157_v37 }
  0xeb   :  { %1036 = vmatpush1.bf16.msra.mxu0 %v5688_v21  ;;  %v5730_v21 = vcombine.low %v239_v8, %v243_v9  ;;  %v5862_v8 = vcombine.low %v6880_v63, %v6882_v3  ;;  %v1185_v9 = vld [vmem:[#allocation8 + $0x240] sm:$0xff] }
  0xec   :  { %1037 = vmatprep.subr.bf16.mxu0 %v5697_v23  ;;  %v5748_v23 = vcombine.low %v1129_v11, %v1133_v12 }
  0xed   :  { %1077 = vmatpush1.bf16.msra.mxu1 %v5690_v45  ;;  %v1165_v45 = vld [vmem:[#allocation8 + $0x1a0] sm:$0xff] }
  0xee   :  { %1078 = vmatprep.subr.bf16.mxu1 %v5699_v47  ;;  %v5759_v47 = vcombine.high %v1138_v41, %v1142_v42  ;;  %v5781_v50 = vcombine.high %v1161_v44, %v1165_v45 }
  0xef   :  { %1038 = vmatpush1.bf16.msra.mxu0 %v5696_v30  ;;  %v5734_v30 = vcombine.low %v1114_v15, %v1118_v16  ;;  %v1193_v16 = vld [vmem:[#allocation8 + $0x280] sm:$0xff] }
  0xf0   :  { %1039 = vmatprep.subr.bf16.mxu0 %v5705_v32  ;;  %v5756_v32 = vcombine.low %v1137_v18, %v1141_v20 }
  0xf1   :  { %1079 = vmatpush1.bf16.msra.mxu1 %v5698_v52  ;;  %v5758_v52 = vcombine.low %v1138_v41, %v1142_v42  ;;  %v1217_v42 = vld [vmem:[#allocation8 + $0x340] sm:$0xff] }
  0xf2   :  { %1080 = vmatprep.subr.bf16.mxu1 %v5707_v54  ;;  %v5780_v54 = vcombine.low %v1161_v44, %v1165_v45 }
  0xf3   :  { %1040 = vmatpush1.bf16.msra.mxu0 %v5704_v38  ;;  %v5742_v38 = vcombine.low %v1122_v25, %v1126_v26  ;;  %v1201_v26 = vld [vmem:[#allocation8 + $0x2c0] sm:$0xff] }
  0xf4   :  { %1041 = vmatprep.subr.bf16.mxu0 %v5713_v40  ;;  %v5764_v40 = vcombine.low %v1145_v28, %v1149_v29 }
  0xf5   :  { %1081 = vmatpush1.bf16.msra.mxu1 %v5706_v60 }
  0xf6   :  { %1082 = vmatprep.subr.bf16.mxu1 %v5715_v62  ;;  %v6878_v62 = vld [vmem:[#allocation8 + $0x420] sm:$0xff] }
  0xf7   :  { %1042 = vmatpush1.bf16.msra.mxu0 %v5712_v46  ;;  %v5750_v46 = vcombine.low %v1130_v33, %v1134_v34  ;;  %v1209_v34 = vld [vmem:[#allocation8 + $0x300] sm:$0xff] }
  0xf8   :  { %1043 = vmatprep.subr.bf16.mxu0 %v5721_v48  ;;  %v1146_v48 = vld [vmem:[#allocation8 + $0x108] sm:$0xff] }
  0xf9   :  { %1083 = vmatpush1.bf16.msra.mxu1 %v5714_v5  ;;  %v5766_v60 = vcombine.low %v1146_v48, %v1150_v49  ;;  %v1166_v5 = vld [vmem:[#allocation8 + $0x1a8] sm:$0xff] }
  0xfa   :  { %1084 = vmatprep.subr.bf16.mxu1 %v5723_v6  ;;  %v5797_v6 = vcombine.high %v1177_v58, %v1181_v59  ;;  %v5783_v12 = vcombine.high %v1162_v4, %v1166_v5  ;;  %v5782_v18 = vcombine.low %v1162_v4, %v1166_v5 }
  0xfb   :  { %1044 = vmatpush1.bf16.msra.mxu0 %v5720_v53  ;;  %v5767_v53 = vcombine.high %v1146_v48, %v1150_v49  ;;  %v1225_v49 = vld [vmem:[#allocation8 + $0x380] sm:$0xff] }
  0xfc   :  { %1045 = vmatprep.subr.bf16.mxu0 %v5729_v55  ;;  %v1154_v55 = vld [vmem:[#allocation8 + $0x148] sm:$0xff] }
  0xfd   :  { %1085 = vmatpush1.bf16.msra.mxu1 %v5722_v19  ;;  %v5775_v0 = vcombine.high %v1154_v55, %v1158_v56  ;;  %v5774_v11 = vcombine.low %v1154_v55, %v1158_v56  ;;  %v5796_v19 = vcombine.low %v1177_v58, %v1181_v59  ;;  %v1233_v56 = vld [vmem:[#allocation8 + $0x3c0] sm:$0xff] }
  0xfe   :  { %1086 = vmatprep.subr.bf16.mxu1 %v5731_v13  ;;  %v1170_v13 = vld [vmem:[#allocation8 + $0x1c8] sm:$0xff] }
  0xff   :  { %1046 = vmatpush1.bf16.msra.mxu0 %v5728_v61  ;;  %v6876_v61 = vld [vmem:[#allocation8 + $0x400] sm:$0xff] }
 0x100   :  { %4227 = vmatprep.subr.bf16.mxu0 %v5733_v1  ;;  %v5788_v1 = vcombine.low %v1169_v24, %v1173_v51 }
 0x101   :  { %1087 = vmatpush1.bf16.msra.mxu1 %v5730_v21 }
 0x102   :  { %1048 = vmatmul.mubr.bf16.vlgmr.msra.gmra.mrb[4].mxu0 %v6868_v2  ;;  %4391 = vmatprep.subr.bf16.mxu1 %v5735_v22  ;;  %v1178_v22 = vld [vmem:[#allocation8 + $0x208] sm:$0xff] }
 0x103   :  { %4228 = vmatpush1.bf16.msra.mxu0 %v5732_v7  ;;  %v5860_v7 = vcombine.low %v6876_v61, %v6878_v62 }
 0x104   :  { %4229 = vmatprep.subr.bf16.mxu0 %v5741_v10  ;;  %1089 = vmatmul.mubr.bf16.vlgmr.msra.gmra.mrb[4].mxu1 %v6868_v2  ;;  %v5772_v2 = vcombine.low %v1153_v36, %v1157_v37  ;;  %v1189_v10 = vld [vmem:[#allocation8 + $0x260] sm:$0xff] }
 0x105   :  { %4392 = vmatpush1.bf16.msra.mxu1 %v5734_v30  ;;  %v5805_v15 = vcombine.high %v1185_v9, %v1189_v10  ;;  %v5804_v21 = vcombine.low %v1185_v9, %v1189_v10  ;;  %v1226_v10 = vld [vmem:[#allocation8 + $0x388] sm:$0xff] }
 0x106   :  { %4393 = vmatprep.subr.bf16.mxu1 %v5743_v31  ;;  %v1186_v31 = vld [vmem:[#allocation8 + $0x248] sm:$0xff] }
 0x107   :  { %4230 = vmatpush1.bf16.msra.mxu0 %v5740_v14  ;;  %v1174_v14 = vld [vmem:[#allocation8 + $0x1e8] sm:$0xff] }
 0x108   :  { %4231 = vmatprep.subr.bf16.mxu0 %v5749_v17  ;;  %v1197_v17 = vld [vmem:[#allocation8 + $0x2a0] sm:$0xff]  ;;  %v5791_v20 = vcombine.high %v1170_v13, %v1174_v14  ;;  %v5790_v28 = vcombine.low %v1170_v13, %v1174_v14  ;;  %v1234_v14 = vld [vmem:[#allocation8 + $0x3c8] sm:$0xff] }
 0x109   :  { %4394 = vmatpush1.bf16.msra.mxu1 %v5742_v38  ;;  %v5813_v25 = vcombine.high %v1193_v16, %v1197_v17  ;;  %v5812_v30 = vcombine.low %v1193_v16, %v1197_v17 }
 0x10a   :  { %4395 = vmatprep.subr.bf16.mxu1 %v5751_v39  ;;  %v1194_v39 = vld [vmem:[#allocation8 + $0x288] sm:$0xff] }
 0x10b   :  { %4232 = vmatpush1.bf16.msra.mxu0 %v5748_v23  ;;  %v1182_v23 = vld [vmem:[#allocation8 + $0x228] sm:$0xff] }
 0x10c   :  { %4233 = vmatprep.subr.bf16.mxu0 %v5757_v27  ;;  %v1205_v27 = vld [vmem:[#allocation8 + $0x2e0] sm:$0xff]  ;;  %v5799_v29 = vcombine.high %v1178_v22, %v1182_v23  ;;  %v5798_v36 = vcombine.low %v1178_v22, %v1182_v23 }
 0x10d   :  { %4396 = vmatpush1.bf16.msra.mxu1 %v5750_v46  ;;  %v5821_v33 = vcombine.high %v1201_v26, %v1205_v27  ;;  %v5820_v38 = vcombine.low %v1201_v26, %v1205_v27 }
 0x10e   :  { %4397 = vmatprep.subr.bf16.mxu1 %v5759_v47  ;;  %v1202_v47 = vld [vmem:[#allocation8 + $0x2c8] sm:$0xff] }
 0x10f   :  { %4234 = vmatpush1.bf16.msra.mxu0 %v5756_v32  ;;  %v1190_v32 = vld [vmem:[#allocation8 + $0x268] sm:$0xff] }
 0x110   :  { %4235 = vmatprep.subr.bf16.mxu0 %v5765_v35  ;;  %v1213_v35 = vld [vmem:[#allocation8 + $0x320] sm:$0xff]  ;;  %v5807_v37 = vcombine.high %v1186_v31, %v1190_v32  ;;  %v5806_v44 = vcombine.low %v1186_v31, %v1190_v32 }
 0x111   :  { %4398 = vmatpush1.bf16.msra.mxu1 %v5758_v52  ;;  %v5829_v41 = vcombine.high %v1209_v34, %v1213_v35  ;;  %v5828_v46 = vcombine.low %v1209_v34, %v1213_v35 }
 0x112   :  { %4399 = vmatprep.subr.bf16.mxu1 %v5767_v53  ;;  %v1210_v53 = vld [vmem:[#allocation8 + $0x308] sm:$0xff] }
 0x113   :  { %4236 = vmatpush1.bf16.msra.mxu0 %v5764_v40  ;;  %v1198_v40 = vld [vmem:[#allocation8 + $0x2a8] sm:$0xff] }
 0x114   :  { %4237 = vmatprep.subr.bf16.mxu0 %v5773_v43  ;;  %v1221_v43 = vld [vmem:[#allocation8 + $0x360] sm:$0xff]  ;;  %v5815_v45 = vcombine.high %v1194_v39, %v1198_v40  ;;  %v5814_v24 = vcombine.low %v1194_v39, %v1198_v40  ;;  %v1250_v39 = vld [vmem:[#allocation8 + $0x448] sm:$0xff] }
 0x115   :  { %4400 = vmatpush1.bf16.msra.mxu1 %v5766_v60  ;;  %v5837_v48 = vcombine.high %v1217_v42, %v1221_v43  ;;  %v5836_v52 = vcombine.low %v1217_v42, %v1221_v43  ;;  %v1254_v40 = vld [vmem:[#allocation8 + $0x468] sm:$0xff] }
 0x116   :  { %4401 = vmatprep.subr.bf16.mxu1 %v5775_v0  ;;  %v1218_v0 = vld [vmem:[#allocation8 + $0x348] sm:$0xff] }
 0x117   :  { %4238 = vmatpush1.bf16.msra.mxu0 %v5772_v2  ;;  %v1206_v2 = vld [vmem:[#allocation8 + $0x2e8] sm:$0xff] }
 0x118   :  { %4239 = vmatprep.subr.bf16.mxu0 %v5781_v50  ;;  %v1229_v50 = vld [vmem:[#allocation8 + $0x3a0] sm:$0xff]  ;;  %v5823_v51 = vcombine.high %v1202_v47, %v1206_v2  ;;  %v5822_v58 = vcombine.low %v1202_v47, %v1206_v2  ;;  %v1258_v2 = vld [vmem:[#allocation8 + $0x488] sm:$0xff] }
 0x119   :  { %4402 = vmatpush1.bf16.msra.mxu1 %v5774_v11  ;;  %v5845_v55 = vcombine.high %v1225_v49, %v1229_v50  ;;  %v5844_v60 = vcombine.low %v1225_v49, %v1229_v50  ;;  %v1230_v11 = vld [vmem:[#allocation8 + $0x3a8] sm:$0xff]  ;;  %v1261_v47 = vld [vmem:[#allocation8 + $0x4a0] sm:$0xff] }
 0x11a   :  { %4403 = vmatprep.subr.bf16.mxu1 %v5783_v12  ;;  %v5861_v12 = vcombine.high %v6876_v61, %v6878_v62  ;;  %v5847_v13 = vcombine.high %v1226_v10, %v1230_v11  ;;  %v5846_v16 = vcombine.low %v1226_v10, %v1230_v11 }
 0x11b   :  { %4240 = vmatpush1.bf16.msra.mxu0 %v5780_v54  ;;  %v1214_v54 = vld [vmem:[#allocation8 + $0x328] sm:$0xff] }
 0x11c   :  { %4241 = vmatprep.subr.bf16.mxu0 %v5789_v57  ;;  %v1237_v57 = vld [vmem:[#allocation8 + $0x3e0] sm:$0xff]  ;;  %v5831_v59 = vcombine.high %v1210_v53, %v1214_v54  ;;  %v5830_v5 = vcombine.low %v1210_v53, %v1214_v54 }
 0x11d   :  { %4404 = vmatpush1.bf16.msra.mxu1 %v5782_v18  ;;  %v5853_v4 = vcombine.high %v1233_v56, %v1237_v57  ;;  %v5852_v9 = vcombine.low %v1233_v56, %v1237_v57  ;;  %v1265_v53 = vld [vmem:[#allocation8 + $0x4c0] sm:$0xff]  ;;  %v1266_v56 = vld [vmem:[#allocation8 + $0x4c8] sm:$0xff] }
 0x11e   :  { %4405 = vmatprep.subr.bf16.mxu1 %v5791_v20  ;;  %v5863_v20 = vcombine.high %v6880_v63, %v6882_v3  ;;  %v1270_v57 = vld [vmem:[#allocation8 + $0x4e8] sm:$0xff] }
 0x11f   :  { %4242 = vmatpush1.bf16.msra.mxu0 %v5788_v1  ;;  %v1222_v1 = vld [vmem:[#allocation8 + $0x368] sm:$0xff]  ;;  %v5886_v10 = vcombine.low %v1266_v56, %v1270_v57 }
 0x120   :  { %4243 = vmatprep.subr.bf16.mxu0 %v5797_v6  ;;  %v5839_v6 = vcombine.high %v1218_v0, %v1222_v1 }
 0x121   :  { %4406 = vmatpush1.bf16.msra.mxu1 %v5790_v28 }
 0x122   :  { %4407 = vmatprep.subr.bf16.mxu1 %v5799_v29 }
 0x123   :  { %4244 = vmatpush1.bf16.msra.mxu0 %v5796_v19  ;;  %v5838_v19 = vcombine.low %v1218_v0, %v1222_v1  ;;  %v1277_v1 = vld [vmem:[#allocation8 + $0x520] sm:$0xff] }
 0x124   :  { %4245 = vmatprep.subr.bf16.mxu0 %v5805_v15  ;;  %v1238_v15 = vld [vmem:[#allocation8 + $0x3e8] sm:$0xff] }
 0x125   :  { %4408 = vmatpush1.bf16.msra.mxu1 %v5798_v36  ;;  %v5855_v17 = vcombine.high %v1234_v14, %v1238_v15  ;;  %v5854_v18 = vcombine.low %v1234_v14, %v1238_v15  ;;  %v1249_v36 = vld [vmem:[#allocation8 + $0x440] sm:$0xff]  ;;  %v1282_v14 = vld [vmem:[#allocation8 + $0x548] sm:$0xff] }
 0x126   :  { %4409 = vmatprep.subr.bf16.mxu1 %v5807_v37  ;;  %v1286_v15 = vld [vmem:[#allocation8 + $0x568] sm:$0xff] }
 0x127   :  { %4246 = vmatpush1.bf16.msra.mxu0 %v5804_v21  ;;  %v246_v21 = vlaneseq }
 0x128   :  { %4247 = vmatprep.subr.bf16.mxu0 %v5813_v25  ;;  %v6895_v25 = vld [vmem:[#allocation7] sm:$0xff] }
 0x129   :  { %4410 = vmatpush1.bf16.msra.mxu1 %v5806_v44  ;;  %v6892_v22 = vshrl.u32 %v246_v21, 7  ;;  %v1289_v21 = vld [vmem:[#allocation8 + $0x580] sm:$0xff] }
 0x12a   :  { %4411 = vmatprep.subr.bf16.mxu1 %v5815_v45  ;;  %v5871_v45 = vcombine.high %v1250_v39, %v1254_v40 }
 0x12b   :  { %4248 = vmatpush1.bf16.msra.mxu0 %v5812_v30  ;;  %v248_v23 = vsub.s32 0, %v6892_v22  ;;  %v252_v26 = vsub.s32 1, %v6892_v22 }
 0x12c   :  { %4249 = vmatprep.subr.bf16.mxu0 %v5821_v33 }
 0x12d   :  { %4412 = vmatpush1.bf16.msra.mxu1 %v5814_v24  ;;  %v249_v27 = vrot.slane %v6895_v25, %v248_v23  ;;  %v253_v28 = vrot.slane %v6895_v25, %v252_v26  ;;  %v5870_v24 = vcombine.low %v1250_v39, %v1254_v40 }
 0x12e   :  { %4413 = vmatprep.subr.bf16.mxu1 %v5823_v51 }
 0x12f   :  { %4250 = vmatpush1.bf16.msra.mxu0 %v5820_v38  ;;  %v1253_v38 = vld [vmem:[#allocation8 + $0x460] sm:$0xff] }
 0x130   :  { %4251 = vmatprep.subr.bf16.mxu0 %v5829_v41  ;;  %v260_v41 = vsub.s32 3, %v6892_v22  ;;  %v5869_v44 = vcombine.high %v1249_v36, %v1253_v38  ;;  %v5868_v50 = vcombine.low %v1249_v36, %v1253_v38  ;;  %v1298_v36 = vld [vmem:[#allocation8 + $0x5c8] sm:$0xff] }
 0x131   :  { %4414 = vmatpush1.bf16.msra.mxu1 %v5822_v58 }
 0x132   :  { %4415 = vmatprep.subr.bf16.mxu1 %v5831_v59  ;;  %v261_v49 = vrot.slane %v6895_v25, %v260_v41 }
 0x133   :  { %4252 = vmatpush1.bf16.msra.mxu0 %v5828_v46  ;;  %v1257_v46 = vld [vmem:[#allocation8 + $0x480] sm:$0xff] }
 0x134   :  { %4253 = vmatprep.subr.bf16.mxu0 %v5837_v48  ;;  %v1262_v48 = vld [vmem:[#allocation8 + $0x4a8] sm:$0xff]  ;;  %v5877_v51 = vcombine.high %v1257_v46, %v1261_v47  ;;  %v5876_v62 = vcombine.low %v1257_v46, %v1261_v47  ;;  %v1309_v46 = vld [vmem:[#allocation8 + $0x620] sm:$0xff] }
 0x135   :  { %4416 = vmatpush1.bf16.msra.mxu1 %v5830_v5  ;;  %v5878_v63 = vcombine.low %v1258_v2, %v1262_v48  ;;  %v1278_v5 = vld [vmem:[#allocation8 + $0x528] sm:$0xff] }
 0x136   :  { %4417 = vmatprep.subr.bf16.mxu1 %v5839_v6  ;;  %v1306_v47 = vld [vmem:[#allocation8 + $0x608] sm:$0xff] }
 0x137   :  { %4254 = vmatpush1.bf16.msra.mxu0 %v5836_v52  ;;  %v5879_v52 = vcombine.high %v1258_v2, %v1262_v48  ;;  %v1310_v2 = vld [vmem:[#allocation8 + $0x628] sm:$0xff] }
 0x138   :  { %4255 = vmatprep.subr.bf16.mxu0 %v5845_v55  ;;  %v1269_v55 = vld [vmem:[#allocation8 + $0x4e0] sm:$0xff] }
 0x139   :  { %4418 = vmatpush1.bf16.msra.mxu1 %v5838_v19  ;;  %v1281_v19 = vld [vmem:[#allocation8 + $0x540] sm:$0xff] }
 0x13a   :  { %4419 = vmatprep.subr.bf16.mxu1 %v5847_v13  ;;  %v1285_v13 = vld [vmem:[#allocation8 + $0x560] sm:$0xff] }
 0x13b   :  { %4256 = vmatpush1.bf16.msra.mxu0 %v5844_v60  ;;  %v1273_v60 = vld [vmem:[#allocation8 + $0x500] sm:$0xff] }
 0x13c   :  { %4257 = vmatprep.subr.bf16.mxu0 %v5853_v4  ;;  %v1274_v4 = vld [vmem:[#allocation8 + $0x508] sm:$0xff]  ;;  %v5893_v11 = vcombine.high %v1273_v60, %v1277_v1 }
 0x13d   :  { %4420 = vmatpush1.bf16.msra.mxu1 %v5846_v16  ;;  %v5892_v16 = vcombine.low %v1273_v60, %v1277_v1  ;;  %v1329_v1 = vld [vmem:[#allocation8 + $0x6c0] sm:$0xff] }
 0x13e   :  { %4421 = vmatprep.subr.bf16.mxu1 %v5855_v17  ;;  %v5894_v17 = vcombine.low %v1274_v4, %v1278_v5 }
 0x13f   :  { %4258 = vmatpush1.bf16.msra.mxu0 %v5852_v9  ;;  %v5884_v9 = vcombine.low %v1265_v53, %v1269_v55 }
 0x140   :  { %4268 = vmatprep.subr.bf16.mxu0 %v5861_v12  ;;  %v5895_v12 = vcombine.high %v1274_v4, %v1278_v5  ;;  %v1333_v4 = vld [vmem:[#allocation8 + $0x6e0] sm:$0xff]  ;;  %v1330_v5 = vld [vmem:[#allocation8 + $0x6c8] sm:$0xff] }
 0x141   :  { %4422 = vmatpush1.bf16.msra.mxu1 %v5854_v18  ;;  %v5901_v18 = vcombine.high %v1281_v19, %v1285_v13 }
 0x142   :  { %4432 = vmatprep.subr.bf16.mxu1 %v5863_v20  ;;  %v5903_v20 = vcombine.high %v1282_v14, %v1286_v15 }
 0x195   :  { %v967_v29 = vpop.f32.mrb[0].mxu0 }
 0x196   :  { %v968_v30 = vadd.f32 %v967_v29, %v249_v27  ;;  %v969_v31 = vpop.f32.mrb[1].mxu0  ;;  %v1293_v27 = vld [vmem:[#allocation8 + $0x5a0] sm:$0xff]  ;;  %v1294_v29 = vld [vmem:[#allocation8 + $0x5a8] sm:$0xff] }
 0x197   :  { %v970_v32 = vadd.f32 %v969_v31, %v253_v28  ;;  %v971_v33 = vpop.f32.mrb[2].mxu0  ;;  %v6922_v54 = vpop.f32.mrb[0].mxu1  ;;  %v1290_v28 = vld [vmem:[#allocation8 + $0x588] sm:$0xff]  ;;  %v5902_v31 = vcombine.low %v1282_v14, %v1286_v15  ;;  %v5908_v38 = vcombine.low %v1289_v21, %v1293_v27  ;;  %v1341_v14 = vld [vmem:[#allocation8 + $0x720] sm:$0xff] }
 0x198   :  { %v1097_v34 = vmax.f32 %v968_v30, 0.0  ;;  %v972_v35 = vpop.f32.mrb[3].mxu0  ;;  %v1010_v58 = vpop.f32.mrb[1].mxu1  ;;  %v5900_v30 = vcombine.low %v1281_v19, %v1285_v13  ;;  %v5911_v33 = vcombine.high %v1290_v28, %v1294_v29  ;;  %v5910_v39 = vcombine.low %v1290_v28, %v1294_v29  ;;  %v1337_v13 = vld [vmem:[#allocation8 + $0x700] sm:$0xff]  ;;  %v1338_v15 = vld [vmem:[#allocation8 + $0x708] sm:$0xff] }
 0x199   :  { %v1098_v37 = vmax.f32 %v970_v32, 0.0  ;;  %v1011_v59 = vadd.f32 %v1010_v58, %v261_v49  ;;  %v1012_v61 = vpop.f32.mrb[2].mxu1  ;;  %v5909_v32 = vcombine.high %v1289_v21, %v1293_v27  ;;  %v1301_v35 = vld [vmem:[#allocation8 + $0x5e0] sm:$0xff]  ;;  %v1346_v29 = vld [vmem:[#allocation8 + $0x748] sm:$0xff] }
 0x19a   :  { %v6907_v43 = vpack.c.bf16 %v1097_v34, %v1097_v34  ;;  %v1013_v3 = vpop.f32.mrb[3].mxu1  ;;  %v1297_v34 = vld [vmem:[#allocation8 + $0x5c0] sm:$0xff] }
 0x19b   :  { %v6905_v42 = vpack.c.bf16 %v1098_v37, %v1098_v37  ;;  %v1100_v0 = vmax.f32 %v1011_v59, 0.0  ;;  %v1302_v37 = vld [vmem:[#allocation8 + $0x5e8] sm:$0xff]  ;;  %v5917_v40 = vcombine.high %v1297_v34, %v1301_v35  ;;  %v5916_v48 = vcombine.low %v1297_v34, %v1301_v35  ;;  %v1321_v61 = vld [vmem:[#allocation8 + $0x680] sm:$0xff] }
 0x19c   :  { %v5918_v49 = vcombine.low %v1298_v36, %v1302_v37  ;;  %v1326_v3 = vld [vmem:[#allocation8 + $0x6a8] sm:$0xff]  ;;  %v1345_v27 = vld [vmem:[#allocation8 + $0x740] sm:$0xff] }
 0x19d   :  { %4259 = vmatprep.mubr.bf16.mxu0 %v6905_v42  ;;  %4423 = vmatprep.mubr.bf16.mxu1 %v6905_v42  ;;  %v6924_v6 = vpack.c.bf16 %v1100_v0, %v1100_v0  ;;  %v1349_v28 = vld [vmem:[#allocation8 + $0x760] sm:$0xff] }
 0x19e   :  { %4260 = vmatmul.mubr.bf16.vlgmr.msra.gmra.mrb[8].mxu0 %v6907_v43  ;;  %4424 = vmatmul.mubr.bf16.vlgmr.msra.gmra.mrb[8].mxu1 %v6907_v43  ;;  %v5965_v34 = vcombine.high %v1345_v27, %v1349_v28 }
 0x19f   :  { %4269 = vmatpush1.bf16.msra.mxu0 %v5860_v7  ;;  %4433 = vmatpush1.bf16.msra.mxu1 %v5862_v8  ;;  %v5885_v7 = vcombine.high %v1265_v53, %v1269_v55  ;;  %v5887_v8 = vcombine.high %v1266_v56, %v1270_v57  ;;  %v1314_v53 = vld [vmem:[#allocation8 + $0x648] sm:$0xff]  ;;  %v5926_v57 = vcombine.low %v1306_v47, %v1310_v2 }
 0x1a0   :  { %4270 = vmatprep.subr.bf16.mxu0 %v5869_v44  ;;  %4434 = vmatprep.subr.bf16.mxu1 %v5871_v45  ;;  %v5919_v44 = vcombine.high %v1298_v36, %v1302_v37  ;;  %v1305_v45 = vld [vmem:[#allocation8 + $0x600] sm:$0xff]  ;;  %v1318_v55 = vld [vmem:[#allocation8 + $0x668] sm:$0xff] }
 0x1a1   :  { %4300 = vmatprep.mubr.bf16.mxu0 %v6924_v6  ;;  %4464 = vmatprep.mubr.bf16.mxu1 %v6924_v6  ;;  %v5924_v56 = vcombine.low %v1305_v45, %v1309_v46  ;;  %v5935_v59 = vcombine.high %v1314_v53, %v1318_v55  ;;  %v1353_v36 = vld [vmem:[#allocation8 + $0x780] sm:$0xff] }
 0x1a2   :  { %v1357_v37 = vld [vmem:[#allocation8 + $0x7a0] sm:$0xff] }
 0x1a3   :  { %4271 = vmatpush1.bf16.msra.mxu0 %v5868_v50  ;;  %4435 = vmatpush1.bf16.msra.mxu1 %v5870_v24  ;;  %v5925_v50 = vcombine.high %v1305_v45, %v1309_v46  ;;  %v5927_v24 = vcombine.high %v1306_v47, %v1310_v2  ;;  %v268_v46 = vsub.s32 5, %v6892_v22  ;;  %v5973_v47 = vcombine.high %v1353_v36, %v1357_v37 }
 0x1a4   :  { %4272 = vmatprep.subr.bf16.mxu0 %v5877_v51  ;;  %4436 = vmatprep.subr.bf16.mxu1 %v5879_v52  ;;  %v1313_v51 = vld [vmem:[#allocation8 + $0x640] sm:$0xff] }
 0x1a5   :  { %v1317_v52 = vld [vmem:[#allocation8 + $0x660] sm:$0xff] }
 0x1a6   :  { %v5933_v58 = vcombine.high %v1313_v51, %v1317_v52 }
 0x1a7   :  { %4273 = vmatpush1.bf16.msra.mxu0 %v5876_v62  ;;  %4437 = vmatpush1.bf16.msra.mxu1 %v5878_v63  ;;  %v1325_v62 = vld [vmem:[#allocation8 + $0x6a0] sm:$0xff]  ;;  %v1322_v63 = vld [vmem:[#allocation8 + $0x688] sm:$0xff] }
 0x1a8   :  { %4274 = vmatprep.subr.bf16.mxu0 %v5885_v7  ;;  %4438 = vmatprep.subr.bf16.mxu1 %v5887_v8  ;;  %v5932_v7 = vcombine.low %v1313_v51, %v1317_v52  ;;  %v5934_v8 = vcombine.low %v1314_v53, %v1318_v55  ;;  %v5941_v60 = vcombine.high %v1321_v61, %v1325_v62 }
 0x1a9   :  { %v5943_v0 = vcombine.high %v1322_v63, %v1326_v3  ;;  %v5972_v52 = vcombine.low %v1353_v36, %v1357_v37  ;;  %v269_v55 = vrot.slane %v6895_v25, %v268_v46  ;;  %v1397_v36 = vld [vmem:[#allocation8 + $0x8e0] sm:$0xff]  ;;  %v1394_v37 = vld [vmem:[#allocation8 + $0x8c8] sm:$0xff] }
 0x1ab   :  { %4275 = vmatpush1.bf16.msra.mxu0 %v5884_v9  ;;  %4439 = vmatpush1.bf16.msra.mxu1 %v5886_v10  ;;  %v1334_v9 = vld [vmem:[#allocation8 + $0x6e8] sm:$0xff]  ;;  %v5940_v10 = vcombine.low %v1321_v61, %v1325_v62 }
 0x1ac   :  { %4276 = vmatprep.subr.bf16.mxu0 %v5893_v11  ;;  %4440 = vmatprep.subr.bf16.mxu1 %v5895_v12  ;;  %v5942_v11 = vcombine.low %v1322_v63, %v1326_v3  ;;  %v5949_v12 = vcombine.high %v1329_v1, %v1333_v4  ;;  %v5951_v19 = vcombine.high %v1330_v5, %v1334_v9  ;;  %v1370_v61 = vld [vmem:[#allocation8 + $0x808] sm:$0xff] }
 0x1ad   :  { %v1374_v62 = vld [vmem:[#allocation8 + $0x828] sm:$0xff] }
 0x1af   :  { %4277 = vmatpush1.bf16.msra.mxu0 %v5892_v16  ;;  %4441 = vmatpush1.bf16.msra.mxu1 %v5894_v17  ;;  %v1342_v16 = vld [vmem:[#allocation8 + $0x728] sm:$0xff]  ;;  %v5948_v17 = vcombine.low %v1329_v1, %v1333_v4  ;;  %v5991_v4 = vcombine.high %v1370_v61, %v1374_v62 }
 0x1b0   :  { %4278 = vmatprep.subr.bf16.mxu0 %v5901_v18  ;;  %4442 = vmatprep.subr.bf16.mxu1 %v5903_v20  ;;  %v5950_v18 = vcombine.low %v1330_v5, %v1334_v9  ;;  %v5957_v20 = vcombine.high %v1337_v13, %v1341_v14  ;;  %v5959_v21 = vcombine.high %v1338_v15, %v1342_v16  ;;  %v1377_v5 = vld [vmem:[#allocation8 + $0x840] sm:$0xff] }
 0x1b3   :  { %4279 = vmatpush1.bf16.msra.mxu0 %v5900_v30  ;;  %4443 = vmatpush1.bf16.msra.mxu1 %v5902_v31  ;;  %v1350_v30 = vld [vmem:[#allocation8 + $0x768] sm:$0xff]  ;;  %v256_v31 = vsub.s32 2, %v6892_v22 }
 0x1b4   :  { %4280 = vmatprep.subr.bf16.mxu0 %v5909_v32  ;;  %4444 = vmatprep.subr.bf16.mxu1 %v5911_v33  ;;  %v5956_v32 = vcombine.low %v1337_v13, %v1341_v14  ;;  %v5958_v33 = vcombine.low %v1338_v15, %v1342_v16  ;;  %v5967_v35 = vcombine.high %v1346_v29, %v1350_v30 }
 0x1b5   :  { %v5966_v45 = vcombine.low %v1346_v29, %v1350_v30  ;;  %v5990_v15 = vcombine.low %v1370_v61, %v1374_v62  ;;  %v1414_v61 = vld [vmem:[#allocation8 + $0x968] sm:$0xff] }
 0x1b7   :  { %4281 = vmatpush1.bf16.msra.mxu0 %v5908_v38  ;;  %4445 = vmatpush1.bf16.msra.mxu1 %v5910_v39  ;;  %v1354_v38 = vld [vmem:[#allocation8 + $0x788] sm:$0xff] }
 0x1b8   :  { %4282 = vmatprep.subr.bf16.mxu0 %v5917_v40  ;;  %4446 = vmatprep.subr.bf16.mxu1 %v5919_v44  ;;  %v1358_v39 = vld [vmem:[#allocation8 + $0x7a8] sm:$0xff]  ;;  %v257_v40 = vrot.slane %v6895_v25, %v256_v31  ;;  %v5964_v44 = vcombine.low %v1345_v27, %v1349_v28 }
 0x1b9   :  { %v5975_v2 = vcombine.high %v1354_v38, %v1358_v39  ;;  %v5974_v53 = vcombine.low %v1354_v38, %v1358_v39  ;;  %v1390_v27 = vld [vmem:[#allocation8 + $0x8a8] sm:$0xff] }
 0x1ba   :  { %v1009_v51 = vadd.f32 %v6922_v54, %v257_v40  ;;  %v1398_v38 = vld [vmem:[#allocation8 + $0x8e8] sm:$0xff] }
 0x1bb   :  { %4283 = vmatpush1.bf16.msra.mxu0 %v5916_v48  ;;  %4447 = vmatpush1.bf16.msra.mxu1 %v5918_v49  ;;  %v1361_v48 = vld [vmem:[#allocation8 + $0x7c0] sm:$0xff] }
 0x1bc   :  { %4284 = vmatprep.subr.bf16.mxu0 %v5925_v50  ;;  %4448 = vmatprep.subr.bf16.mxu1 %v5927_v24  ;;  %v1365_v49 = vld [vmem:[#allocation8 + $0x7e0] sm:$0xff]  ;;  %v1362_v50 = vld [vmem:[#allocation8 + $0x7c8] sm:$0xff]  ;;  %v1099_v3 = vmax.f32 %v1009_v51, 0.0 }
 0x1bd   :  { %v1366_v24 = vld [vmem:[#allocation8 + $0x7e8] sm:$0xff] }
 0x1be   :  { %v6939_v13 = vpack.c.bf16 %v1099_v3, %v1099_v3  ;;  %v1406_v51 = vld [vmem:[#allocation8 + $0x928] sm:$0xff] }
 0x1bf   :  { %4285 = vmatpush1.bf16.msra.mxu0 %v5924_v56  ;;  %4449 = vmatpush1.bf16.msra.mxu1 %v5926_v57  ;;  %v5981_v56 = vcombine.high %v1361_v48, %v1365_v49  ;;  %v5983_v57 = vcombine.high %v1362_v50, %v1366_v24 }
 0x1c0   :  { %4286 = vmatprep.subr.bf16.mxu0 %v5933_v58  ;;  %4450 = vmatprep.subr.bf16.mxu1 %v5935_v59  ;;  %v1369_v58 = vld [vmem:[#allocation8 + $0x800] sm:$0xff] }
 0x1c1   :  { %v1373_v59 = vld [vmem:[#allocation8 + $0x820] sm:$0xff] }
 0x1c2   :  { %v5989_v1 = vcombine.high %v1369_v58, %v1373_v59  ;;  %v5988_v14 = vcombine.low %v1369_v58, %v1373_v59  ;;  %v1413_v58 = vld [vmem:[#allocation8 + $0x960] sm:$0xff]  ;;  %v1410_v59 = vld [vmem:[#allocation8 + $0x948] sm:$0xff] }
 0x1c3   :  { %4287 = vmatpush1.bf16.msra.mxu0 %v5932_v7  ;;  %4451 = vmatpush1.bf16.msra.mxu1 %v5934_v8  ;;  %v5980_v7 = vcombine.low %v1361_v48, %v1365_v49  ;;  %v5982_v8 = vcombine.low %v1362_v50, %v1366_v24  ;;  %v6015_v48 = vcombine.high %v1394_v37, %v1398_v38  ;;  %v1401_v49 = vld [vmem:[#allocation8 + $0x900] sm:$0xff]  ;;  %v1402_v24 = vld [vmem:[#allocation8 + $0x908] sm:$0xff] }
 0x1c4   :  { %4288 = vmatprep.subr.bf16.mxu0 %v5941_v60  ;;  %4452 = vmatprep.subr.bf16.mxu1 %v5943_v0  ;;  %v1405_v50 = vld [vmem:[#allocation8 + $0x920] sm:$0xff]  ;;  %v6022_v3 = vcombine.low %v1402_v24, %v1406_v51 }
 0x1c5   :  { %v6020_v62 = vcombine.low %v1401_v49, %v1405_v50 }
 0x1c7   :  { %4289 = vmatpush1.bf16.msra.mxu0 %v5940_v10  ;;  %4453 = vmatpush1.bf16.msra.mxu1 %v5942_v11  ;;  %v1381_v10 = vld [vmem:[#allocation8 + $0x860] sm:$0xff]  ;;  %v1378_v11 = vld [vmem:[#allocation8 + $0x848] sm:$0xff] }
 0x1c8   :  { %4290 = vmatprep.subr.bf16.mxu0 %v5949_v12  ;;  %4454 = vmatprep.subr.bf16.mxu1 %v5951_v19  ;;  %v1382_v12 = vld [vmem:[#allocation8 + $0x868] sm:$0xff]  ;;  %v5997_v16 = vcombine.high %v1377_v5, %v1381_v10  ;;  %v5996_v29 = vcombine.low %v1377_v5, %v1381_v10  ;;  %v6030_v5 = vcombine.low %v1410_v59, %v1414_v61 }
 0x1c9   :  { %v5998_v30 = vcombine.low %v1378_v11, %v1382_v12 }
 0x1cb   :  { %4291 = vmatpush1.bf16.msra.mxu0 %v5948_v17  ;;  %4455 = vmatpush1.bf16.msra.mxu1 %v5950_v18  ;;  %v5999_v17 = vcombine.high %v1378_v11, %v1382_v12  ;;  %v1385_v18 = vld [vmem:[#allocation8 + $0x880] sm:$0xff] }
 0x1cc   :  { %4292 = vmatprep.subr.bf16.mxu0 %v5957_v20  ;;  %4456 = vmatprep.subr.bf16.mxu1 %v5959_v21  ;;  %v1389_v20 = vld [vmem:[#allocation8 + $0x8a0] sm:$0xff]  ;;  %v1386_v21 = vld [vmem:[#allocation8 + $0x888] sm:$0xff] }
 0x1cd   :  { %v1425_v11 = vld [vmem:[#allocation8 + $0x9c0] sm:$0xff] }
 0x1ce   :  { %v1429_v12 = vld [vmem:[#allocation8 + $0x9e0] sm:$0xff] }
 0x1cf   :  { %4293 = vmatpush1.bf16.msra.mxu0 %v5956_v32  ;;  %4457 = vmatpush1.bf16.msra.mxu1 %v5958_v33  ;;  %v6005_v32 = vcombine.high %v1385_v18, %v1389_v20  ;;  %v6007_v33 = vcombine.high %v1386_v21, %v1390_v27 }
 0x1d0   :  { %4294 = vmatprep.subr.bf16.mxu0 %v5965_v34  ;;  %4458 = vmatprep.subr.bf16.mxu1 %v5967_v35  ;;  %v1393_v34 = vld [vmem:[#allocation8 + $0x8c0] sm:$0xff] }
 0x1d3   :  { %4295 = vmatpush1.bf16.msra.mxu0 %v5964_v44  ;;  %4459 = vmatpush1.bf16.msra.mxu1 %v5966_v45  ;;  %v6004_v44 = vcombine.low %v1385_v18, %v1389_v20  ;;  %v6006_v45 = vcombine.low %v1386_v21, %v1390_v27  ;;  %v1433_v20 = vld [vmem:[#allocation8 + $0xa00] sm:$0xff]  ;;  %v1434_v27 = vld [vmem:[#allocation8 + $0xa08] sm:$0xff] }
 0x1d4   :  { %4296 = vmatprep.subr.bf16.mxu0 %v5973_v47  ;;  %4460 = vmatprep.subr.bf16.mxu1 %v5975_v2  ;;  %v6013_v2 = vcombine.high %v1393_v34, %v1397_v36  ;;  %v1437_v21 = vld [vmem:[#allocation8 + $0xa20] sm:$0xff] }
 0x1d5   :  { %v6937_v63 = vpop.f32.mrb[4].mxu0 }
 0x1d6   :  { %v1051_v54 = vpop.f32.mrb[5].mxu0 }
 0x1d7   :  { %4297 = vmatpush1.bf16.msra.mxu0 %v5972_v52  ;;  %4461 = vmatpush1.bf16.msra.mxu1 %v5974_v53  ;;  %v1052_v60 = vadd.f32 %v1051_v54, %v269_v55  ;;  %v1053_v0 = vpop.f32.mrb[6].mxu0  ;;  %v6945_v35 = vpop.f32.mrb[4].mxu1  ;;  %v6012_v52 = vcombine.low %v1393_v34, %v1397_v36  ;;  %v6014_v53 = vcombine.low %v1394_v37, %v1398_v38  ;;  %v1441_v36 = vld [vmem:[#allocation8 + $0xa40] sm:$0xff]  ;;  %v1442_v38 = vld [vmem:[#allocation8 + $0xa48] sm:$0xff] }
 0x1d8   :  { %4298 = vmatprep.subr.bf16.mxu0 %v5981_v56  ;;  %4462 = vmatprep.subr.bf16.mxu1 %v5983_v57  ;;  %v1054_v9 = vpop.f32.mrb[7].mxu0  ;;  %v6949_v39 = vpop.f32.mrb[5].mxu1  ;;  %v6021_v55 = vcombine.high %v1401_v49, %v1405_v50  ;;  %v6023_v56 = vcombine.high %v1402_v24, %v1406_v51  ;;  %v1409_v57 = vld [vmem:[#allocation8 + $0x940] sm:$0xff]  ;;  %v1418_v0 = vld [vmem:[#allocation8 + $0x988] sm:$0xff] }
 0x1d9   :  { %v1102_v19 = vmax.f32 %v1052_v60, 0.0  ;;  %v1094_v40 = vpop.f32.mrb[6].mxu1  ;;  %v6029_v54 = vcombine.high %v1409_v57, %v1413_v58  ;;  %v1421_v60 = vld [vmem:[#allocation8 + $0x9a0] sm:$0xff]  ;;  %v1450_v50 = vld [vmem:[#allocation8 + $0xa88] sm:$0xff] }
 0x1da   :  { %v1095_v47 = vpop.f32.mrb[7].mxu1  ;;  %v1445_v37 = vld [vmem:[#allocation8 + $0xa60] sm:$0xff]  ;;  %v1446_v40 = vld [vmem:[#allocation8 + $0xa68] sm:$0xff] }
 0x1db   :  { %4299 = vmatpush1.bf16.msra.mxu0 %v5980_v7  ;;  %4463 = vmatpush1.bf16.msra.mxu1 %v5982_v8  ;;  %v6941_v28 = vpack.c.bf16 %v1102_v19, %v1102_v19  ;;  %v6031_v7 = vcombine.high %v1410_v59, %v1414_v61  ;;  %v1417_v8 = vld [vmem:[#allocation8 + $0x980] sm:$0xff]  ;;  %v1426_v19 = vld [vmem:[#allocation8 + $0x9c8] sm:$0xff]  ;;  %v6061_v47 = vcombine.high %v1441_v36, %v1445_v37 }
 0x1dc   :  { %4309 = vmatprep.subr.bf16.mxu0 %v5989_v1  ;;  %4473 = vmatprep.subr.bf16.mxu1 %v5991_v4  ;;  %v1422_v1 = vld [vmem:[#allocation8 + $0x9a8] sm:$0xff]  ;;  %v6028_v4 = vcombine.low %v1409_v57, %v1413_v58  ;;  %v6037_v9 = vcombine.high %v1417_v8, %v1421_v60  ;;  %v1453_v49 = vld [vmem:[#allocation8 + $0xaa0] sm:$0xff]  ;;  %v6060_v51 = vcombine.low %v1441_v36, %v1445_v37 }
 0x1dd   :  { %v6039_v10 = vcombine.high %v1418_v0, %v1422_v1  ;;  %v1454_v24 = vld [vmem:[#allocation8 + $0xaa8] sm:$0xff]  ;;  %v1461_v57 = vld [vmem:[#allocation8 + $0xae0] sm:$0xff] }
 0x1de   :  { %4301 = vmatmul.mubr.bf16.vlgmr.msra.gmra.mrb[8].mxu0 %v6939_v13  ;;  %4465 = vmatmul.mubr.bf16.vlgmr.msra.gmra.mrb[8].mxu1 %v6939_v13  ;;  %v1458_v58 = vld [vmem:[#allocation8 + $0xac8] sm:$0xff] }
 0x1df   :  { %4310 = vmatpush1.bf16.msra.mxu0 %v5988_v14  ;;  %4474 = vmatpush1.bf16.msra.mxu1 %v5990_v15  ;;  %v1430_v14 = vld [vmem:[#allocation8 + $0x9e8] sm:$0xff]  ;;  %v6036_v15 = vcombine.low %v1417_v8, %v1421_v60  ;;  %v1469_v8 = vld [vmem:[#allocation8 + $0xb20] sm:$0xff] }
 0x1e0   :  { %4311 = vmatprep.subr.bf16.mxu0 %v5997_v16  ;;  %4475 = vmatprep.subr.bf16.mxu1 %v5999_v17  ;;  %v6038_v16 = vcombine.low %v1418_v0, %v1422_v1  ;;  %v6045_v17 = vcombine.high %v1425_v11, %v1429_v12  ;;  %v6047_v18 = vcombine.high %v1426_v19, %v1430_v14  ;;  %v1462_v59 = vld [vmem:[#allocation8 + $0xae8] sm:$0xff] }
 0x1e1   :  { %4341 = vmatprep.mubr.bf16.mxu0 %v6941_v28  ;;  %4505 = vmatprep.mubr.bf16.mxu1 %v6941_v28  ;;  %v1466_v60 = vld [vmem:[#allocation8 + $0xb08] sm:$0xff] }
 0x1e2   :  { %v1470_v0 = vld [vmem:[#allocation8 + $0xb28] sm:$0xff] }
 0x1e3   :  { %4312 = vmatpush1.bf16.msra.mxu0 %v5996_v29  ;;  %4476 = vmatpush1.bf16.msra.mxu1 %v5998_v30  ;;  %v1438_v29 = vld [vmem:[#allocation8 + $0xa28] sm:$0xff]  ;;  %v6044_v30 = vcombine.low %v1425_v11, %v1429_v12  ;;  %v1477_v11 = vld [vmem:[#allocation8 + $0xb60] sm:$0xff] }
 0x1e4   :  { %4313 = vmatprep.subr.bf16.mxu0 %v6005_v32  ;;  %4477 = vmatprep.subr.bf16.mxu1 %v6007_v33  ;;  %v6046_v32 = vcombine.low %v1426_v19, %v1430_v14  ;;  %v6053_v33 = vcombine.high %v1433_v20, %v1437_v21  ;;  %v6055_v34 = vcombine.high %v1434_v27, %v1438_v29  ;;  %v1474_v12 = vld [vmem:[#allocation8 + $0xb48] sm:$0xff]  ;;  %v264_v14 = vsub.s32 4, %v6892_v22 }
 0x1e5   :  { %v1478_v19 = vld [vmem:[#allocation8 + $0xb68] sm:$0xff] }
 0x1e7   :  { %4314 = vmatpush1.bf16.msra.mxu0 %v6004_v44  ;;  %4478 = vmatpush1.bf16.msra.mxu1 %v6006_v45  ;;  %v6052_v44 = vcombine.low %v1433_v20, %v1437_v21  ;;  %v6054_v45 = vcombine.low %v1434_v27, %v1438_v29  ;;  %v1481_v20 = vld [vmem:[#allocation8 + $0xb80] sm:$0xff]  ;;  %v1482_v27 = vld [vmem:[#allocation8 + $0xb88] sm:$0xff] }
 0x1e8   :  { %4315 = vmatprep.subr.bf16.mxu0 %v6013_v2  ;;  %4479 = vmatprep.subr.bf16.mxu1 %v6015_v48  ;;  %v6063_v2 = vcombine.high %v1442_v38, %v1446_v40  ;;  %v1449_v48 = vld [vmem:[#allocation8 + $0xa80] sm:$0xff]  ;;  %v1486_v29 = vld [vmem:[#allocation8 + $0xba8] sm:$0xff] }
 0x1e9   :  { %v6068_v61 = vcombine.low %v1449_v48, %v1453_v49  ;;  %v1485_v21 = vld [vmem:[#allocation8 + $0xba0] sm:$0xff]  ;;  %v6103_v37 = vcombine.high %v1482_v27, %v1486_v29 }
 0x1ea   :  { %v6101_v36 = vcombine.high %v1481_v20, %v1485_v21 }
 0x1eb   :  { %4316 = vmatpush1.bf16.msra.mxu0 %v6012_v52  ;;  %4480 = vmatpush1.bf16.msra.mxu1 %v6014_v53  ;;  %v6062_v52 = vcombine.low %v1442_v38, %v1446_v40  ;;  %v6069_v53 = vcombine.high %v1449_v48, %v1453_v49  ;;  %v1489_v38 = vld [vmem:[#allocation8 + $0xbc0] sm:$0xff]  ;;  %v6100_v48 = vcombine.low %v1481_v20, %v1485_v21  ;;  %v1522_v20 = vld [vmem:[#allocation8 + $0xcc8] sm:$0xff] }
 0x1ec   :  { %4317 = vmatprep.subr.bf16.mxu0 %v6021_v55  ;;  %4481 = vmatprep.subr.bf16.mxu1 %v6023_v56  ;;  %v6071_v55 = vcombine.high %v1450_v50, %v1454_v24  ;;  %v1457_v56 = vld [vmem:[#allocation8 + $0xac0] sm:$0xff]  ;;  %v6102_v49 = vcombine.low %v1482_v27, %v1486_v29  ;;  %v1526_v21 = vld [vmem:[#allocation8 + $0xce8] sm:$0xff] }
 0x1ed   :  { %v6076_v1 = vcombine.low %v1457_v56, %v1461_v57  ;;  %v1493_v40 = vld [vmem:[#allocation8 + $0xbe0] sm:$0xff] }
 0x1ef   :  { %4318 = vmatpush1.bf16.msra.mxu0 %v6020_v62  ;;  %4482 = vmatpush1.bf16.msra.mxu1 %v6022_v3  ;;  %v6070_v62 = vcombine.low %v1450_v50, %v1454_v24  ;;  %v6077_v3 = vcombine.high %v1457_v56, %v1461_v57  ;;  %v6109_v50 = vcombine.high %v1489_v38, %v1493_v40 }
 0x1f0   :  { %4319 = vmatprep.subr.bf16.mxu0 %v6029_v54  ;;  %4483 = vmatprep.subr.bf16.mxu1 %v6031_v7  ;;  %v6079_v54 = vcombine.high %v1458_v58, %v1462_v59  ;;  %v1465_v7 = vld [vmem:[#allocation8 + $0xb00] sm:$0xff] }
 0x1f3   :  { %4320 = vmatpush1.bf16.msra.mxu0 %v6028_v4  ;;  %4484 = vmatpush1.bf16.msra.mxu1 %v6030_v5  ;;  %v6078_v4 = vcombine.low %v1458_v58, %v1462_v59  ;;  %v6085_v5 = vcombine.high %v1465_v7, %v1469_v8 }
 0x1f4   :  { %4321 = vmatprep.subr.bf16.mxu0 %v6037_v9  ;;  %4485 = vmatprep.subr.bf16.mxu1 %v6039_v10  ;;  %v6087_v9 = vcombine.high %v1466_v60, %v1470_v0  ;;  %v1473_v10 = vld [vmem:[#allocation8 + $0xb40] sm:$0xff] }
 0x1f7   :  { %4322 = vmatpush1.bf16.msra.mxu0 %v6036_v15  ;;  %4486 = vmatpush1.bf16.msra.mxu1 %v6038_v16  ;;  %v6084_v15 = vcombine.low %v1465_v7, %v1469_v8  ;;  %v6086_v16 = vcombine.low %v1466_v60, %v1470_v0 }
 0x1f8   :  { %4323 = vmatprep.subr.bf16.mxu0 %v6045_v17  ;;  %4487 = vmatprep.subr.bf16.mxu1 %v6047_v18  ;;  %v6093_v17 = vcombine.high %v1473_v10, %v1477_v11  ;;  %v6095_v18 = vcombine.high %v1474_v12, %v1478_v19 }
 0x1fb   :  { %4324 = vmatpush1.bf16.msra.mxu0 %v6044_v30  ;;  %4488 = vmatpush1.bf16.msra.mxu1 %v6046_v32  ;;  %v276_v30 = vsub.s32 7, %v6892_v22  ;;  %v265_v32 = vrot.slane %v6895_v25, %v264_v14 }
 0x1fc   :  { %4325 = vmatprep.subr.bf16.mxu0 %v6053_v33  ;;  %4489 = vmatprep.subr.bf16.mxu1 %v6055_v34  ;;  %v6092_v33 = vcombine.low %v1473_v10, %v1477_v11  ;;  %v6094_v34 = vcombine.low %v1474_v12, %v1478_v19  ;;  %v1518_v10 = vld [vmem:[#allocation8 + $0xca8] sm:$0xff] }
 0x1ff   :  { %4326 = vmatpush1.bf16.msra.mxu0 %v6052_v44  ;;  %4490 = vmatpush1.bf16.msra.mxu1 %v6054_v45  ;;  %v1490_v44 = vld [vmem:[#allocation8 + $0xbc8] sm:$0xff] }
 0x200   :  { %4327 = vmatprep.subr.bf16.mxu0 %v6061_v47  ;;  %4491 = vmatprep.subr.bf16.mxu1 %v6063_v2  ;;  %v1494_v45 = vld [vmem:[#allocation8 + $0xbe8] sm:$0xff]  ;;  %v277_v47 = vrot.slane %v6895_v25, %v276_v30  ;;  %v1050_v2 = vadd.f32 %v6937_v63, %v265_v32  ;;  %v6108_v25 = vcombine.low %v1489_v38, %v1493_v40 }
 0x201   :  { %v6111_v24 = vcombine.high %v1490_v44, %v1494_v45  ;;  %v6110_v58 = vcombine.low %v1490_v44, %v1494_v45  ;;  %v1534_v38 = vld [vmem:[#allocation8 + $0xd28] sm:$0xff]  ;;  %v6142_v44 = vcombine.low %v1522_v20, %v1526_v21 }
 0x202   :  { %v1093_v56 = vadd.f32 %v6949_v39, %v277_v47  ;;  %v1101_v57 = vmax.f32 %v1050_v2, 0.0  ;;  %v1537_v2 = vld [vmem:[#allocation8 + $0xd40] sm:$0xff] }
 0x203   :  { %4328 = vmatpush1.bf16.msra.mxu0 %v6060_v51  ;;  %4492 = vmatpush1.bf16.msra.mxu1 %v6062_v52  ;;  %v1497_v51 = vld [vmem:[#allocation8 + $0xc00] sm:$0xff] }
 0x204   :  { %4329 = vmatprep.subr.bf16.mxu0 %v6069_v53  ;;  %4493 = vmatprep.subr.bf16.mxu1 %v6071_v55  ;;  %v1501_v52 = vld [vmem:[#allocation8 + $0xc20] sm:$0xff]  ;;  %v1498_v53 = vld [vmem:[#allocation8 + $0xc08] sm:$0xff]  ;;  %v1104_v7 = vmax.f32 %v1093_v56, 0.0  ;;  %v6961_v8 = vpack.c.bf16 %v1101_v57, %v1101_v57 }
 0x205   :  { %v1502_v55 = vld [vmem:[#allocation8 + $0xc28] sm:$0xff]  ;;  %v6117_v63 = vcombine.high %v1497_v51, %v1501_v52  ;;  %v6116_v60 = vcombine.low %v1497_v51, %v1501_v52  ;;  %v1549_v56 = vld [vmem:[#allocation8 + $0xda0] sm:$0xff] }
 0x206   :  { %v6119_v59 = vcombine.high %v1498_v53, %v1502_v55  ;;  %v6118_v39 = vcombine.low %v1498_v53, %v1502_v55  ;;  %v6963_v11 = vpack.c.bf16 %v1104_v7, %v1104_v7  ;;  %v1545_v55 = vld [vmem:[#allocation8 + $0xd80] sm:$0xff]  ;;  %v1546_v57 = vld [vmem:[#allocation8 + $0xd88] sm:$0xff] }
 0x207   :  { %4330 = vmatpush1.bf16.msra.mxu0 %v6068_v61  ;;  %4494 = vmatpush1.bf16.msra.mxu1 %v6070_v62  ;;  %v1505_v61 = vld [vmem:[#allocation8 + $0xc40] sm:$0xff]  ;;  %v1558_v7 = vld [vmem:[#allocation8 + $0xde8] sm:$0xff] }
 0x208   :  { %4331 = vmatprep.subr.bf16.mxu0 %v6077_v3  ;;  %4495 = vmatprep.subr.bf16.mxu1 %v6079_v54  ;;  %v1509_v62 = vld [vmem:[#allocation8 + $0xc60] sm:$0xff]  ;;  %v1506_v3 = vld [vmem:[#allocation8 + $0xc48] sm:$0xff] }
 0x209   :  { %v1510_v54 = vld [vmem:[#allocation8 + $0xc68] sm:$0xff]  ;;  %v6125_v0 = vcombine.high %v1505_v61, %v1509_v62  ;;  %v6124_v12 = vcombine.low %v1505_v61, %v1509_v62  ;;  %v1553_v62 = vld [vmem:[#allocation8 + $0xdc0] sm:$0xff] }
 0x20a   :  { %v6126_v19 = vcombine.low %v1506_v3, %v1510_v54 }
 0x20b   :  { %4332 = vmatpush1.bf16.msra.mxu0 %v6076_v1  ;;  %4496 = vmatpush1.bf16.msra.mxu1 %v6078_v4  ;;  %v6127_v1 = vcombine.high %v1506_v3, %v1510_v54  ;;  %v1513_v4 = vld [vmem:[#allocation8 + $0xc80] sm:$0xff]  ;;  %v1554_v54 = vld [vmem:[#allocation8 + $0xdc8] sm:$0xff] }
 0x20c   :  { %4333 = vmatprep.subr.bf16.mxu0 %v6085_v5  ;;  %4497 = vmatprep.subr.bf16.mxu1 %v6087_v9  ;;  %v1517_v5 = vld [vmem:[#allocation8 + $0xca0] sm:$0xff]  ;;  %v1514_v9 = vld [vmem:[#allocation8 + $0xc88] sm:$0xff] }
 0x20d   :  { %v6132_v27 = vcombine.low %v1513_v4, %v1517_v5  ;;  %v6134_v29 = vcombine.low %v1514_v9, %v1518_v10  ;;  %v1557_v3 = vld [vmem:[#allocation8 + $0xde0] sm:$0xff] }
 0x20f   :  { %4334 = vmatpush1.bf16.msra.mxu0 %v6084_v15  ;;  %4498 = vmatpush1.bf16.msra.mxu1 %v6086_v16  ;;  %v6133_v15 = vcombine.high %v1513_v4, %v1517_v5  ;;  %v6135_v16 = vcombine.high %v1514_v9, %v1518_v10  ;;  %v1561_v4 = vld [vmem:[#allocation8 + $0xe00] sm:$0xff]  ;;  %v1562_v9 = vld [vmem:[#allocation8 + $0xe08] sm:$0xff] }
 0x210   :  { %4335 = vmatprep.subr.bf16.mxu0 %v6093_v17  ;;  %4499 = vmatprep.subr.bf16.mxu1 %v6095_v18  ;;  %v1521_v17 = vld [vmem:[#allocation8 + $0xcc0] sm:$0xff]  ;;  %v1566_v10 = vld [vmem:[#allocation8 + $0xe28] sm:$0xff] }
 0x211   :  { %v1525_v18 = vld [vmem:[#allocation8 + $0xce0] sm:$0xff] }
 0x212   :  { %v6141_v32 = vcombine.high %v1521_v17, %v1525_v18  ;;  %v6140_v40 = vcombine.low %v1521_v17, %v1525_v18  ;;  %v1565_v5 = vld [vmem:[#allocation8 + $0xe20] sm:$0xff] }
 0x213   :  { %4336 = vmatpush1.bf16.msra.mxu0 %v6092_v33  ;;  %4500 = vmatpush1.bf16.msra.mxu1 %v6094_v34  ;;  %v6143_v33 = vcombine.high %v1522_v20, %v1526_v21  ;;  %v1529_v34 = vld [vmem:[#allocation8 + $0xd00] sm:$0xff]  ;;  %v1570_v20 = vld [vmem:[#allocation8 + $0xe48] sm:$0xff] }
 0x214   :  { %4337 = vmatprep.subr.bf16.mxu0 %v6101_v36  ;;  %4501 = vmatprep.subr.bf16.mxu1 %v6103_v37  ;;  %v1533_v36 = vld [vmem:[#allocation8 + $0xd20] sm:$0xff]  ;;  %v1530_v37 = vld [vmem:[#allocation8 + $0xd08] sm:$0xff] }
 0x215   :  { %v6149_v45 = vcombine.high %v1529_v34, %v1533_v36  ;;  %v6151_v47 = vcombine.high %v1530_v37, %v1534_v38  ;;  %v6150_v51 = vcombine.low %v1530_v37, %v1534_v38  ;;  %v1569_v17 = vld [vmem:[#allocation8 + $0xe40] sm:$0xff]  ;;  %v1574_v21 = vld [vmem:[#allocation8 + $0xe68] sm:$0xff] }
 0x216   :  { %v1573_v18 = vld [vmem:[#allocation8 + $0xe60] sm:$0xff]  ;;  %v1578_v37 = vld [vmem:[#allocation8 + $0xe88] sm:$0xff] }
 0x217   :  { %4338 = vmatpush1.bf16.msra.mxu0 %v6100_v48  ;;  %4502 = vmatpush1.bf16.msra.mxu1 %v6102_v49  ;;  %v1541_v48 = vld [vmem:[#allocation8 + $0xd60] sm:$0xff]  ;;  %v1538_v49 = vld [vmem:[#allocation8 + $0xd48] sm:$0xff] }
 0x218   :  { %4339 = vmatprep.subr.bf16.mxu0 %v6109_v50  ;;  %4503 = vmatprep.subr.bf16.mxu1 %v6111_v24  ;;  %v1542_v50 = vld [vmem:[#allocation8 + $0xd68] sm:$0xff]  ;;  %v6148_v24 = vcombine.low %v1529_v34, %v1533_v36  ;;  %v6157_v52 = vcombine.high %v1537_v2, %v1541_v48  ;;  %v1577_v34 = vld [vmem:[#allocation8 + $0xe80] sm:$0xff] }
 0x219   :  { %v6159_v53 = vcombine.high %v1538_v49, %v1542_v50  ;;  %v1581_v36 = vld [vmem:[#allocation8 + $0xea0] sm:$0xff]  ;;  %v1582_v38 = vld [vmem:[#allocation8 + $0xea8] sm:$0xff] }
 0x21b   :  { %4340 = vmatpush1.bf16.msra.mxu0 %v6108_v25  ;;  %4504 = vmatpush1.bf16.msra.mxu1 %v6110_v58  ;;  %v1550_v25 = vld [vmem:[#allocation8 + $0xda8] sm:$0xff]  ;;  %v6156_v58 = vcombine.low %v1537_v2, %v1541_v48  ;;  %v1585_v2 = vld [vmem:[#allocation8 + $0xec0] sm:$0xff] }
 0x21c   :  { %4350 = vmatprep.subr.bf16.mxu0 %v6117_v63  ;;  %4514 = vmatprep.subr.bf16.mxu1 %v6119_v59  ;;  %v6158_v63 = vcombine.low %v1538_v49, %v1542_v50  ;;  %v6165_v59 = vcombine.high %v1545_v55, %v1549_v56  ;;  %v6167_v61 = vcombine.high %v1546_v57, %v1550_v25  ;;  %v1589_v48 = vld [vmem:[#allocation8 + $0xee0] sm:$0xff]  ;;  %v1586_v49 = vld [vmem:[#allocation8 + $0xec8] sm:$0xff] }
 0x21d   :  { %v1590_v50 = vld [vmem:[#allocation8 + $0xee8] sm:$0xff] }
 0x21e   :  { %4342 = vmatmul.mubr.bf16.vlgmr.msra.gmra.mrb[8].mxu0 %v6961_v8  ;;  %4506 = vmatmul.mubr.bf16.vlgmr.msra.gmra.mrb[8].mxu1 %v6961_v8 }
 0x21f   :  { %4351 = vmatpush1.bf16.msra.mxu0 %v6116_v60  ;;  %4515 = vmatpush1.bf16.msra.mxu1 %v6118_v39  ;;  %v6164_v60 = vcombine.low %v1545_v55, %v1549_v56  ;;  %v6166_v39 = vcombine.low %v1546_v57, %v1550_v25  ;;  %v1593_v55 = vld [vmem:[#allocation8 + $0xf00] sm:$0xff]  ;;  %v1594_v57 = vld [vmem:[#allocation8 + $0xf08] sm:$0xff] }
 0x220   :  { %4352 = vmatprep.subr.bf16.mxu0 %v6125_v0  ;;  %4516 = vmatprep.subr.bf16.mxu1 %v6127_v1  ;;  %v6173_v0 = vcombine.high %v1553_v62, %v1557_v3  ;;  %v6175_v1 = vcombine.high %v1554_v54, %v1558_v7  ;;  %v1597_v56 = vld [vmem:[#allocation8 + $0xf20] sm:$0xff]  ;;  %v1598_v25 = vld [vmem:[#allocation8 + $0xf28] sm:$0xff] }
 0x221   :  { %4382 = vmatprep.mubr.bf16.mxu0 %v6963_v11  ;;  %4546 = vmatprep.mubr.bf16.mxu1 %v6963_v11 }
 0x223   :  { %4353 = vmatpush1.bf16.msra.mxu0 %v6124_v12  ;;  %4517 = vmatpush1.bf16.msra.mxu1 %v6126_v19  ;;  %v6172_v12 = vcombine.low %v1553_v62, %v1557_v3  ;;  %v6174_v19 = vcombine.low %v1554_v54, %v1558_v7  ;;  %v1601_v62 = vld [vmem:[#allocation8 + $0xf40] sm:$0xff]  ;;  %v1602_v54 = vld [vmem:[#allocation8 + $0xf48] sm:$0xff] }
 0x224   :  { %4354 = vmatprep.subr.bf16.mxu0 %v6133_v15  ;;  %4518 = vmatprep.subr.bf16.mxu1 %v6135_v16  ;;  %v6181_v15 = vcombine.high %v1561_v4, %v1565_v5  ;;  %v6183_v16 = vcombine.high %v1562_v9, %v1566_v10  ;;  %v1605_v3 = vld [vmem:[#allocation8 + $0xf60] sm:$0xff]  ;;  %v1606_v7 = vld [vmem:[#allocation8 + $0xf68] sm:$0xff] }
 0x227   :  { %4355 = vmatpush1.bf16.msra.mxu0 %v6132_v27  ;;  %4519 = vmatpush1.bf16.msra.mxu1 %v6134_v29  ;;  %v6180_v27 = vcombine.low %v1561_v4, %v1565_v5  ;;  %v6182_v29 = vcombine.low %v1562_v9, %v1566_v10  ;;  %v6223_v4 = vcombine.high %v1602_v54, %v1606_v7  ;;  %v1609_v5 = vld [vmem:[#allocation8 + $0xf80] sm:$0xff]  ;;  %v1610_v10 = vld [vmem:[#allocation8 + $0xf88] sm:$0xff] }
 0x228   :  { %4356 = vmatprep.subr.bf16.mxu0 %v6141_v32  ;;  %4520 = vmatprep.subr.bf16.mxu1 %v6143_v33  ;;  %v6189_v32 = vcombine.high %v1569_v17, %v1573_v18  ;;  %v6191_v33 = vcombine.high %v1570_v20, %v1574_v21  ;;  %v1613_v9 = vld [vmem:[#allocation8 + $0xfa0] sm:$0xff] }
 0x22b   :  { %4357 = vmatpush1.bf16.msra.mxu0 %v6140_v40  ;;  %4521 = vmatpush1.bf16.msra.mxu1 %v6142_v44  ;;  %v6188_v40 = vcombine.low %v1569_v17, %v1573_v18  ;;  %v6190_v44 = vcombine.low %v1570_v20, %v1574_v21  ;;  %v6229_v18 = vcombine.high %v1609_v5, %v1613_v9  ;;  %v1617_v21 = vld [vmem:[#allocation8 + $0xfc0] sm:$0xff] }
 0x22c   :  { %4358 = vmatprep.subr.bf16.mxu0 %v6149_v45  ;;  %4522 = vmatprep.subr.bf16.mxu1 %v6151_v47  ;;  %v6197_v45 = vcombine.high %v1577_v34, %v1581_v36  ;;  %v6199_v47 = vcombine.high %v1578_v37, %v1582_v38 }
 0x22f   :  { %4359 = vmatpush1.bf16.msra.mxu0 %v6148_v24  ;;  %4523 = vmatpush1.bf16.msra.mxu1 %v6150_v51  ;;  %v6196_v24 = vcombine.low %v1577_v34, %v1581_v36  ;;  %v6198_v51 = vcombine.low %v1578_v37, %v1582_v38 }
 0x230   :  { %4360 = vmatprep.subr.bf16.mxu0 %v6157_v52  ;;  %4524 = vmatprep.subr.bf16.mxu1 %v6159_v53  ;;  %v6205_v52 = vcombine.high %v1585_v2, %v1589_v48  ;;  %v6207_v53 = vcombine.high %v1586_v49, %v1590_v50 }
 0x233   :  { %4361 = vmatpush1.bf16.msra.mxu0 %v6156_v58  ;;  %4525 = vmatpush1.bf16.msra.mxu1 %v6158_v63  ;;  %v6204_v58 = vcombine.low %v1585_v2, %v1589_v48  ;;  %v6206_v63 = vcombine.low %v1586_v49, %v1590_v50 }
 0x234   :  { %4362 = vmatprep.subr.bf16.mxu0 %v6165_v59  ;;  %4526 = vmatprep.subr.bf16.mxu1 %v6167_v61  ;;  %v6213_v59 = vcombine.high %v1593_v55, %v1597_v56  ;;  %v6215_v61 = vcombine.high %v1594_v57, %v1598_v25 }
 0x237   :  { %4363 = vmatpush1.bf16.msra.mxu0 %v6164_v60  ;;  %4527 = vmatpush1.bf16.msra.mxu1 %v6166_v39  ;;  %v6212_v60 = vcombine.low %v1593_v55, %v1597_v56  ;;  %v6214_v39 = vcombine.low %v1594_v57, %v1598_v25 }
 0x238   :  { %4364 = vmatprep.subr.bf16.mxu0 %v6173_v0  ;;  %4528 = vmatprep.subr.bf16.mxu1 %v6175_v1  ;;  %v272_v0 = vsub.s32 6, %v6892_v22  ;;  %v6221_v1 = vcombine.high %v1601_v62, %v1605_v3 }
 0x23b   :  { %4365 = vmatpush1.bf16.msra.mxu0 %v6172_v12  ;;  %4529 = vmatpush1.bf16.msra.mxu1 %v6174_v19  ;;  %v1614_v12 = vld [vmem:[#allocation8 + $0xfa8] sm:$0xff]  ;;  %v6220_v19 = vcombine.low %v1601_v62, %v1605_v3  ;;  %v1136_v62 = vld [vmem:[#allocation8 + $0xb8] sm:$0xff] }
 0x23c   :  { %4366 = vmatprep.subr.bf16.mxu0 %v6181_v15  ;;  %4530 = vmatprep.subr.bf16.mxu1 %v6183_v16  ;;  %v6222_v15 = vcombine.low %v1602_v54, %v1606_v7  ;;  %v6535_v16 = vld [vmem:[#allocation7] sm:$0xff]  ;;  %v6231_v20 = vcombine.high %v1610_v10, %v1614_v12  ;;  %v6230_v34 = vcombine.low %v1610_v10, %v1614_v12 }
 0x23d   :  { %v273_v17 = vrot.slane %v6535_v16, %v272_v0  ;;  %v1151_v16 = vld [vmem:[#allocation8 + $0x130] sm:$0xff] }
 0x23f   :  { %4367 = vmatpush1.bf16.msra.mxu0 %v6180_v27  ;;  %4531 = vmatpush1.bf16.msra.mxu1 %v6182_v29  ;;  %v1621_v27 = vld [vmem:[#allocation8 + $0xfe0] sm:$0xff]  ;;  %v1618_v29 = vld [vmem:[#allocation8 + $0xfc8] sm:$0xff]  ;;  %v1091_v36 = vadd.f32 %v6945_v35, %v273_v17  ;;  %v1124_v35 = vld [vmem:[#allocation8 + $0x58] sm:$0xff] }
 0x240   :  { %4368 = vmatprep.subr.bf16.mxu0 %v6189_v32  ;;  %4532 = vmatprep.subr.bf16.mxu1 %v6191_v33  ;;  %v1622_v32 = vld [vmem:[#allocation8 + $0xfe8] sm:$0xff]  ;;  %v6228_v33 = vcombine.low %v1609_v5, %v1613_v9  ;;  %v6237_v37 = vcombine.high %v1617_v21, %v1621_v27  ;;  %v6236_v2 = vcombine.low %v1617_v21, %v1621_v27  ;;  %v1144_v5 = vld [vmem:[#allocation8 + $0xf8] sm:$0xff] }
 0x241   :  { %v6239_v38 = vcombine.high %v1618_v29, %v1622_v32  ;;  %v6238_v48 = vcombine.low %v1618_v29, %v1622_v32  ;;  %v1103_v49 = vmax.f32 %v1091_v36, 0.0  ;;  %v1152_v17 = vld [vmem:[#allocation8 + $0x138] sm:$0xff]  ;;  %v1155_v29 = vld [vmem:[#allocation8 + $0x150] sm:$0xff] }
 0x242   :  { %v1159_v32 = vld [vmem:[#allocation8 + $0x170] sm:$0xff] }
 0x243   :  { %4369 = vmatpush1.bf16.msra.mxu0 %v6188_v40  ;;  %4533 = vmatpush1.bf16.msra.mxu1 %v6190_v44  ;;  %v1115_v40 = vld [vmem:[#allocation8 + $0x10] sm:$0xff]  ;;  %v6973_v56 = vpack.c.bf16 %v1103_v49, %v1103_v49 }
 0x244   :  { %4370 = vmatprep.subr.bf16.mxu0 %v6197_v45  ;;  %4534 = vmatprep.subr.bf16.mxu1 %v6199_v47  ;;  %v1119_v44 = vld [vmem:[#allocation8 + $0x30] sm:$0xff]  ;;  %v1116_v45 = vld [vmem:[#allocation8 + $0x18] sm:$0xff] }
 0x245   :  { %v1120_v47 = vld [vmem:[#allocation8 + $0x38] sm:$0xff]  ;;  %v5737_v50 = vcombine.high %v1115_v40, %v1119_v44  ;;  %v5736_v55 = vcombine.low %v1115_v40, %v1119_v44  ;;  %v1163_v44 = vld [vmem:[#allocation8 + $0x190] sm:$0xff] }
 0x246   :  { %v5738_v57 = vcombine.low %v1116_v45, %v1120_v47 }
 0x247   :  { %4371 = vmatpush1.bf16.msra.mxu0 %v6196_v24  ;;  %4535 = vmatpush1.bf16.msra.mxu1 %v6198_v51  ;;  %v5739_v24 = vcombine.high %v1116_v45, %v1120_v47  ;;  %v1123_v51 = vld [vmem:[#allocation8 + $0x50] sm:$0xff]  ;;  %v1164_v47 = vld [vmem:[#allocation8 + $0x198] sm:$0xff] }
 0x248   :  { %4372 = vmatprep.subr.bf16.mxu0 %v6205_v52  ;;  %4536 = vmatprep.subr.bf16.mxu1 %v6207_v53  ;;  %v1127_v52 = vld [vmem:[#allocation8 + $0x70] sm:$0xff]  ;;  %v1128_v53 = vld [vmem:[#allocation8 + $0x78] sm:$0xff] }
 0x249   :  { %v5745_v25 = vcombine.high %v1123_v51, %v1127_v52  ;;  %v5744_v3 = vcombine.low %v1123_v51, %v1127_v52  ;;  %v5746_v54 = vcombine.low %v1124_v35, %v1128_v53  ;;  %v1167_v45 = vld [vmem:[#allocation8 + $0x1b0] sm:$0xff] }
 0x24a   :  { %v1171_v51 = vld [vmem:[#allocation8 + $0x1d0] sm:$0xff] }
 0x24b   :  { %4373 = vmatpush1.bf16.msra.mxu0 %v6204_v58  ;;  %4537 = vmatpush1.bf16.msra.mxu1 %v6206_v63  ;;  %v5747_v58 = vcombine.high %v1124_v35, %v1128_v53  ;;  %v1131_v63 = vld [vmem:[#allocation8 + $0x90] sm:$0xff]  ;;  %v1172_v35 = vld [vmem:[#allocation8 + $0x1d8] sm:$0xff] }
 0x24c   :  { %4374 = vmatprep.subr.bf16.mxu0 %v6213_v59  ;;  %4538 = vmatprep.subr.bf16.mxu1 %v6215_v61  ;;  %v1135_v59 = vld [vmem:[#allocation8 + $0xb0] sm:$0xff]  ;;  %v1132_v61 = vld [vmem:[#allocation8 + $0x98] sm:$0xff] }
 0x24d   :  { %v5753_v7 = vcombine.high %v1131_v63, %v1135_v59  ;;  %v5752_v9 = vcombine.low %v1131_v63, %v1135_v59  ;;  %v5754_v10 = vcombine.low %v1132_v61, %v1136_v62  ;;  %v1175_v52 = vld [vmem:[#allocation8 + $0x1f0] sm:$0xff]  ;;  %v1176_v53 = vld [vmem:[#allocation8 + $0x1f8] sm:$0xff] }
 0x24e   :  { %v1179_v63 = vld [vmem:[#allocation8 + $0x210] sm:$0xff] }
 0x24f   :  { %4375 = vmatpush1.bf16.msra.mxu0 %v6212_v60  ;;  %4539 = vmatpush1.bf16.msra.mxu1 %v6214_v39  ;;  %v5755_v60 = vcombine.high %v1132_v61, %v1136_v62  ;;  %v1139_v39 = vld [vmem:[#allocation8 + $0xd0] sm:$0xff]  ;;  %v1180_v61 = vld [vmem:[#allocation8 + $0x218] sm:$0xff] }
 0x250   :  { %4376 = vmatprep.subr.bf16.mxu0 %v6221_v1  ;;  %4540 = vmatprep.subr.bf16.mxu1 %v6223_v4  ;;  %v1143_v1 = vld [vmem:[#allocation8 + $0xf0] sm:$0xff]  ;;  %v1140_v4 = vld [vmem:[#allocation8 + $0xd8] sm:$0xff] }
 0x251   :  { %v5761_v12 = vcombine.high %v1139_v39, %v1143_v1  ;;  %v1183_v59 = vld [vmem:[#allocation8 + $0x230] sm:$0xff]  ;;  %v1184_v62 = vld [vmem:[#allocation8 + $0x238] sm:$0xff] }
 0x253   :  { %4377 = vmatpush1.bf16.msra.mxu0 %v6220_v19  ;;  %4541 = vmatpush1.bf16.msra.mxu1 %v6222_v15  ;;  %v5763_v19 = vcombine.high %v1140_v4, %v1144_v5  ;;  %v1147_v15 = vld [vmem:[#allocation8 + $0x110] sm:$0xff] }
 0x254   :  { %4378 = vmatprep.subr.bf16.mxu0 %v6229_v18  ;;  %4542 = vmatprep.subr.bf16.mxu1 %v6231_v20  ;;  %v5760_v18 = vcombine.low %v1139_v39, %v1143_v1  ;;  %v5762_v20 = vcombine.low %v1140_v4, %v1144_v5  ;;  %v5769_v21 = vcombine.high %v1147_v15, %v1151_v16  ;;  %v1187_v39 = vld [vmem:[#allocation8 + $0x250] sm:$0xff]  ;;  %v1188_v4 = vld [vmem:[#allocation8 + $0x258] sm:$0xff] }
 0x255   :  { %v5768_v36 = vcombine.low %v1147_v15, %v1151_v16  ;;  %v1191_v1 = vld [vmem:[#allocation8 + $0x270] sm:$0xff]  ;;  %v1192_v5 = vld [vmem:[#allocation8 + $0x278] sm:$0xff] }
 0x256   :  { %v1195_v15 = vld [vmem:[#allocation8 + $0x290] sm:$0xff] }
 0x257   :  { %4379 = vmatpush1.bf16.msra.mxu0 %v6228_v33  ;;  %4543 = vmatpush1.bf16.msra.mxu1 %v6230_v34  ;;  %v1156_v33 = vld [vmem:[#allocation8 + $0x158] sm:$0xff]  ;;  %v1199_v16 = vld [vmem:[#allocation8 + $0x2b0] sm:$0xff] }
 0x258   :  { %4380 = vmatprep.subr.bf16.mxu0 %v6237_v37  ;;  %4544 = vmatprep.subr.bf16.mxu1 %v6239_v38  ;;  %v1160_v34 = vld [vmem:[#allocation8 + $0x178] sm:$0xff]  ;;  %v5777_v38 = vcombine.high %v1155_v29, %v1159_v32 }
 0x259   :  { %v5779_v40 = vcombine.high %v1156_v33, %v1160_v34  ;;  %v5778_v49 = vcombine.low %v1156_v33, %v1160_v34  ;;  %v1204_v33 = vld [vmem:[#allocation8 + $0x2d8] sm:$0xff] }
 0x25a   :  { %v1208_v34 = vld [vmem:[#allocation8 + $0x2f8] sm:$0xff] }
 0x25b   :  { %4381 = vmatpush1.bf16.msra.mxu0 %v6236_v2  ;;  %4545 = vmatpush1.bf16.msra.mxu1 %v6238_v48  ;;  %v1168_v2 = vld [vmem:[#allocation8 + $0x1b8] sm:$0xff]  ;;  %v5776_v48 = vcombine.low %v1155_v29, %v1159_v32  ;;  %v1203_v29 = vld [vmem:[#allocation8 + $0x2d0] sm:$0xff] }
 0x25c   :  { %4555 = vmatprep.subr.bf16.mxu0 %v5737_v50  ;;  %4719 = vmatprep.subr.bf16.mxu1 %v5739_v24  ;;  %v5785_v50 = vcombine.high %v1163_v44, %v1167_v45  ;;  %v5787_v24 = vcombine.high %v1164_v47, %v1168_v2  ;;  %v1207_v32 = vld [vmem:[#allocation8 + $0x2f0] sm:$0xff] }
 0x25e   :  { %4383 = vmatmul.mubr.bf16.vlgmr.msra.gmra.mrb[8].mxu0 %v6973_v56  ;;  %4547 = vmatmul.mubr.bf16.vlgmr.msra.gmra.mrb[8].mxu1 %v6973_v56 }
 0x25f   :  { %4556 = vmatpush1.bf16.msra.mxu0 %v5736_v55  ;;  %4587 = vmatprep.mubr.bf16.mxu0 %v6905_v42  ;;  %v5784_v55 = vcombine.low %v1163_v44, %v1167_v45  ;;  %v1211_v44 = vld [vmem:[#allocation8 + $0x310] sm:$0xff] }
 0x260   :  { %4720 = vmatpush1.bf16.msra.mxu1 %v5738_v57  ;;  %4751 = vmatprep.mubr.bf16.mxu1 %v6905_v42  ;;  %v1148_v42 = vld [vmem:[#allocation8 + $0x118] sm:$0xff]  ;;  %v5786_v57 = vcombine.low %v1164_v47, %v1168_v2  ;;  %v1215_v45 = vld [vmem:[#allocation8 + $0x330] sm:$0xff] }
 0x261   :  { %4557 = vmatprep.subr.bf16.mxu0 %v5745_v25  ;;  %4721 = vmatprep.subr.bf16.mxu1 %v5747_v58  ;;  %v5771_v27 = vcombine.high %v1148_v42, %v1152_v17  ;;  %v5770_v37 = vcombine.low %v1148_v42, %v1152_v17  ;;  %v5793_v25 = vcombine.high %v1171_v51, %v1175_v52  ;;  %v1196_v42 = vld [vmem:[#allocation8 + $0x298] sm:$0xff] }
 0x262   :  { %v5795_v58 = vcombine.high %v1172_v35, %v1176_v53  ;;  %v1200_v17 = vld [vmem:[#allocation8 + $0x2b8] sm:$0xff] }
 0x263   :  { %4558 = vmatpush1.bf16.msra.mxu0 %v5744_v3  ;;  %v5792_v3 = vcombine.low %v1171_v51, %v1175_v52  ;;  %v1212_v47 = vld [vmem:[#allocation8 + $0x318] sm:$0xff]  ;;  %v1219_v51 = vld [vmem:[#allocation8 + $0x350] sm:$0xff] }
 0x264   :  { %4722 = vmatpush1.bf16.msra.mxu1 %v5746_v54  ;;  %4559 = vmatprep.subr.bf16.mxu0 %v5753_v7  ;;  %v5794_v54 = vcombine.low %v1172_v35, %v1176_v53  ;;  %v5801_v7 = vcombine.high %v1179_v63, %v1183_v59  ;;  %v1216_v2 = vld [vmem:[#allocation8 + $0x338] sm:$0xff]  ;;  %v1223_v52 = vld [vmem:[#allocation8 + $0x370] sm:$0xff] }
 0x265   :  { %4723 = vmatprep.subr.bf16.mxu1 %v5755_v60  ;;  %v5803_v60 = vcombine.high %v1180_v61, %v1184_v62  ;;  %v1220_v35 = vld [vmem:[#allocation8 + $0x358] sm:$0xff] }
 0x266   :  { %v1224_v53 = vld [vmem:[#allocation8 + $0x378] sm:$0xff] }
 0x267   :  { %4560 = vmatpush1.bf16.msra.mxu0 %v5752_v9  ;;  %v5800_v9 = vcombine.low %v1179_v63, %v1183_v59  ;;  %v1227_v63 = vld [vmem:[#allocation8 + $0x390] sm:$0xff] }
 0x268   :  { %4724 = vmatpush1.bf16.msra.mxu1 %v5754_v10  ;;  %4561 = vmatprep.subr.bf16.mxu0 %v5761_v12  ;;  %v5802_v10 = vcombine.low %v1180_v61, %v1184_v62  ;;  %v5809_v12 = vcombine.high %v1187_v39, %v1191_v1  ;;  %v1231_v59 = vld [vmem:[#allocation8 + $0x3b0] sm:$0xff]  ;;  %v1228_v61 = vld [vmem:[#allocation8 + $0x398] sm:$0xff] }
 0x269   :  { %4725 = vmatprep.subr.bf16.mxu1 %v5763_v19  ;;  %v5811_v19 = vcombine.high %v1188_v4, %v1192_v5  ;;  %v1232_v62 = vld [vmem:[#allocation8 + $0x3b8] sm:$0xff] }
 0x26b   :  { %4562 = vmatpush1.bf16.msra.mxu0 %v5760_v18  ;;  %v5808_v18 = vcombine.low %v1187_v39, %v1191_v1  ;;  %v1235_v39 = vld [vmem:[#allocation8 + $0x3d0] sm:$0xff] }
 0x26c   :  { %4726 = vmatpush1.bf16.msra.mxu1 %v5762_v20  ;;  %4563 = vmatprep.subr.bf16.mxu0 %v5769_v21  ;;  %v5810_v20 = vcombine.low %v1188_v4, %v1192_v5  ;;  %v5817_v21 = vcombine.high %v1195_v15, %v1199_v16  ;;  %v1239_v1 = vld [vmem:[#allocation8 + $0x3f0] sm:$0xff]  ;;  %v1236_v4 = vld [vmem:[#allocation8 + $0x3d8] sm:$0xff] }
 0x26d   :  { %4727 = vmatprep.subr.bf16.mxu1 %v5771_v27  ;;  %v5819_v27 = vcombine.high %v1196_v42, %v1200_v17  ;;  %v1240_v5 = vld [vmem:[#allocation8 + $0x3f8] sm:$0xff] }
 0x26f   :  { %4564 = vmatpush1.bf16.msra.mxu0 %v5768_v36  ;;  %v5816_v36 = vcombine.low %v1195_v15, %v1199_v16  ;;  %v1243_v15 = vld [vmem:[#allocation8 + $0x410] sm:$0xff] }
 0x270   :  { %4728 = vmatpush1.bf16.msra.mxu1 %v5770_v37  ;;  %4565 = vmatprep.subr.bf16.mxu0 %v5777_v38  ;;  %v5818_v37 = vcombine.low %v1196_v42, %v1200_v17  ;;  %v5825_v38 = vcombine.high %v1203_v29, %v1207_v32  ;;  %v1247_v16 = vld [vmem:[#allocation8 + $0x430] sm:$0xff]  ;;  %v1244_v42 = vld [vmem:[#allocation8 + $0x418] sm:$0xff] }
 0x271   :  { %4729 = vmatprep.subr.bf16.mxu1 %v5779_v40  ;;  %v5827_v40 = vcombine.high %v1204_v33, %v1208_v34  ;;  %v1248_v17 = vld [vmem:[#allocation8 + $0x438] sm:$0xff] }
 0x273   :  { %4566 = vmatpush1.bf16.msra.mxu0 %v5776_v48  ;;  %v5824_v48 = vcombine.low %v1203_v29, %v1207_v32  ;;  %v1251_v29 = vld [vmem:[#allocation8 + $0x450] sm:$0xff] }
 0x274   :  { %4730 = vmatpush1.bf16.msra.mxu1 %v5778_v49  ;;  %4567 = vmatprep.subr.bf16.mxu0 %v5785_v50  ;;  %v5826_v49 = vcombine.low %v1204_v33, %v1208_v34  ;;  %v5833_v50 = vcombine.high %v1211_v44, %v1215_v45  ;;  %v1255_v32 = vld [vmem:[#allocation8 + $0x470] sm:$0xff]  ;;  %v5864_v33 = vcombine.low %v1243_v15, %v1247_v16  ;;  %v1252_v34 = vld [vmem:[#allocation8 + $0x458] sm:$0xff] }
 0x275   :  { %4731 = vmatprep.subr.bf16.mxu1 %v5787_v24  ;;  %v5835_v24 = vcombine.high %v1212_v47, %v1216_v2 }
 0x277   :  { %4568 = vmatpush1.bf16.msra.mxu0 %v5784_v55  ;;  %v5832_v55 = vcombine.low %v1211_v44, %v1215_v45  ;;  %v1263_v44 = vld [vmem:[#allocation8 + $0x4b0] sm:$0xff] }
 0x278   :  { %4732 = vmatpush1.bf16.msra.mxu1 %v5786_v57  ;;  %4569 = vmatprep.subr.bf16.mxu0 %v5793_v25  ;;  %v5834_v57 = vcombine.low %v1212_v47, %v1216_v2  ;;  %v5841_v25 = vcombine.high %v1219_v51, %v1223_v52  ;;  %v1260_v47 = vld [vmem:[#allocation8 + $0x498] sm:$0xff] }
 0x279   :  { %4733 = vmatprep.subr.bf16.mxu1 %v5795_v58  ;;  %v5843_v58 = vcombine.high %v1220_v35, %v1224_v53  ;;  %v1264_v2 = vld [vmem:[#allocation8 + $0x4b8] sm:$0xff] }
 0x27b   :  { %4570 = vmatpush1.bf16.msra.mxu0 %v5792_v3  ;;  %v5840_v3 = vcombine.low %v1219_v51, %v1223_v52  ;;  %v1267_v51 = vld [vmem:[#allocation8 + $0x4d0] sm:$0xff] }
 0x27c   :  { %4734 = vmatpush1.bf16.msra.mxu1 %v5794_v54  ;;  %4571 = vmatprep.subr.bf16.mxu0 %v5801_v7  ;;  %v5842_v54 = vcombine.low %v1220_v35, %v1224_v53  ;;  %v5849_v7 = vcombine.high %v1227_v63, %v1231_v59  ;;  %v1271_v52 = vld [vmem:[#allocation8 + $0x4f0] sm:$0xff]  ;;  %v1268_v35 = vld [vmem:[#allocation8 + $0x4d8] sm:$0xff] }
 0x27d   :  { %4735 = vmatprep.subr.bf16.mxu1 %v5803_v60  ;;  %v5851_v60 = vcombine.high %v1228_v61, %v1232_v62  ;;  %v1272_v53 = vld [vmem:[#allocation8 + $0x4f8] sm:$0xff] }
 0x27f   :  { %4572 = vmatpush1.bf16.msra.mxu0 %v5800_v9  ;;  %v5848_v9 = vcombine.low %v1227_v63, %v1231_v59  ;;  %v1279_v63 = vld [vmem:[#allocation8 + $0x530] sm:$0xff]  ;;  %v1276_v59 = vld [vmem:[#allocation8 + $0x518] sm:$0xff] }
 0x280   :  { %4736 = vmatpush1.bf16.msra.mxu1 %v5802_v10  ;;  %4573 = vmatprep.subr.bf16.mxu0 %v5809_v12  ;;  %v5850_v10 = vcombine.low %v1228_v61, %v1232_v62  ;;  %v5857_v12 = vcombine.high %v1235_v39, %v1239_v1  ;;  %v1280_v61 = vld [vmem:[#allocation8 + $0x538] sm:$0xff]  ;;  %v5890_v62 = vcombine.low %v1268_v35, %v1272_v53 }
 0x281   :  { %4737 = vmatprep.subr.bf16.mxu1 %v5811_v19  ;;  %v5859_v19 = vcombine.high %v1236_v4, %v1240_v5 }
 0x283   :  { %4574 = vmatpush1.bf16.msra.mxu0 %v5808_v18  ;;  %v5856_v18 = vcombine.low %v1235_v39, %v1239_v1  ;;  %v1284_v39 = vld [vmem:[#allocation8 + $0x558] sm:$0xff] }
 0x284   :  { %4738 = vmatpush1.bf16.msra.mxu1 %v5810_v20  ;;  %4575 = vmatprep.subr.bf16.mxu0 %v5817_v21  ;;  %v5858_v20 = vcombine.low %v1236_v4, %v1240_v5  ;;  %v5865_v21 = vcombine.high %v1243_v15, %v1247_v16  ;;  %v1288_v1 = vld [vmem:[#allocation8 + $0x578] sm:$0xff]  ;;  %v5898_v5 = vcombine.low %v1276_v59, %v1280_v61 }
 0x285   :  { %4739 = vmatprep.subr.bf16.mxu1 %v5819_v27  ;;  %v5867_v27 = vcombine.high %v1244_v42, %v1248_v17  ;;  %v1292_v15 = vld [vmem:[#allocation8 + $0x598] sm:$0xff] }
 0x286   :  { %v1296_v16 = vld [vmem:[#allocation8 + $0x5b8] sm:$0xff] }
 0x287   :  { %4576 = vmatpush1.bf16.msra.mxu0 %v5816_v36  ;;  %v1256_v36 = vld [vmem:[#allocation8 + $0x478] sm:$0xff] }
 0x288   :  { %4740 = vmatpush1.bf16.msra.mxu1 %v5818_v37  ;;  %4577 = vmatprep.subr.bf16.mxu0 %v5825_v38  ;;  %v5866_v37 = vcombine.low %v1244_v42, %v1248_v17  ;;  %v5873_v38 = vcombine.high %v1251_v29, %v1255_v32  ;;  %v5875_v45 = vcombine.high %v1252_v34, %v1256_v36 }
 0x289   :  { %4741 = vmatprep.subr.bf16.mxu1 %v5827_v40  ;;  %v1259_v40 = vld [vmem:[#allocation8 + $0x490] sm:$0xff]  ;;  %v5906_v17 = vcombine.low %v1284_v39, %v1288_v1 }
 0x28b   :  { %4578 = vmatpush1.bf16.msra.mxu0 %v5824_v48  ;;  %v5872_v48 = vcombine.low %v1251_v29, %v1255_v32  ;;  %v1300_v29 = vld [vmem:[#allocation8 + $0x5d8] sm:$0xff] }
 0x28c   :  { %4742 = vmatpush1.bf16.msra.mxu1 %v5826_v49  ;;  %4579 = vmatprep.subr.bf16.mxu0 %v5833_v50  ;;  %v5874_v49 = vcombine.low %v1252_v34, %v1256_v36  ;;  %v5881_v50 = vcombine.high %v1259_v40, %v1263_v44  ;;  %v1304_v32 = vld [vmem:[#allocation8 + $0x5f8] sm:$0xff]  ;;  %v5914_v34 = vcombine.low %v1292_v15, %v1296_v16 }
 0x28d   :  { %4743 = vmatprep.subr.bf16.mxu1 %v5835_v24  ;;  %v5883_v24 = vcombine.high %v1260_v47, %v1264_v2 }
 0x28f   :  { %4580 = vmatpush1.bf16.msra.mxu0 %v5832_v55  ;;  %v5880_v55 = vcombine.low %v1259_v40, %v1263_v44  ;;  %v1311_v40 = vld [vmem:[#allocation8 + $0x630] sm:$0xff]  ;;  %v1308_v44 = vld [vmem:[#allocation8 + $0x618] sm:$0xff] }
 0x290   :  { %4744 = vmatpush1.bf16.msra.mxu1 %v5834_v57  ;;  %4581 = vmatprep.subr.bf16.mxu0 %v5841_v25  ;;  %v5889_v57 = vcombine.high %v1267_v51, %v1271_v52  ;;  %v5891_v25 = vcombine.high %v1268_v35, %v1272_v53 }
 0x291   :  { %4745 = vmatprep.subr.bf16.mxu1 %v5843_v58  ;;  %v1275_v58 = vld [vmem:[#allocation8 + $0x510] sm:$0xff] }
 0x292   :  { %v5896_v4 = vcombine.low %v1275_v58, %v1279_v63 }
 0x293   :  { %4582 = vmatpush1.bf16.msra.mxu0 %v5840_v3  ;;  %v5897_v3 = vcombine.high %v1275_v58, %v1279_v63  ;;  %v1324_v58 = vld [vmem:[#allocation8 + $0x698] sm:$0xff] }
 0x294   :  { %4746 = vmatpush1.bf16.msra.mxu1 %v5842_v54  ;;  %4583 = vmatprep.subr.bf16.mxu0 %v5849_v7  ;;  %v5899_v54 = vcombine.high %v1276_v59, %v1280_v61  ;;  %v1283_v7 = vld [vmem:[#allocation8 + $0x550] sm:$0xff]  ;;  %v1328_v63 = vld [vmem:[#allocation8 + $0x6b8] sm:$0xff] }
 0x295   :  { %4747 = vmatprep.subr.bf16.mxu1 %v5851_v60  ;;  %v1287_v60 = vld [vmem:[#allocation8 + $0x570] sm:$0xff] }
 0x296   :  { %v5904_v42 = vcombine.low %v1283_v7, %v1287_v60 }
 0x297   :  { %4584 = vmatpush1.bf16.msra.mxu0 %v5848_v9  ;;  %v5905_v9 = vcombine.high %v1283_v7, %v1287_v60  ;;  %v1332_v7 = vld [vmem:[#allocation8 + $0x6d8] sm:$0xff] }
 0x298   :  { %4748 = vmatpush1.bf16.msra.mxu1 %v5850_v10  ;;  %4585 = vmatprep.subr.bf16.mxu0 %v5857_v12  ;;  %v5907_v10 = vcombine.high %v1284_v39, %v1288_v1  ;;  %v1291_v12 = vld [vmem:[#allocation8 + $0x590] sm:$0xff]  ;;  %v1336_v60 = vld [vmem:[#allocation8 + $0x6f8] sm:$0xff]  ;;  %v5946_v1 = vcombine.low %v1324_v58, %v1328_v63 }
 0x299   :  { %4749 = vmatprep.subr.bf16.mxu1 %v5859_v19  ;;  %v1295_v19 = vld [vmem:[#allocation8 + $0x5b0] sm:$0xff] }
 0x29b   :  { %4586 = vmatpush1.bf16.msra.mxu0 %v5856_v18  ;;  %v5913_v18 = vcombine.high %v1291_v12, %v1295_v19 }
 0x29c   :  { %4750 = vmatpush1.bf16.msra.mxu1 %v5858_v20  ;;  %4596 = vmatprep.subr.bf16.mxu0 %v5865_v21  ;;  %v5915_v20 = vcombine.high %v1292_v15, %v1296_v16  ;;  %v1299_v21 = vld [vmem:[#allocation8 + $0x5d0] sm:$0xff]  ;;  %v5954_v16 = vcombine.low %v1332_v7, %v1336_v60 }
 0x29d   :  { %4760 = vmatprep.subr.bf16.mxu1 %v5867_v27  ;;  %v1303_v27 = vld [vmem:[#allocation8 + $0x5f0] sm:$0xff] }
 0x29e   :  { %4588 = vmatmul.mubr.bf16.vlgmr.msra.gmra.mrb[12].mxu0 %v6907_v43  ;;  %v5921_v36 = vcombine.high %v1299_v21, %v1303_v27 }
 0x29f   :  { %4752 = vmatmul.mubr.bf16.vlgmr.msra.gmra.mrb[12].mxu1 %v6907_v43  ;;  %4597 = vmatpush1.bf16.msra.mxu0 %v5864_v33  ;;  %v5882_v43 = vcombine.low %v1260_v47, %v1264_v2  ;;  %v5912_v33 = vcombine.low %v1291_v12, %v1295_v19  ;;  %v5920_v47 = vcombine.low %v1299_v21, %v1303_v27  ;;  %v1340_v12 = vld [vmem:[#allocation8 + $0x718] sm:$0xff] }
 0x2a0   :  { %4628 = vmatprep.mubr.bf16.mxu0 %v6924_v6  ;;  %4761 = vmatpush1.bf16.msra.mxu1 %v5866_v37  ;;  %v5923_v37 = vcombine.high %v1300_v29, %v1304_v32  ;;  %v5922_v2 = vcombine.low %v1300_v29, %v1304_v32  ;;  %v1344_v19 = vld [vmem:[#allocation8 + $0x738] sm:$0xff] }
 0x2a1   :  { %4792 = vmatprep.mubr.bf16.mxu1 %v6924_v6  ;;  %4598 = vmatprep.subr.bf16.mxu0 %v5873_v38  ;;  %v5888_v6 = vcombine.low %v1267_v51, %v1271_v52  ;;  %v1307_v38 = vld [vmem:[#allocation8 + $0x610] sm:$0xff]  ;;  %v1316_v51 = vld [vmem:[#allocation8 + $0x658] sm:$0xff]  ;;  %v5962_v32 = vcombine.low %v1340_v12, %v1344_v19 }
 0x2a2   :  { %4762 = vmatprep.subr.bf16.mxu1 %v5875_v45  ;;  %v1312_v45 = vld [vmem:[#allocation8 + $0x638] sm:$0xff]  ;;  %v5928_v35 = vcombine.low %v1307_v38, %v1311_v40 }
 0x2a3   :  { %4599 = vmatpush1.bf16.msra.mxu0 %v5872_v48  ;;  %v5929_v48 = vcombine.high %v1307_v38, %v1311_v40  ;;  %v1320_v52 = vld [vmem:[#allocation8 + $0x678] sm:$0xff]  ;;  %v5930_v53 = vcombine.low %v1308_v44, %v1312_v45 }
 0x2a4   :  { %4763 = vmatpush1.bf16.msra.mxu1 %v5874_v49  ;;  %4600 = vmatprep.subr.bf16.mxu0 %v5881_v50  ;;  %v5931_v49 = vcombine.high %v1308_v44, %v1312_v45  ;;  %v1315_v50 = vld [vmem:[#allocation8 + $0x650] sm:$0xff]  ;;  %v5938_v61 = vcombine.low %v1316_v51, %v1320_v52  ;;  %v1348_v21 = vld [vmem:[#allocation8 + $0x758] sm:$0xff] }
 0x2a5   :  { %4764 = vmatprep.subr.bf16.mxu1 %v5883_v24  ;;  %v1319_v24 = vld [vmem:[#allocation8 + $0x670] sm:$0xff]  ;;  %v1352_v27 = vld [vmem:[#allocation8 + $0x778] sm:$0xff] }
 0x2a6   :  { %v5936_v59 = vcombine.low %v1315_v50, %v1319_v24  ;;  %v1356_v38 = vld [vmem:[#allocation8 + $0x798] sm:$0xff]  ;;  %v5970_v45 = vcombine.low %v1348_v21, %v1352_v27 }
 0x2a7   :  { %4601 = vmatpush1.bf16.msra.mxu0 %v5880_v55  ;;  %v5937_v55 = vcombine.high %v1315_v50, %v1319_v24  ;;  %v1360_v40 = vld [vmem:[#allocation8 + $0x7b8] sm:$0xff] }
 0x2a8   :  { %4765 = vmatpush1.bf16.msra.mxu1 %v5882_v43  ;;  %4602 = vmatprep.subr.bf16.mxu0 %v5889_v57  ;;  %v5939_v43 = vcombine.high %v1316_v51, %v1320_v52  ;;  %v1323_v57 = vld [vmem:[#allocation8 + $0x690] sm:$0xff]  ;;  %v1364_v50 = vld [vmem:[#allocation8 + $0x7d8] sm:$0xff]  ;;  %v5978_v52 = vcombine.low %v1356_v38, %v1360_v40 }
 0x2a9   :  { %4766 = vmatprep.subr.bf16.mxu1 %v5891_v25  ;;  %v1327_v25 = vld [vmem:[#allocation8 + $0x6b0] sm:$0xff]  ;;  %v1368_v24 = vld [vmem:[#allocation8 + $0x7f8] sm:$0xff] }
 0x2aa   :  { %v5944_v39 = vcombine.low %v1323_v57, %v1327_v25 }
 0x2ab   :  { %4603 = vmatpush1.bf16.msra.mxu0 %v5888_v6  ;;  %v5945_v6 = vcombine.high %v1323_v57, %v1327_v25  ;;  %v1372_v57 = vld [vmem:[#allocation8 + $0x818] sm:$0xff] }
 0x2ac   :  { %4767 = vmatpush1.bf16.msra.mxu1 %v5890_v62  ;;  %4604 = vmatprep.subr.bf16.mxu0 %v5897_v3  ;;  %v5947_v62 = vcombine.high %v1324_v58, %v1328_v63  ;;  %v1331_v3 = vld [vmem:[#allocation8 + $0x6d0] sm:$0xff]  ;;  %v1376_v25 = vld [vmem:[#allocation8 + $0x838] sm:$0xff]  ;;  %v5986_v63 = vcombine.low %v1364_v50, %v1368_v24 }
 0x2ad   :  { %4768 = vmatprep.subr.bf16.mxu1 %v5899_v54  ;;  %v1335_v54 = vld [vmem:[#allocation8 + $0x6f0] sm:$0xff] }
 0x2ae   :  { %v5952_v15 = vcombine.low %v1331_v3, %v1335_v54 }
 0x2af   :  { %4605 = vmatpush1.bf16.msra.mxu0 %v5896_v4  ;;  %v5953_v4 = vcombine.high %v1331_v3, %v1335_v54  ;;  %v1380_v54 = vld [vmem:[#allocation8 + $0x858] sm:$0xff] }
 0x2b0   :  { %4769 = vmatpush1.bf16.msra.mxu1 %v5898_v5  ;;  %4606 = vmatprep.subr.bf16.mxu0 %v5905_v9  ;;  %v5955_v5 = vcombine.high %v1332_v7, %v1336_v60  ;;  %v1339_v9 = vld [vmem:[#allocation8 + $0x710] sm:$0xff]  ;;  %v1384_v7 = vld [vmem:[#allocation8 + $0x878] sm:$0xff]  ;;  %v5994_v60 = vcombine.low %v1372_v57, %v1376_v25 }
 0x2b1   :  { %4770 = vmatprep.subr.bf16.mxu1 %v5907_v10  ;;  %v1343_v10 = vld [vmem:[#allocation8 + $0x730] sm:$0xff] }
 0x2b2   :  { %v5960_v29 = vcombine.low %v1339_v9, %v1343_v10 }
 0x2b3   :  { %4607 = vmatpush1.bf16.msra.mxu0 %v5904_v42  ;;  %v5961_v42 = vcombine.high %v1339_v9, %v1343_v10  ;;  %v1388_v9 = vld [vmem:[#allocation8 + $0x898] sm:$0xff] }
 0x2b4   :  { %4771 = vmatpush1.bf16.msra.mxu1 %v5906_v17  ;;  %4608 = vmatprep.subr.bf16.mxu0 %v5913_v18  ;;  %v5963_v17 = vcombine.high %v1340_v12, %v1344_v19  ;;  %v1347_v18 = vld [vmem:[#allocation8 + $0x750] sm:$0xff]  ;;  %v1392_v10 = vld [vmem:[#allocation8 + $0x8b8] sm:$0xff]  ;;  %v6002_v19 = vcombine.low %v1380_v54, %v1384_v7 }
 0x2b5   :  { %4772 = vmatprep.subr.bf16.mxu1 %v5915_v20  ;;  %v1351_v20 = vld [vmem:[#allocation8 + $0x770] sm:$0xff] }
 0x2b6   :  { %v5968_v44 = vcombine.low %v1347_v18, %v1351_v20 }
 0x2b7   :  { %4609 = vmatpush1.bf16.msra.mxu0 %v5912_v33  ;;  %v5969_v33 = vcombine.high %v1347_v18, %v1351_v20  ;;  %v1396_v18 = vld [vmem:[#allocation8 + $0x8d8] sm:$0xff] }
 0x2b8   :  { %4773 = vmatpush1.bf16.msra.mxu1 %v5914_v34  ;;  %4610 = vmatprep.subr.bf16.mxu0 %v5921_v36  ;;  %v5971_v34 = vcombine.high %v1348_v21, %v1352_v27  ;;  %v1355_v36 = vld [vmem:[#allocation8 + $0x790] sm:$0xff]  ;;  %v1400_v20 = vld [vmem:[#allocation8 + $0x8f8] sm:$0xff] }
 0x2b9   :  { %4774 = vmatprep.subr.bf16.mxu1 %v5923_v37  ;;  %v1359_v37 = vld [vmem:[#allocation8 + $0x7b0] sm:$0xff] }
 0x2ba   :  { %v5976_v51 = vcombine.low %v1355_v36, %v1359_v37 }
 0x2bb   :  { %4611 = vmatpush1.bf16.msra.mxu0 %v5920_v47  ;;  %v5977_v47 = vcombine.high %v1355_v36, %v1359_v37  ;;  %v1408_v36 = vld [vmem:[#allocation8 + $0x938] sm:$0xff]  ;;  %v6018_v37 = vcombine.low %v1396_v18, %v1400_v20 }
 0x2bc   :  { %4775 = vmatpush1.bf16.msra.mxu1 %v5922_v2  ;;  %4612 = vmatprep.subr.bf16.mxu0 %v5929_v48  ;;  %v5979_v2 = vcombine.high %v1356_v38, %v1360_v40  ;;  %v1363_v48 = vld [vmem:[#allocation8 + $0x7d0] sm:$0xff] }
 0x2bd   :  { %4776 = vmatprep.subr.bf16.mxu1 %v5931_v49  ;;  %v1367_v49 = vld [vmem:[#allocation8 + $0x7f0] sm:$0xff] }
 0x2be   :  { %v5984_v58 = vcombine.low %v1363_v48, %v1367_v49 }
 0x2bf   :  { %4613 = vmatpush1.bf16.msra.mxu0 %v5928_v35  ;;  %v5985_v35 = vcombine.high %v1363_v48, %v1367_v49 }
 0x2c0   :  { %4777 = vmatpush1.bf16.msra.mxu1 %v5930_v53  ;;  %4614 = vmatprep.subr.bf16.mxu0 %v5937_v55  ;;  %v5987_v53 = vcombine.high %v1364_v50, %v1368_v24  ;;  %v1371_v55 = vld [vmem:[#allocation8 + $0x810] sm:$0xff] }
 0x2c1   :  { %4778 = vmatprep.subr.bf16.mxu1 %v5939_v43  ;;  %v1375_v43 = vld [vmem:[#allocation8 + $0x830] sm:$0xff] }
 0x2c2   :  { %v5992_v3 = vcombine.low %v1371_v55, %v1375_v43 }
 0x2c3   :  { %4615 = vmatpush1.bf16.msra.mxu0 %v5936_v59  ;;  %v5993_v59 = vcombine.high %v1371_v55, %v1375_v43 }
 0x2c4   :  { %4779 = vmatpush1.bf16.msra.mxu1 %v5938_v61  ;;  %4616 = vmatprep.subr.bf16.mxu0 %v5945_v6  ;;  %v5995_v61 = vcombine.high %v1372_v57, %v1376_v25  ;;  %v1379_v6 = vld [vmem:[#allocation8 + $0x850] sm:$0xff] }
 0x2c5   :  { %4780 = vmatprep.subr.bf16.mxu1 %v5947_v62  ;;  %v1383_v62 = vld [vmem:[#allocation8 + $0x870] sm:$0xff] }
 0x2c6   :  { %v6000_v12 = vcombine.low %v1379_v6, %v1383_v62 }
 0x2c7   :  { %4617 = vmatpush1.bf16.msra.mxu0 %v5944_v39  ;;  %v6001_v39 = vcombine.high %v1379_v6, %v1383_v62 }
 0x2c8   :  { %4781 = vmatpush1.bf16.msra.mxu1 %v5946_v1  ;;  %4618 = vmatprep.subr.bf16.mxu0 %v5953_v4  ;;  %v1387_v1 = vld [vmem:[#allocation8 + $0x890] sm:$0xff] }
 0x2c9   :  { %4782 = vmatprep.subr.bf16.mxu1 %v5955_v5  ;;  %v1391_v4 = vld [vmem:[#allocation8 + $0x8b0] sm:$0xff]  ;;  %v6003_v5 = vcombine.high %v1380_v54, %v1384_v7 }
 0x2ca   :  { %v6008_v21 = vcombine.low %v1387_v1, %v1391_v4  ;;  %v1435_v7 = vld [vmem:[#allocation8 + $0xa10] sm:$0xff] }
 0x2cb   :  { %4619 = vmatpush1.bf16.msra.mxu0 %v5952_v15  ;;  %v6009_v15 = vcombine.high %v1387_v1, %v1391_v4  ;;  %v1440_v1 = vld [vmem:[#allocation8 + $0xa38] sm:$0xff] }
 0x2cc   :  { %4783 = vmatpush1.bf16.msra.mxu1 %v5954_v16  ;;  %4620 = vmatprep.subr.bf16.mxu0 %v5961_v42  ;;  %v6011_v16 = vcombine.high %v1388_v9, %v1392_v10  ;;  %v1395_v42 = vld [vmem:[#allocation8 + $0x8d0] sm:$0xff] }
 0x2cd   :  { %4784 = vmatprep.subr.bf16.mxu1 %v5963_v17  ;;  %v1399_v17 = vld [vmem:[#allocation8 + $0x8f0] sm:$0xff] }
 0x2ce   :  { %v6017_v27 = vcombine.high %v1395_v42, %v1399_v17 }
 0x2cf   :  { %4621 = vmatpush1.bf16.msra.mxu0 %v5960_v29  ;;  %v6019_v29 = vcombine.high %v1396_v18, %v1400_v20 }
 0x2d0   :  { %4785 = vmatpush1.bf16.msra.mxu1 %v5962_v32  ;;  %4622 = vmatprep.subr.bf16.mxu0 %v5969_v33  ;;  %v1403_v32 = vld [vmem:[#allocation8 + $0x910] sm:$0xff] }
 0x2d1   :  { %4786 = vmatprep.subr.bf16.mxu1 %v5971_v34  ;;  %v1407_v33 = vld [vmem:[#allocation8 + $0x930] sm:$0xff]  ;;  %v1404_v34 = vld [vmem:[#allocation8 + $0x918] sm:$0xff] }
 0x2d2   :  { %v6025_v38 = vcombine.high %v1403_v32, %v1407_v33  ;;  %v6027_v40 = vcombine.high %v1404_v34, %v1408_v36  ;;  %v6024_v48 = vcombine.low %v1403_v32, %v1407_v33  ;;  %v6026_v49 = vcombine.low %v1404_v34, %v1408_v36 }
 0x2d3   :  { %4623 = vmatpush1.bf16.msra.mxu0 %v5968_v44  ;;  %v1411_v44 = vld [vmem:[#allocation8 + $0x950] sm:$0xff] }
 0x2d4   :  { %4787 = vmatpush1.bf16.msra.mxu1 %v5970_v45  ;;  %4624 = vmatprep.subr.bf16.mxu0 %v5977_v47  ;;  %v1415_v45 = vld [vmem:[#allocation8 + $0x970] sm:$0xff]  ;;  %v1412_v47 = vld [vmem:[#allocation8 + $0x958] sm:$0xff] }
 0x2d5   :  { %4788 = vmatprep.subr.bf16.mxu1 %v5979_v2  ;;  %v1416_v2 = vld [vmem:[#allocation8 + $0x978] sm:$0xff]  ;;  %v6033_v50 = vcombine.high %v1411_v44, %v1415_v45  ;;  %v6032_v55 = vcombine.low %v1411_v44, %v1415_v45 }
 0x2d6   :  { %v6035_v24 = vcombine.high %v1412_v47, %v1416_v2  ;;  %v6034_v43 = vcombine.low %v1412_v47, %v1416_v2 }
 0x2d7   :  { %4625 = vmatpush1.bf16.msra.mxu0 %v5976_v51  ;;  %v1419_v51 = vld [vmem:[#allocation8 + $0x990] sm:$0xff] }
 0x2d8   :  { %4789 = vmatpush1.bf16.msra.mxu1 %v5978_v52  ;;  %4626 = vmatprep.subr.bf16.mxu0 %v5985_v35  ;;  %v1423_v52 = vld [vmem:[#allocation8 + $0x9b0] sm:$0xff]  ;;  %v1420_v35 = vld [vmem:[#allocation8 + $0x998] sm:$0xff] }
 0x2d9   :  { %4790 = vmatprep.subr.bf16.mxu1 %v5987_v53  ;;  %v1424_v53 = vld [vmem:[#allocation8 + $0x9b8] sm:$0xff]  ;;  %v6041_v57 = vcombine.high %v1419_v51, %v1423_v52  ;;  %v6040_v6 = vcombine.low %v1419_v51, %v1423_v52 }
 0x2da   :  { %v6043_v25 = vcombine.high %v1420_v35, %v1424_v53  ;;  %v6042_v62 = vcombine.low %v1420_v35, %v1424_v53 }
 0x2db   :  { %4627 = vmatpush1.bf16.msra.mxu0 %v5984_v58  ;;  %v1427_v58 = vld [vmem:[#allocation8 + $0x9d0] sm:$0xff] }
 0x2dc   :  { %4791 = vmatpush1.bf16.msra.mxu1 %v5986_v63  ;;  %4637 = vmatprep.subr.bf16.mxu0 %v5993_v59  ;;  %v1431_v63 = vld [vmem:[#allocation8 + $0x9f0] sm:$0xff]  ;;  %v1428_v59 = vld [vmem:[#allocation8 + $0x9d8] sm:$0xff] }
 0x2dd   :  { %4801 = vmatprep.subr.bf16.mxu1 %v5995_v61  ;;  %v1432_v61 = vld [vmem:[#allocation8 + $0x9f8] sm:$0xff]  ;;  %v6048_v4 = vcombine.low %v1427_v58, %v1431_v63 }
 0x2de   :  { %4629 = vmatmul.mubr.bf16.vlgmr.msra.gmra.mrb[12].mxu0 %v6939_v13  ;;  %v6051_v54 = vcombine.high %v1428_v59, %v1432_v61 }
 0x2df   :  { %4793 = vmatmul.mubr.bf16.vlgmr.msra.gmra.mrb[12].mxu1 %v6939_v13  ;;  %4638 = vmatpush1.bf16.msra.mxu0 %v5992_v3  ;;  %v6010_v13 = vcombine.low %v1388_v9, %v1392_v10  ;;  %v6049_v3 = vcombine.high %v1427_v58, %v1431_v63 }
 0x2e0   :  { %4669 = vmatprep.mubr.bf16.mxu0 %v6941_v28  ;;  %4802 = vmatpush1.bf16.msra.mxu1 %v5994_v60  ;;  %v1439_v60 = vld [vmem:[#allocation8 + $0xa30] sm:$0xff] }
 0x2e1   :  { %4833 = vmatprep.mubr.bf16.mxu1 %v6941_v28  ;;  %4639 = vmatprep.subr.bf16.mxu0 %v6001_v39  ;;  %v6016_v28 = vcombine.low %v1395_v42, %v1399_v17  ;;  %v1436_v39 = vld [vmem:[#allocation8 + $0xa18] sm:$0xff]  ;;  %v6057_v9 = vcombine.high %v1435_v7, %v1439_v60  ;;  %v6056_v42 = vcombine.low %v1435_v7, %v1439_v60 }
 0x2e2   :  { %4803 = vmatprep.subr.bf16.mxu1 %v6003_v5  ;;  %v6050_v5 = vcombine.low %v1428_v59, %v1432_v61  ;;  %v6059_v10 = vcombine.high %v1436_v39, %v1440_v1  ;;  %v6058_v17 = vcombine.low %v1436_v39, %v1440_v1 }
 0x2e3   :  { %4640 = vmatpush1.bf16.msra.mxu0 %v6000_v12  ;;  %v1443_v12 = vld [vmem:[#allocation8 + $0xa50] sm:$0xff] }
 0x2e4   :  { %4804 = vmatpush1.bf16.msra.mxu1 %v6002_v19  ;;  %4641 = vmatprep.subr.bf16.mxu0 %v6009_v15  ;;  %v1447_v19 = vld [vmem:[#allocation8 + $0xa70] sm:$0xff]  ;;  %v1444_v15 = vld [vmem:[#allocation8 + $0xa58] sm:$0xff] }
 0x2e5   :  { %4805 = vmatprep.subr.bf16.mxu1 %v6011_v16  ;;  %v1448_v16 = vld [vmem:[#allocation8 + $0xa78] sm:$0xff]  ;;  %v6065_v18 = vcombine.high %v1443_v12, %v1447_v19  ;;  %v6064_v32 = vcombine.low %v1443_v12, %v1447_v19 }
 0x2e6   :  { %v6067_v20 = vcombine.high %v1444_v15, %v1448_v16  ;;  %v6066_v33 = vcombine.low %v1444_v15, %v1448_v16 }
 0x2e7   :  { %4642 = vmatpush1.bf16.msra.mxu0 %v6008_v21  ;;  %v1451_v21 = vld [vmem:[#allocation8 + $0xa90] sm:$0xff] }
 0x2e8   :  { %4806 = vmatpush1.bf16.msra.mxu1 %v6010_v13  ;;  %4643 = vmatprep.subr.bf16.mxu0 %v6017_v27  ;;  %v1455_v13 = vld [vmem:[#allocation8 + $0xab0] sm:$0xff]  ;;  %v1452_v27 = vld [vmem:[#allocation8 + $0xa98] sm:$0xff] }
 0x2e9   :  { %4807 = vmatprep.subr.bf16.mxu1 %v6019_v29  ;;  %v1456_v29 = vld [vmem:[#allocation8 + $0xab8] sm:$0xff]  ;;  %v6073_v34 = vcombine.high %v1451_v21, %v1455_v13  ;;  %v6072_v44 = vcombine.low %v1451_v21, %v1455_v13 }
 0x2ea   :  { %v6075_v36 = vcombine.high %v1452_v27, %v1456_v29  ;;  %v6074_v45 = vcombine.low %v1452_v27, %v1456_v29 }
 0x2eb   :  { %4644 = vmatpush1.bf16.msra.mxu0 %v6016_v28  ;;  %v1459_v28 = vld [vmem:[#allocation8 + $0xad0] sm:$0xff] }
 0x2ec   :  { %4808 = vmatpush1.bf16.msra.mxu1 %v6018_v37  ;;  %4645 = vmatprep.subr.bf16.mxu0 %v6025_v38  ;;  %v1463_v37 = vld [vmem:[#allocation8 + $0xaf0] sm:$0xff]  ;;  %v1460_v38 = vld [vmem:[#allocation8 + $0xad8] sm:$0xff] }
 0x2ed   :  { %4809 = vmatprep.subr.bf16.mxu1 %v6027_v40  ;;  %v1464_v40 = vld [vmem:[#allocation8 + $0xaf8] sm:$0xff]  ;;  %v6081_v47 = vcombine.high %v1459_v28, %v1463_v37  ;;  %v6080_v51 = vcombine.low %v1459_v28, %v1463_v37 }
 0x2ee   :  { %v6083_v2 = vcombine.high %v1460_v38, %v1464_v40  ;;  %v6082_v52 = vcombine.low %v1460_v38, %v1464_v40  ;;  %v1512_v28 = vld [vmem:[#allocation8 + $0xc78] sm:$0xff]  ;;  %v1515_v40 = vld [vmem:[#allocation8 + $0xc90] sm:$0xff] }
 0x2ef   :  { %4646 = vmatpush1.bf16.msra.mxu0 %v6024_v48  ;;  %v1467_v48 = vld [vmem:[#allocation8 + $0xb10] sm:$0xff] }
 0x2f0   :  { %4810 = vmatpush1.bf16.msra.mxu1 %v6026_v49  ;;  %4647 = vmatprep.subr.bf16.mxu0 %v6033_v50  ;;  %v1471_v49 = vld [vmem:[#allocation8 + $0xb30] sm:$0xff]  ;;  %v1468_v50 = vld [vmem:[#allocation8 + $0xb18] sm:$0xff] }
 0x2f1   :  { %4811 = vmatprep.subr.bf16.mxu1 %v6035_v24  ;;  %v1472_v24 = vld [vmem:[#allocation8 + $0xb38] sm:$0xff]  ;;  %v6089_v35 = vcombine.high %v1467_v48, %v1471_v49  ;;  %v6088_v58 = vcombine.low %v1467_v48, %v1471_v49 }
 0x2f2   :  { %v6091_v53 = vcombine.high %v1468_v50, %v1472_v24  ;;  %v6090_v63 = vcombine.low %v1468_v50, %v1472_v24 }
 0x2f3   :  { %4648 = vmatpush1.bf16.msra.mxu0 %v6032_v55  ;;  %v1475_v55 = vld [vmem:[#allocation8 + $0xb50] sm:$0xff] }
 0x2f4   :  { %4812 = vmatpush1.bf16.msra.mxu1 %v6034_v43  ;;  %4649 = vmatprep.subr.bf16.mxu0 %v6041_v57  ;;  %v1479_v43 = vld [vmem:[#allocation8 + $0xb70] sm:$0xff]  ;;  %v1476_v57 = vld [vmem:[#allocation8 + $0xb58] sm:$0xff] }
 0x2f5   :  { %4813 = vmatprep.subr.bf16.mxu1 %v6043_v25  ;;  %v1480_v25 = vld [vmem:[#allocation8 + $0xb78] sm:$0xff]  ;;  %v6097_v59 = vcombine.high %v1475_v55, %v1479_v43  ;;  %v6096_v7 = vcombine.low %v1475_v55, %v1479_v43 }
 0x2f6   :  { %v6099_v61 = vcombine.high %v1476_v57, %v1480_v25  ;;  %v6098_v60 = vcombine.low %v1476_v57, %v1480_v25  ;;  %v1531_v25 = vld [vmem:[#allocation8 + $0xd10] sm:$0xff] }
 0x2f7   :  { %4650 = vmatpush1.bf16.msra.mxu0 %v6040_v6  ;;  %v1483_v6 = vld [vmem:[#allocation8 + $0xb90] sm:$0xff] }
 0x2f8   :  { %4814 = vmatpush1.bf16.msra.mxu1 %v6042_v62  ;;  %4651 = vmatprep.subr.bf16.mxu0 %v6049_v3  ;;  %v1487_v62 = vld [vmem:[#allocation8 + $0xbb0] sm:$0xff]  ;;  %v1484_v3 = vld [vmem:[#allocation8 + $0xb98] sm:$0xff] }
 0x2f9   :  { %4815 = vmatprep.subr.bf16.mxu1 %v6051_v54  ;;  %v1488_v54 = vld [vmem:[#allocation8 + $0xbb8] sm:$0xff]  ;;  %v6105_v39 = vcombine.high %v1483_v6, %v1487_v62  ;;  %v6104_v12 = vcombine.low %v1483_v6, %v1487_v62 }
 0x2fa   :  { %v6107_v1 = vcombine.high %v1484_v3, %v1488_v54  ;;  %v6106_v19 = vcombine.low %v1484_v3, %v1488_v54  ;;  %v1539_v3 = vld [vmem:[#allocation8 + $0xd50] sm:$0xff] }
 0x2fb   :  { %4652 = vmatpush1.bf16.msra.mxu0 %v6048_v4  ;;  %v1491_v4 = vld [vmem:[#allocation8 + $0xbd0] sm:$0xff] }
 0x2fc   :  { %4816 = vmatpush1.bf16.msra.mxu1 %v6050_v5  ;;  %4653 = vmatprep.subr.bf16.mxu0 %v6057_v9  ;;  %v1495_v5 = vld [vmem:[#allocation8 + $0xbf0] sm:$0xff]  ;;  %v1492_v9 = vld [vmem:[#allocation8 + $0xbd8] sm:$0xff] }
 0x2fd   :  { %4817 = vmatprep.subr.bf16.mxu1 %v6059_v10  ;;  %v1496_v10 = vld [vmem:[#allocation8 + $0xbf8] sm:$0xff]  ;;  %v6113_v15 = vcombine.high %v1491_v4, %v1495_v5  ;;  %v6112_v21 = vcombine.low %v1491_v4, %v1495_v5  ;;  %v1543_v54 = vld [vmem:[#allocation8 + $0xd70] sm:$0xff] }
 0x2fe   :  { %v6115_v16 = vcombine.high %v1492_v9, %v1496_v10  ;;  %v6114_v13 = vcombine.low %v1492_v9, %v1496_v10  ;;  %v6161_v4 = vcombine.high %v1539_v3, %v1543_v54  ;;  %v1547_v9 = vld [vmem:[#allocation8 + $0xd90] sm:$0xff] }
 0x2ff   :  { %4654 = vmatpush1.bf16.msra.mxu0 %v6056_v42  ;;  %v1499_v42 = vld [vmem:[#allocation8 + $0xc10] sm:$0xff] }
 0x300   :  { %4818 = vmatpush1.bf16.msra.mxu1 %v6058_v17  ;;  %4655 = vmatprep.subr.bf16.mxu0 %v6065_v18  ;;  %v1503_v17 = vld [vmem:[#allocation8 + $0xc30] sm:$0xff]  ;;  %v1500_v18 = vld [vmem:[#allocation8 + $0xc18] sm:$0xff] }
 0x301   :  { %4819 = vmatprep.subr.bf16.mxu1 %v6067_v20  ;;  %v1504_v20 = vld [vmem:[#allocation8 + $0xc38] sm:$0xff]  ;;  %v6121_v27 = vcombine.high %v1499_v42, %v1503_v17  ;;  %v1551_v10 = vld [vmem:[#allocation8 + $0xdb0] sm:$0xff] }
 0x302   :  { %v6123_v29 = vcombine.high %v1500_v18, %v1504_v20  ;;  %v6122_v37 = vcombine.low %v1500_v18, %v1504_v20 }
 0x303   :  { %4656 = vmatpush1.bf16.msra.mxu0 %v6064_v32  ;;  %v1507_v32 = vld [vmem:[#allocation8 + $0xc50] sm:$0xff] }
 0x304   :  { %4820 = vmatpush1.bf16.msra.mxu1 %v6066_v33  ;;  %4657 = vmatprep.subr.bf16.mxu0 %v6073_v34  ;;  %v1511_v33 = vld [vmem:[#allocation8 + $0xc70] sm:$0xff]  ;;  %v6120_v34 = vcombine.low %v1499_v42, %v1503_v17  ;;  %v6169_v42 = vcombine.high %v1547_v9, %v1551_v10 }
 0x305   :  { %4821 = vmatprep.subr.bf16.mxu1 %v6075_v36  ;;  %v1508_v36 = vld [vmem:[#allocation8 + $0xc58] sm:$0xff]  ;;  %v6129_v38 = vcombine.high %v1507_v32, %v1511_v33  ;;  %v6128_v48 = vcombine.low %v1507_v32, %v1511_v33 }
 0x306   :  { %v6130_v49 = vcombine.low %v1508_v36, %v1512_v28  ;;  %v1556_v32 = vld [vmem:[#allocation8 + $0xdd8] sm:$0xff] }
 0x307   :  { %4658 = vmatpush1.bf16.msra.mxu0 %v6072_v44  ;;  %v1519_v44 = vld [vmem:[#allocation8 + $0xcb0] sm:$0xff]  ;;  %v1560_v33 = vld [vmem:[#allocation8 + $0xdf8] sm:$0xff] }
 0x308   :  { %4822 = vmatpush1.bf16.msra.mxu1 %v6074_v45  ;;  %4659 = vmatprep.subr.bf16.mxu0 %v6081_v47  ;;  %v6131_v45 = vcombine.high %v1508_v36, %v1512_v28  ;;  %v1516_v47 = vld [vmem:[#allocation8 + $0xc98] sm:$0xff]  ;;  %v6137_v50 = vcombine.high %v1515_v40, %v1519_v44  ;;  %v6136_v55 = vcombine.low %v1515_v40, %v1519_v44 }
 0x309   :  { %4823 = vmatprep.subr.bf16.mxu1 %v6083_v2  ;;  %v1520_v2 = vld [vmem:[#allocation8 + $0xcb8] sm:$0xff]  ;;  %v6168_v28 = vcombine.low %v1547_v9, %v1551_v10 }
 0x30a   :  { %v6139_v24 = vcombine.high %v1516_v47, %v1520_v2 }
 0x30b   :  { %4660 = vmatpush1.bf16.msra.mxu0 %v6080_v51  ;;  %v1523_v51 = vld [vmem:[#allocation8 + $0xcd0] sm:$0xff] }
 0x30c   :  { %4824 = vmatpush1.bf16.msra.mxu1 %v6082_v52  ;;  %4661 = vmatprep.subr.bf16.mxu0 %v6089_v35  ;;  %v1527_v52 = vld [vmem:[#allocation8 + $0xcf0] sm:$0xff]  ;;  %v1524_v35 = vld [vmem:[#allocation8 + $0xcd8] sm:$0xff] }
 0x30d   :  { %4825 = vmatprep.subr.bf16.mxu1 %v6091_v53  ;;  %v1528_v53 = vld [vmem:[#allocation8 + $0xcf8] sm:$0xff]  ;;  %v6145_v43 = vcombine.high %v1523_v51, %v1527_v52 }
 0x30e   :  { %v6147_v57 = vcombine.high %v1524_v35, %v1528_v53 }
 0x30f   :  { %4662 = vmatpush1.bf16.msra.mxu0 %v6088_v58  ;;  %v1535_v58 = vld [vmem:[#allocation8 + $0xd30] sm:$0xff] }
 0x310   :  { %4826 = vmatpush1.bf16.msra.mxu1 %v6090_v63  ;;  %4663 = vmatprep.subr.bf16.mxu0 %v6097_v59  ;;  %v1532_v63 = vld [vmem:[#allocation8 + $0xd18] sm:$0xff]  ;;  %v6153_v6 = vcombine.high %v1531_v25, %v1535_v58 }
 0x311   :  { %4827 = vmatprep.subr.bf16.mxu1 %v6099_v61  ;;  %v1536_v59 = vld [vmem:[#allocation8 + $0xd38] sm:$0xff]  ;;  %v6146_v61 = vcombine.low %v1524_v35, %v1528_v53  ;;  %v1571_v35 = vld [vmem:[#allocation8 + $0xe50] sm:$0xff] }
 0x312   :  { %v6155_v62 = vcombine.high %v1532_v63, %v1536_v59  ;;  %v1575_v53 = vld [vmem:[#allocation8 + $0xe70] sm:$0xff] }
 0x313   :  { %4664 = vmatpush1.bf16.msra.mxu0 %v6096_v7  ;;  %v1540_v7 = vld [vmem:[#allocation8 + $0xd58] sm:$0xff] }
 0x314   :  { %4828 = vmatpush1.bf16.msra.mxu1 %v6098_v60  ;;  %4665 = vmatprep.subr.bf16.mxu0 %v6105_v39  ;;  %v1544_v60 = vld [vmem:[#allocation8 + $0xd78] sm:$0xff]  ;;  %v6152_v39 = vcombine.low %v1531_v25, %v1535_v58  ;;  %v6193_v25 = vcombine.high %v1571_v35, %v1575_v53 }
 0x315   :  { %4829 = vmatprep.subr.bf16.mxu1 %v6107_v1  ;;  %v6154_v1 = vcombine.low %v1532_v63, %v1536_v59  ;;  %v6163_v5 = vcombine.high %v1540_v7, %v1544_v60  ;;  %v1579_v63 = vld [vmem:[#allocation8 + $0xe90] sm:$0xff] }
 0x316   :  { %v1583_v59 = vld [vmem:[#allocation8 + $0xeb0] sm:$0xff] }
 0x317   :  { %4666 = vmatpush1.bf16.msra.mxu0 %v6104_v12  ;;  %v1548_v12 = vld [vmem:[#allocation8 + $0xd98] sm:$0xff] }
 0x318   :  { %4830 = vmatpush1.bf16.msra.mxu1 %v6106_v19  ;;  %4667 = vmatprep.subr.bf16.mxu0 %v6113_v15  ;;  %v1552_v19 = vld [vmem:[#allocation8 + $0xdb8] sm:$0xff]  ;;  %v6160_v15 = vcombine.low %v1539_v3, %v1543_v54  ;;  %v6201_v3 = vcombine.high %v1579_v63, %v1583_v59 }
 0x319   :  { %4831 = vmatprep.subr.bf16.mxu1 %v6115_v16  ;;  %v6162_v16 = vcombine.low %v1540_v7, %v1544_v60  ;;  %v6171_v20 = vcombine.high %v1548_v12, %v1552_v19  ;;  %v6170_v40 = vcombine.low %v1548_v12, %v1552_v19  ;;  %v1587_v7 = vld [vmem:[#allocation8 + $0xed0] sm:$0xff] }
 0x31a   :  { %v1591_v60 = vld [vmem:[#allocation8 + $0xef0] sm:$0xff] }
 0x31b   :  { %4668 = vmatpush1.bf16.msra.mxu0 %v6112_v21  ;;  %v1555_v21 = vld [vmem:[#allocation8 + $0xdd0] sm:$0xff]  ;;  %v6209_v9 = vcombine.high %v1587_v7, %v1591_v60 }
 0x31c   :  { %4832 = vmatpush1.bf16.msra.mxu1 %v6114_v13  ;;  %4678 = vmatprep.subr.bf16.mxu0 %v6121_v27  ;;  %v1559_v13 = vld [vmem:[#allocation8 + $0xdf0] sm:$0xff] }
 0x31d   :  { %4842 = vmatprep.subr.bf16.mxu1 %v6123_v29  ;;  %v6177_v44 = vcombine.high %v1555_v21, %v1559_v13  ;;  %v1595_v12 = vld [vmem:[#allocation8 + $0xf10] sm:$0xff] }
 0x31e   :  { %4670 = vmatmul.mubr.bf16.vlgmr.msra.gmra.mrb[12].mxu0 %v6961_v8  ;;  %v1599_v19 = vld [vmem:[#allocation8 + $0xf30] sm:$0xff] }
 0x31f   :  { %4834 = vmatmul.mubr.bf16.vlgmr.msra.gmra.mrb[12].mxu1 %v6961_v8  ;;  %4679 = vmatpush1.bf16.msra.mxu0 %v6120_v34  ;;  %v6138_v8 = vcombine.low %v1516_v47, %v1520_v2  ;;  %v1563_v47 = vld [vmem:[#allocation8 + $0xe10] sm:$0xff] }
 0x320   :  { %4710 = vmatprep.mubr.bf16.mxu0 %v6963_v11  ;;  %4843 = vmatpush1.bf16.msra.mxu1 %v6122_v37  ;;  %v1567_v2 = vld [vmem:[#allocation8 + $0xe30] sm:$0xff] }
 0x321   :  { %4874 = vmatprep.mubr.bf16.mxu1 %v6963_v11  ;;  %4680 = vmatprep.subr.bf16.mxu0 %v6129_v38  ;;  %v6144_v11 = vcombine.low %v1523_v51, %v1527_v52  ;;  %v6185_v51 = vcombine.high %v1563_v47, %v1567_v2 }
 0x322   :  { %4844 = vmatprep.subr.bf16.mxu1 %v6131_v45  ;;  %v6179_v45 = vcombine.high %v1556_v32, %v1560_v33 }
 0x323   :  { %4681 = vmatpush1.bf16.msra.mxu0 %v6128_v48  ;;  %v1564_v48 = vld [vmem:[#allocation8 + $0xe18] sm:$0xff] }
 0x324   :  { %4845 = vmatpush1.bf16.msra.mxu1 %v6130_v49  ;;  %4682 = vmatprep.subr.bf16.mxu0 %v6137_v50  ;;  %v1568_v49 = vld [vmem:[#allocation8 + $0xe38] sm:$0xff]  ;;  %v6176_v50 = vcombine.low %v1555_v21, %v1559_v13  ;;  %v6217_v21 = vcombine.high %v1595_v12, %v1599_v19 }
 0x325   :  { %4846 = vmatprep.subr.bf16.mxu1 %v6139_v24  ;;  %v6178_v24 = vcombine.low %v1556_v32, %v1560_v33  ;;  %v6187_v52 = vcombine.high %v1564_v48, %v1568_v49  ;;  %v1603_v32 = vld [vmem:[#allocation8 + $0xf50] sm:$0xff] }
 0x326   :  { %v1607_v33 = vld [vmem:[#allocation8 + $0xf70] sm:$0xff] }
 0x327   :  { %4683 = vmatpush1.bf16.msra.mxu0 %v6136_v55  ;;  %v1572_v55 = vld [vmem:[#allocation8 + $0xe58] sm:$0xff] }
 0x328   :  { %4847 = vmatpush1.bf16.msra.mxu1 %v6138_v8  ;;  %4684 = vmatprep.subr.bf16.mxu0 %v6145_v43  ;;  %v1576_v8 = vld [vmem:[#allocation8 + $0xe78] sm:$0xff]  ;;  %v6184_v43 = vcombine.low %v1563_v47, %v1567_v2 }
 0x329   :  { %4848 = vmatprep.subr.bf16.mxu1 %v6147_v57  ;;  %v6186_v57 = vcombine.low %v1564_v48, %v1568_v49  ;;  %v6195_v58 = vcombine.high %v1572_v55, %v1576_v8  ;;  %v1612_v47 = vld [vmem:[#allocation8 + $0xf98] sm:$0xff]  ;;  %v6999_v48 = vld [vmem:[#allocation10] sm:$0xff]  ;;  %v6224_v49 = vcombine.low %v1603_v32, %v1607_v33 }
 0x32a   :  { %v1616_v2 = vld [vmem:[#allocation8 + $0xfb8] sm:$0xff] }
 0x32b   :  { %4685 = vmatpush1.bf16.msra.mxu0 %v6144_v11  ;;  %v1580_v11 = vld [vmem:[#allocation8 + $0xe98] sm:$0xff] }
 0x32c   :  { %4849 = vmatpush1.bf16.msra.mxu1 %v6146_v61  ;;  %4686 = vmatprep.subr.bf16.mxu0 %v6153_v6  ;;  %v1584_v61 = vld [vmem:[#allocation8 + $0xeb8] sm:$0xff]  ;;  %v6192_v6 = vcombine.low %v1571_v35, %v1575_v53  ;;  %v1623_v35 = vld [vmem:[#allocation8 + $0xff0] sm:$0xff]  ;;  %v1634_v53 = vrot.slane %v6999_v48, %v252_v26 }
 0x32d   :  { %4850 = vmatprep.subr.bf16.mxu1 %v6155_v62  ;;  %v6194_v62 = vcombine.low %v1572_v55, %v1576_v8  ;;  %v6203_v54 = vcombine.high %v1580_v11, %v1584_v61  ;;  %v1620_v55 = vld [vmem:[#allocation8 + $0xfd8] sm:$0xff] }
 0x32e   :  { %v1624_v8 = vld [vmem:[#allocation8 + $0xff8] sm:$0xff] }
 0x32f   :  { %4687 = vmatpush1.bf16.msra.mxu0 %v6152_v39  ;;  %v1588_v39 = vld [vmem:[#allocation8 + $0xed8] sm:$0xff] }
 0x330   :  { %4851 = vmatpush1.bf16.msra.mxu1 %v6154_v1  ;;  %4688 = vmatprep.subr.bf16.mxu0 %v6161_v4  ;;  %v1592_v1 = vld [vmem:[#allocation8 + $0xef8] sm:$0xff]  ;;  %v6200_v4 = vcombine.low %v1579_v63, %v1583_v59  ;;  %v6243_v63 = vcombine.high %v1620_v55, %v1624_v8 }
 0x331   :  { %v6991_v17 = vpop.f32.mrb[8].mxu0  ;;  %v6993_v18 = vpop.f32.mrb[8].mxu1  ;;  %4852 = vmatprep.subr.bf16.mxu1 %v6163_v5  ;;  %v6202_v5 = vcombine.low %v1580_v11, %v1584_v61  ;;  %v6211_v10 = vcombine.high %v1588_v39, %v1592_v1  ;;  %v6242_v61 = vcombine.low %v1620_v55, %v1624_v8  ;;  %v6502_v55 = vld [vmem:[#allocation11 + $0x180] sm:$0xff]   ;;  %v6503_v8 = vld [vmem:[#allocation11 + $0x148] sm:$0xff]  }
 0x332   :  { %v6995_v27 = vpop.f32.mrb[9].mxu0  ;;  %v6997_v29 = vpop.f32.mrb[9].mxu1 }
 0x333   :  { %v4388_v34 = vpop.f32.mrb[10].mxu0  ;;  %v4552_v36 = vpop.f32.mrb[10].mxu1  ;;  %4689 = vmatpush1.bf16.msra.mxu0 %v6160_v15  ;;  %v1596_v15 = vld [vmem:[#allocation8 + $0xf18] sm:$0xff]  ;;  %v6398_v59 = vadd.f32 %v6995_v27, %v1634_v53 }
 0x334   :  { %4853 = vmatpush1.bf16.msra.mxu1 %v6162_v16  ;;  %v4389_v37 = vpop.f32.mrb[11].mxu0  ;;  %v4553_v38 = vpop.f32.mrb[11].mxu1  ;;  %4690 = vmatprep.subr.bf16.mxu0 %v6169_v42  ;;  %v1600_v16 = vld [vmem:[#allocation8 + $0xf38] sm:$0xff]  ;;  %v6208_v42 = vcombine.low %v1587_v7, %v1591_v60  ;;  %v6470_v7 = vld [vmem:[#allocation11 + $0x80] sm:$0xff]   ;;  %v6471_v60 = vld [vmem:[#allocation11 + $0x48] sm:$0xff]  }
 0x335   :  { %4854 = vmatprep.subr.bf16.mxu1 %v6171_v20  ;;  %v6210_v20 = vcombine.low %v1588_v39, %v1592_v1  ;;  %v6219_v13 = vcombine.high %v1596_v15, %v1600_v16  ;;  %v1604_v34 = vld [vmem:[#allocation8 + $0xf58] sm:$0xff]  ;;  %v6218_v37 = vcombine.low %v1596_v15, %v1600_v16  ;;  %v6225_v38 = vcombine.high %v1603_v32, %v1607_v33  ;;  %v6473_v1 = vld [vmem:[#allocation11 + $0x8] sm:$0xff]   ;;  %v6480_v15 = vld [vmem:[#allocation11 + $0xd8] sm:$0xff]  }
 0x336   :  { %v1608_v36 = vld [vmem:[#allocation8 + $0xf78] sm:$0xff]  ;;  %v6482_v16 = vld [vmem:[#allocation11 + $0x98] sm:$0xff]   ;;  %v6487_v32 = vld [vmem:[#allocation11 + $0x68] sm:$0xff]  }
 0x337   :  { %4691 = vmatpush1.bf16.msra.mxu0 %v6168_v28  ;;  %v6216_v28 = vcombine.low %v1595_v12, %v1599_v19  ;;  %v6478_v12 = vld [vmem:[#allocation11 + $0x90] sm:$0xff]   ;;  %v6479_v19 = vld [vmem:[#allocation11 + $0x58] sm:$0xff]   ;;  %v6488_v33 = vld [vmem:[#allocation11 + $0xe8] sm:$0xff]  }
 0x338   :  { %4855 = vmatpush1.bf16.msra.mxu1 %v6170_v40  ;;  %4692 = vmatprep.subr.bf16.mxu0 %v6177_v44  ;;  %v6227_v40 = vcombine.high %v1604_v34, %v1608_v36  ;;  %v1611_v44 = vld [vmem:[#allocation8 + $0xf90] sm:$0xff] }
 0x339   :  { %4856 = vmatprep.subr.bf16.mxu1 %v6179_v45  ;;  %v1615_v45 = vld [vmem:[#allocation8 + $0xfb0] sm:$0xff] }
 0x33b   :  { %4693 = vmatpush1.bf16.msra.mxu0 %v6176_v50  ;;  %v6226_v50 = vcombine.low %v1604_v34, %v1608_v36  ;;  %v6489_v34 = vld [vmem:[#allocation11 + $0x28] sm:$0xff]   ;;  %v1630_v36 = vrot.slane %v6999_v48, %v248_v23 }
 0x33c   :  { %4857 = vmatpush1.bf16.msra.mxu1 %v6178_v24  ;;  %4694 = vmatprep.subr.bf16.mxu0 %v6185_v51  ;;  %v6233_v24 = vcombine.high %v1611_v44, %v1615_v45  ;;  %v6235_v51 = vcombine.high %v1612_v47, %v1616_v2 }
 0x33d   :  { %4858 = vmatprep.subr.bf16.mxu1 %v6187_v52  ;;  %v1619_v52 = vld [vmem:[#allocation8 + $0xfd0] sm:$0xff] }
 0x33e   :  { %v6240_v26 = vcombine.low %v1619_v52, %v1623_v35 }
 0x33f   :  { %4695 = vmatpush1.bf16.msra.mxu0 %v6184_v43  ;;  %v1642_v43 = vrot.slane %v6999_v48, %v260_v41  ;;  %v6468_v41 = vld [vmem:[#allocation11 + $0xc0] sm:$0xff]  }
 0x340   :  { %4859 = vmatpush1.bf16.msra.mxu1 %v6186_v57  ;;  %4696 = vmatprep.subr.bf16.mxu0 %v6193_v25  ;;  %v6232_v57 = vcombine.low %v1611_v44, %v1615_v45  ;;  %v6234_v25 = vcombine.low %v1612_v47, %v1616_v2  ;;  %v6493_v44 = vld [vmem:[#allocation11 + $0x30] sm:$0xff]   ;;  %v6397_v45 = vadd.f32 %v6991_v17, %v1630_v36  ;;  %v6495_v2 = vld [vmem:[#allocation11 + $0x78] sm:$0xff]   ;;  %v6501_v17 = vld [vmem:[#allocation11 + $0x100] sm:$0xff]  }
 0x341   :  { %4860 = vmatprep.subr.bf16.mxu1 %v6195_v58  ;;  %v6241_v58 = vcombine.high %v1619_v52, %v1623_v35  ;;  %v6400_v11 = vadd.f32 %v6997_v29, %v1642_v43  ;;  %v6472_v29 = vld [vmem:[#allocation11 + $0xc8] sm:$0xff]   ;;  %v6494_v47 = vld [vmem:[#allocation11 + $0xb0] sm:$0xff]   ;;  %v6500_v35 = vld [vmem:[#allocation11 + $0x1c0] sm:$0xff]  }
 0x342   :  { %v6504_v43 = vld [vmem:[#allocation11 + $0x1c8] sm:$0xff]  }
 0x343   :  { %4697 = vmatpush1.bf16.msra.mxu0 %v6192_v6  ;;  %v6467_v6 = vld [vmem:[#allocation11 + $0x40] sm:$0xff]  }
 0x344   :  { %4861 = vmatpush1.bf16.msra.mxu1 %v6194_v62  ;;  %4698 = vmatprep.subr.bf16.mxu0 %v6201_v3  ;;  %v4884_v62 = vmax.f32 %v6398_v59, 0.0  ;;  %v4886_v3 = vmax.f32 %v6400_v11, 0.0  ;;  %v6509_v59 = vld [vmem:[#allocation11 + $0x110] sm:$0xff]  }
 0x345   :  { %4862 = vmatprep.subr.bf16.mxu1 %v6203_v54  ;;  %v6469_v54 = vld [vmem:[#allocation11] sm:$0xff]   ;;  %v6510_v11 = vld [vmem:[#allocation11 + $0x190] sm:$0xff]  }
 0x346   :  { %v4892_v27 = vpack.c.bf16 %v4884_v62, %v4884_v62  ;;  %v4894_v39 = vpack.c.bf16 %v4886_v3, %v4886_v3  ;;  %v6515_v62 = vld [vmem:[#allocation11 + $0x160] sm:$0xff]  }
 0x347   :  { %4699 = vmatpush1.bf16.msra.mxu0 %v6200_v4  ;;  %v6474_v4 = vld [vmem:[#allocation11 + $0x88] sm:$0xff]   ;;  %v6516_v3 = vld [vmem:[#allocation11 + $0x1e0] sm:$0xff]  }
 0x348   :  { %4863 = vmatpush1.bf16.msra.mxu1 %v6202_v5  ;;  %4700 = vmatprep.subr.bf16.mxu0 %v6209_v9  ;;  %v6475_v5 = vld [vmem:[#allocation11 + $0x50] sm:$0xff]  }
 0x349   :  { %4864 = vmatprep.subr.bf16.mxu1 %v6211_v10  ;;  %v6476_v9 = vld [vmem:[#allocation11 + $0xd0] sm:$0xff]  }
 0x34a   :  { %v6477_v10 = vld [vmem:[#allocation11 + $0x10] sm:$0xff]  }
 0x34b   :  { %4701 = vmatpush1.bf16.msra.mxu0 %v6208_v42  ;;  %v6483_v42 = vld [vmem:[#allocation11 + $0x60] sm:$0xff]  }
 0x34c   :  { %4865 = vmatpush1.bf16.msra.mxu1 %v6210_v20  ;;  %4702 = vmatprep.subr.bf16.mxu0 %v6217_v21  ;;  %v6484_v20 = vld [vmem:[#allocation11 + $0xe0] sm:$0xff]  }
 0x34d   :  { %4866 = vmatprep.subr.bf16.mxu1 %v6219_v13  ;;  %v6485_v21 = vld [vmem:[#allocation11 + $0x20] sm:$0xff]  }
 0x34e   :  { %v6486_v13 = vld [vmem:[#allocation11 + $0xa0] sm:$0xff]  }
 0x34f   :  { %4703 = vmatpush1.bf16.msra.mxu0 %v6216_v28  ;;  %v6490_v28 = vld [vmem:[#allocation11 + $0xa8] sm:$0xff]  }
 0x350   :  { %4867 = vmatpush1.bf16.msra.mxu1 %v6218_v37  ;;  %4704 = vmatprep.subr.bf16.mxu0 %v6225_v38  ;;  %v6491_v37 = vld [vmem:[#allocation11 + $0x70] sm:$0xff]   ;;  %v1638_v38 = vrot.slane %v6999_v48, %v256_v31  ;;  %v6498_v31 = vld [vmem:[#allocation11 + $0xb8] sm:$0xff]  }
 0x351   :  { %4868 = vmatprep.subr.bf16.mxu1 %v6227_v40  ;;  %v6492_v40 = vld [vmem:[#allocation11 + $0xf0] sm:$0xff]  }
 0x352   :  { %v6399_v23 = vadd.f32 %v6993_v18, %v1638_v38 }
 0x353   :  { %4705 = vmatpush1.bf16.msra.mxu0 %v6224_v49  ;;  %v6496_v49 = vld [vmem:[#allocation11 + $0xf8] sm:$0xff]  }
 0x354   :  { %4869 = vmatpush1.bf16.msra.mxu1 %v6226_v50  ;;  %4706 = vmatprep.subr.bf16.mxu0 %v6233_v24  ;;  %v6497_v50 = vld [vmem:[#allocation11 + $0x38] sm:$0xff]   ;;  %v4883_v24 = vmax.f32 %v6397_v45, 0.0  ;;  %v4885_v52 = vmax.f32 %v6399_v23, 0.0 }
 0x355   :  { %4870 = vmatprep.subr.bf16.mxu1 %v6235_v51  ;;  %v6499_v51 = vld [vmem:[#allocation11 + $0x140] sm:$0xff]  }
 0x356   :  { %v4891_v53 = vpack.c.bf16 %v4883_v24, %v4883_v24  ;;  %v4893_v18 = vpack.c.bf16 %v4885_v52, %v4885_v52 }
 0x357   :  { %4707 = vmatpush1.bf16.msra.mxu0 %v6232_v57  ;;  %v6505_v57 = vld [vmem:[#allocation11 + $0x108] sm:$0xff]  }
 0x358   :  { %4871 = vmatpush1.bf16.msra.mxu1 %v6234_v25  ;;  %4708 = vmatprep.subr.bf16.mxu0 %v6241_v58  ;;  %v6506_v25 = vld [vmem:[#allocation11 + $0x188] sm:$0xff]   ;;  %v6507_v58 = vld [vmem:[#allocation11 + $0x150] sm:$0xff]  }
 0x359   :  { %4872 = vmatprep.subr.bf16.mxu1 %v6243_v63  ;;  %v6508_v63 = vld [vmem:[#allocation11 + $0x1d0] sm:$0xff]  }
 0x35b   :  { %4709 = vmatpush1.bf16.msra.mxu0 %v6240_v26  ;;  %v6511_v26 = vld [vmem:[#allocation11 + $0x158] sm:$0xff]  }
 0x35c   :  { %4873 = vmatpush1.bf16.msra.mxu1 %v6242_v61  ;;  %6309 = vmatprep.subr.bf16.mxu0 %v6467_v6  ;;  %v6512_v61 = vld [vmem:[#allocation11 + $0x1d8] sm:$0xff]  }
 0x35d   :  { %6331 = vmatprep.subr.bf16.mxu1 %v6468_v41  ;;  %v6513_v6 = vld [vmem:[#allocation11 + $0x118] sm:$0xff]  }
 0x35e   :  { %4711 = vmatmul.mubr.bf16.vlgmr.msra.gmra.mrb[12].mxu0 %v6973_v56  ;;  %v6514_v41 = vld [vmem:[#allocation11 + $0x198] sm:$0xff]  }
 0x35f   :  { %4875 = vmatmul.mubr.bf16.vlgmr.msra.gmra.mrb[12].mxu1 %v6973_v56  ;;  %6310 = vmatpush3.bf16.msra.mxu0 %v6469_v54  ;;  %v6481_v56 = vld [vmem:[#allocation11 + $0x18] sm:$0xff]   ;;  %v6517_v54 = vld [vmem:[#allocation11 + $0x120] sm:$0xff]  }
 0x360   :  { %5450 = vmatprep.mubr.bf16.mxu0 %v4892_v27  ;;  %6332 = vmatpush3.bf16.msra.mxu1 %v6470_v7  ;;  %v6518_v7 = vld [vmem:[#allocation11 + $0x1a0] sm:$0xff]   ;;  %v6520_v27 = vld [vmem:[#allocation11 + $0x1e8] sm:$0xff]  }
 0x361   :  { %5490 = vmatprep.mubr.bf16.mxu1 %v4894_v39  ;;  %6311 = vmatprep.subr.bf16.mxu0 %v6471_v60  ;;  %v6519_v60 = vld [vmem:[#allocation11 + $0x168] sm:$0xff]  }
 0x362   :  { %6333 = vmatprep.subr.bf16.mxu1 %v6472_v29  ;;  %v6521_v29 = vld [vmem:[#allocation11 + $0x128] sm:$0xff]  }
 0x363   :  { %6312 = vmatpush3.bf16.msra.mxu0 %v6473_v1  ;;  %v6522_v39 = vld [vmem:[#allocation11 + $0x1a8] sm:$0xff]   ;;  %v6523_v1 = vld [vmem:[#allocation11 + $0x170] sm:$0xff]  }
 0x364   :  { %6334 = vmatpush3.bf16.msra.mxu1 %v6474_v4  ;;  %6313 = vmatprep.subr.bf16.mxu0 %v6475_v5  ;;  %v6524_v4 = vld [vmem:[#allocation11 + $0x1f0] sm:$0xff]  }
 0x365   :  { %6335 = vmatprep.subr.bf16.mxu1 %v6476_v9  ;;  %v6525_v5 = vld [vmem:[#allocation11 + $0x130] sm:$0xff]  }
 0x366   :  { %v6526_v9 = vld [vmem:[#allocation11 + $0x1b0] sm:$0xff]  }
 0x367   :  { %6314 = vmatpush3.bf16.msra.mxu0 %v6477_v10  ;;  %v6527_v10 = vld [vmem:[#allocation11 + $0x178] sm:$0xff]  }
 0x368   :  { %6336 = vmatpush3.bf16.msra.mxu1 %v6478_v12  ;;  %6315 = vmatprep.subr.bf16.mxu0 %v6479_v19  ;;  %v6528_v12 = vld [vmem:[#allocation11 + $0x1f8] sm:$0xff]  }
 0x369   :  { %6337 = vmatprep.subr.bf16.mxu1 %v6480_v15  ;;  %v6529_v19 = vld [vmem:[#allocation11 + $0x138] sm:$0xff]  }
 0x36a   :  { %v6530_v15 = vld [vmem:[#allocation11 + $0x1b8] sm:$0xff]  }
 0x36b   :  { %6316 = vmatpush3.bf16.msra.mxu0 %v6481_v56  ;;  %v1646_v56 = vrot.slane %v6999_v48, %v264_v14 }
 0x36c   :  { %6338 = vmatpush3.bf16.msra.mxu1 %v6482_v16  ;;  %6317 = vmatprep.subr.bf16.mxu0 %v6483_v42  ;;  %v1654_v16 = vrot.slane %v6999_v48, %v272_v0  ;;  %v1650_v42 = vrot.slane %v6999_v48, %v268_v46 }
 0x36d   :  { %6339 = vmatprep.subr.bf16.mxu1 %v6484_v20  ;;  %v1658_v20 = vrot.slane %v6999_v48, %v276_v30 }
 0x36f   :  { %6318 = vmatpush3.bf16.msra.mxu0 %v6485_v21 }
 0x370   :  { %6340 = vmatpush3.bf16.msra.mxu1 %v6486_v13  ;;  %6319 = vmatprep.subr.bf16.mxu0 %v6487_v32 }
 0x371   :  { %6341 = vmatprep.subr.bf16.mxu1 %v6488_v33 }
 0x373   :  { %6320 = vmatpush3.bf16.msra.mxu0 %v6489_v34 }
 0x374   :  { %6342 = vmatpush3.bf16.msra.mxu1 %v6490_v28  ;;  %6321 = vmatprep.subr.bf16.mxu0 %v6491_v37 }
 0x375   :  { %6343 = vmatprep.subr.bf16.mxu1 %v6492_v40 }
 0x377   :  { %6322 = vmatpush3.bf16.msra.mxu0 %v6493_v44 }
 0x378   :  { %6344 = vmatpush3.bf16.msra.mxu1 %v6494_v47  ;;  %6323 = vmatprep.subr.bf16.mxu0 %v6495_v2 }
 0x379   :  { %6345 = vmatprep.subr.bf16.mxu1 %v6496_v49 }
 0x37b   :  { %6324 = vmatpush3.bf16.msra.mxu0 %v6497_v50  ;;  %v6244_v50 = vld [vmem:[#allocation13] ss:$0 sm:$0xff] }
 0x37c   :  { %6346 = vmatpush3.bf16.msra.mxu1 %v6498_v31  ;;  %6353 = vmatprep.subr.bf16.mxu0 %v6499_v51 }
 0x37d   :  { %6375 = vmatprep.subr.bf16.mxu1 %v6500_v35 }
 0x37e   :  { %5451 = vmatmul.mubr.bf16.vlgmr.msra.gmra.mrb[16].mxu0 %v4891_v53 }
 0x37f   :  { %5491 = vmatmul.mubr.bf16.vlgmr.msra.gmra.mrb[16].mxu1 %v4893_v18  ;;  %6354 = vmatpush3.bf16.msra.mxu0 %v6501_v17 }
 0x380   :  { %6376 = vmatpush3.bf16.msra.mxu1 %v6502_v55  ;;  %6355 = vmatprep.subr.bf16.mxu0 %v6503_v8 }
 0x381   :  { %6377 = vmatprep.subr.bf16.mxu1 %v6504_v43 }
 0x383   :  { %6356 = vmatpush3.bf16.msra.mxu0 %v6505_v57 }
 0x384   :  { %6378 = vmatpush3.bf16.msra.mxu1 %v6506_v25  ;;  %6357 = vmatprep.subr.bf16.mxu0 %v6507_v58 }
 0x385   :  { %6379 = vmatprep.subr.bf16.mxu1 %v6508_v63 }
 0x387   :  { %6358 = vmatpush3.bf16.msra.mxu0 %v6509_v59 }
 0x388   :  { %6380 = vmatpush3.bf16.msra.mxu1 %v6510_v11  ;;  %6359 = vmatprep.subr.bf16.mxu0 %v6511_v26 }
 0x389   :  { %6381 = vmatprep.subr.bf16.mxu1 %v6512_v61 }
 0x38b   :  { %6360 = vmatpush3.bf16.msra.mxu0 %v6513_v6 }
 0x38c   :  { %6382 = vmatpush3.bf16.msra.mxu1 %v6514_v41  ;;  %6361 = vmatprep.subr.bf16.mxu0 %v6515_v62 }
 0x38d   :  { %6383 = vmatprep.subr.bf16.mxu1 %v6516_v3 }
 0x38f   :  { %6362 = vmatpush3.bf16.msra.mxu0 %v6517_v54 }
 0x390   :  { %6384 = vmatpush3.bf16.msra.mxu1 %v6518_v7  ;;  %6363 = vmatprep.subr.bf16.mxu0 %v6519_v60 }
 0x391   :  { %6385 = vmatprep.subr.bf16.mxu1 %v6520_v27 }
 0x393   :  { %6364 = vmatpush3.bf16.msra.mxu0 %v6521_v29 }
 0x394   :  { %6386 = vmatpush3.bf16.msra.mxu1 %v6522_v39  ;;  %6365 = vmatprep.subr.bf16.mxu0 %v6523_v1 }
 0x395   :  { %6387 = vmatprep.subr.bf16.mxu1 %v6524_v4 }
 0x397   :  { %6366 = vmatpush3.bf16.msra.mxu0 %v6525_v5 }
 0x398   :  { %6388 = vmatpush3.bf16.msra.mxu1 %v6526_v9  ;;  %6367 = vmatprep.subr.bf16.mxu0 %v6527_v10 }
 0x399   :  { %6389 = vmatprep.subr.bf16.mxu1 %v6528_v12 }
 0x39b   :  { %6368 = vmatpush3.bf16.msra.mxu0 %v6529_v19 }
 0x39c   :  { %6390 = vmatpush3.bf16.msra.mxu1 %v6530_v15 }
 0x431   :  { %v4712_v21 = vpop.f32.mrb[12].mxu0 }
 0x432   :  { %v6401_v13 = vadd.f32 %v4712_v21, %v1646_v56  ;;  %v4876_v32 = vpop.f32.mrb[12].mxu1  ;;  %v4714_v33 = vpop.f32.mrb[13].mxu0 }
 0x433   :  { %v6403_v34 = vadd.f32 %v4876_v32, %v1654_v16  ;;  %v6402_v36 = vadd.f32 %v4714_v33, %v1650_v42  ;;  %v4878_v28 = vpop.f32.mrb[13].mxu1  ;;  %v4716_v14 = vpop.f32.mrb[14].mxu0 }
 0x434   :  { %v4887_v37 = vmax.f32 %v6401_v13, 0.0  ;;  %v6404_v38 = vadd.f32 %v4878_v28, %v1658_v20  ;;  %v4880_v40 = vpop.f32.mrb[14].mxu1  ;;  %v4717_v0 = vpop.f32.mrb[15].mxu0 }
 0x435   :  { %v4889_v44 = vmax.f32 %v6403_v34, 0.0  ;;  %v4888_v45 = vmax.f32 %v6402_v36, 0.0  ;;  %v4881_v47 = vpop.f32.mrb[15].mxu1 }
 0x436   :  { %v4890_v46 = vmax.f32 %v6404_v38, 0.0  ;;  %v4895_v22 = vpack.c.bf16 %v4887_v37, %v4887_v37 }
 0x437   :  { %v4896_v2 = vpack.c.bf16 %v4888_v45, %v4888_v45  ;;  %v4897_v30 = vpack.c.bf16 %v4889_v44, %v4889_v44 }
 0x438   :  { %v4898_v23 = vpack.c.bf16 %v4890_v46, %v4890_v46 }
 0x439   :  { %5530 = vmatprep.mubr.bf16.mxu0 %v4896_v2 }
 0x43a   :  { %5570 = vmatprep.mubr.bf16.mxu1 %v4898_v23  ;;  %5531 = vmatmul.mubr.bf16.vlgmr.msra.gmra.mrb[20].mxu0 %v4895_v22 }
 0x43b   :  { %5571 = vmatmul.mubr.bf16.vlgmr.msra.gmra.mrb[20].mxu1 %v4897_v30 }
 0x451   :  { %v6325_v48 = vpop.f32.mrb[16].mxu0 }
 0x452   :  { %v6347_v49 = vpop.f32.mrb[16].mxu1  ;;  %v6326_v24 = vpop.f32.mrb[17].mxu0 }
 0x453   :  { %v6327_v31 = vadd.f32 %v6326_v24, %v6325_v48  ;;  %v6348_v51 = vpop.f32.mrb[17].mxu1  ;;  %v6328_v52 = vpop.f32.mrb[18].mxu0 }
 0x454   :  { %v6349_v35 = vadd.f32 %v6348_v51, %v6347_v49  ;;  %v6350_v17 = vpop.f32.mrb[18].mxu1  ;;  %v6329_v53 = vpop.f32.mrb[19].mxu0 }
 0x455   :  { %v5453_v55 = vadd.f32 %v6327_v31, %v6244_v50  ;;  %v6351_v8 = vpop.f32.mrb[19].mxu1 }
 0x457   :  { %v5493_v18 = vadd.f32 %v6349_v35, %v5453_v55 }
 0x50d   :  { %v6369_v43 = vpop.f32.mrb[20].mxu0 }
 0x50e   :  { %v6391_v57 = vpop.f32.mrb[20].mxu1  ;;  %v6370_v25 = vpop.f32.mrb[21].mxu0 }
 0x50f   :  { %v6371_v58 = vadd.f32 %v6370_v25, %v6369_v43  ;;  %v6392_v63 = vpop.f32.mrb[21].mxu1  ;;  %v6372_v59 = vpop.f32.mrb[22].mxu0 }
 0x510   :  { %v6393_v11 = vadd.f32 %v6392_v63, %v6391_v57  ;;  %v6394_v26 = vpop.f32.mrb[22].mxu1  ;;  %v6373_v61 = vpop.f32.mrb[23].mxu0 }
 0x511   :  { %v5533_v6 = vadd.f32 %v6371_v58, %v5493_v18  ;;  %v6395_v41 = vpop.f32.mrb[23].mxu1 }
 0x513   :  { %v5573_v62 = vadd.f32 %v6393_v11, %v5533_v6 }
 0x515   :  { %v5578_v3 = vsub.f32 0.0, %v5573_v62 }
 0x517   :  { %v5579_v54 = vmul.f32 1.442695, %v5578_v3 }
 0x519   :  { %6531 = vpow2.f32 %v5579_v54 }
 0x523   :  { %v6532_v7 = vpop.eup %6531 }
 0x524   :  { %v5581_v60 = vadd.f32 1.0, %v6532_v7 }
 0x526   :  { %6533 = vrcp.f32 %v5581_v60 }
 0x530   :  { %v6534_v27 = vpop.eup %6533 }
 0x531   :  { %5583 = vst [vmem:[#allocation14] sm:$0xff] %v6534_v27 }
 0x532   :  { %6701 = shalt.err (!%p6698_p4)
}
 0x533   :  { %s6702_s11 = scalar_lea.hbm %s7050_s7, 128 }
 0x534   :  { %p6703_p5 = scmp.ne.s32.totalorder %s7050_s7, %s6702_s11  ;;  %p6706_p6 = scmp.lt.u32.totalorder %s6702_s11, %s7050_s7 }
 0x536   :  { %p6708_p7 = pnand %p6706_p6, %p6703_p5 }
 0x538   :  { %6711 = shalt.err (!%p6708_p7)
}
 0x539   :  { %5593 = dma.vmem_to_hbm [thread:$0]  %s5591_s13, 128, %s7050_s7, [#allocation4]  }
 0x53a   :  { %6720 = dma.done.wait [#allocation4], 128  }
 0x53b   :  { %6721 = vsyncadd [#allocation4], 4294967168 }
 0x53c   :  { %5597 = vsyncpa [#allocation3], 1 }
 0x53d   :  { %5598 = vsyncpa [#allocation6], 1 }
 0x53e   :  { %5599 = vsyncpa [#allocation9], 1 }
 0x53f   :  { %5600 = vsyncpa [#allocation12], 1 }
 0x540   :  { %5601 = vsyncpa [#allocation4], 1 }

</bundles_post_ra>
